<compile_context>
chip_gen: v6e
topology: v6e:2x2x1
jax: 0.10.0
libtpu: 0.0.40
codegen_flags: <defaults>
</compile_context>

<pallas_src>
import functools

import numpy as np
import jax
import jax.numpy as jnp
from jax.experimental import pallas as pl
from jax.experimental.pallas import tpu as pltpu

K = 3        # kernel_size
PAD = 1      # ConvTranspose2d padding
STRIDE = 1
EPS = 1e-5   # BatchNorm2d eps
LANE = 128


def _round_up(x, m):
    return (x + m - 1) // m * m


def _pick_row_tile(mrows, cap=2048):
    """Largest (16-, then 8-) multiple divisor of mrows not exceeding cap, else full extent."""
    if mrows <= cap:
        return mrows
    for step in (16, 8):
        if mrows % step == 0:
            best = step
            for d in range(step, cap + 1, step):
                if mrows % d == 0:
                    best = d
            return best
    return mrows  # full-extent block is always legal


# ---------------------------------------------------------------------------
# Kernel A: fused deconv (9 shifted matmuls) + bias + per-step partial BN stats.
# ---------------------------------------------------------------------------
def deconv_kernel(x_ref, w_ref, b_ref, m_ref, y_ref, ps_ref, pss_ref,
                  *, shifts, mrows, cp):
    # x_ref  : (Lp, Cin)       bf16  flattened zero-padded NHWC rows, one batch element
    # w_ref  : (K*K, Cin, Cp)  bf16  per-tap correlation weights, Cout padded to Cp lanes
    # b_ref  : (1, Cp)         f32   conv bias (padded)
    # m_ref  : (mrows, 1)      f32   1.0 for valid output columns, 0.0 for row-padding junk
    # y_ref  : (mrows, Cp)     bf16  deconv output in the padded-row frame (lane dense)
    # ps_ref, pss_ref : (1, Cp) f32  per-grid-step partial sum / sum-of-squares
    acc = jnp.broadcast_to(b_ref[...], (mrows, cp))     # bias folded into the accumulator
    for t, s in enumerate(shifts):                       # static, unrolled at trace time
        xt = x_ref[s:s + mrows, :]                       # contiguous row slice (mrows, Cin)
        acc = acc + jnp.dot(xt, w_ref[t], preferred_element_type=jnp.float32)
    y_ref[...] = acc.astype(y_ref.dtype)                 # bf16 intermediate -> less HBM traffic

    m = m_ref[...]                                       # mask junk columns out of the stats
    am = acc * m                                         # stats stay in f32
    ps_ref[...] = jnp.sum(am, axis=0, keepdims=True)
    pss_ref[...] = jnp.sum(am * acc, axis=0, keepdims=True)


# ---------------------------------------------------------------------------
# Kernel B: BatchNorm (pre-folded scale/shift) + ReLU, elementwise, lane dense, row tiled.
# ---------------------------------------------------------------------------
def bn_relu_kernel(y_ref, scale_ref, shift_ref, o_ref):
    y = y_ref[...].astype(jnp.float32)
    o_ref[...] = jnp.maximum(y * scale_ref[...] + shift_ref[...], 0.0)


# ---------------------------------------------------------------------------
# Wrapper reproducing DeconvBlock.forward (training-mode BatchNorm).
# ---------------------------------------------------------------------------
@jax.jit
def deconv_block_forward(x_nchw, w_pt, bias, gamma, beta):
    """x_nchw: (N, Cin, H, W) f32.  w_pt: (Cin, Cout, K, K) PyTorch ConvTranspose2d weight."""
    N, Cin, H, W = x_nchw.shape
    Cout = w_pt.shape[1]
    # stride=1, padding=1, k=3 -> output spatial == input spatial
    pad = K - 1 - PAD
    Hp, Wp = H + 2 * pad, W + 2 * pad
    mrows = H * Wp                                   # padded-output-frame rows per batch elem
    shifts = tuple(kh * Wp + kw for kh in range(K) for kw in range(K))
    Lp = _round_up(max(Hp * Wp, shifts[-1] + mrows), 8)
    Cp = _round_up(Cout, LANE)

    # NCHW -> zero-padded NHWC, flattened over (Hp, Wp), cast to bf16 for the MXU.
    x = jnp.transpose(x_nchw, (0, 2, 3, 1))
    xp = jnp.pad(x, ((0, 0), (pad, pad), (pad, pad), (0, 0)))
    xflat = xp.reshape(N, Hp * Wp, Cin)
    xflat = jnp.pad(xflat, ((0, 0), (0, Lp - Hp * Wp), (0, 0))).astype(jnp.bfloat16)

    # ConvTranspose2d(stride=1) == correlation with flipped kernel, in/out channels swapped.
    # w_taps[kh*K+kw, ci, co] = w_pt[ci, co, K-1-kh, K-1-kw], zero-padded to Cp lanes.
    wc = jnp.transpose(w_pt[:, :, ::-1, ::-1], (2, 3, 0, 1))          # (K, K, Cin, Cout)
    w_taps = jnp.pad(wc.reshape(K * K, Cin, Cout),
                     ((0, 0), (0, 0), (0, Cp - Cout))).astype(jnp.bfloat16)

    bias_p = jnp.pad(bias.astype(jnp.float32), (0, Cp - Cout)).reshape(1, Cp)

    # Valid-column mask over the padded-output frame: row q is valid iff (q % Wp) < W.
    col = jnp.arange(mrows, dtype=jnp.int32) % Wp
    mask = (col < W).astype(jnp.float32).reshape(mrows, 1)

    kernel_a = functools.partial(deconv_kernel, shifts=shifts, mrows=mrows, cp=Cp)

    y_pad, ps, pss = pl.pallas_call(
        kernel_a,
        out_shape=(
            jax.ShapeDtypeStruct((N, mrows, Cp), jnp.bfloat16),
            jax.ShapeDtypeStruct((N, 1, Cp), jnp.float32),
            jax.ShapeDtypeStruct((N, 1, Cp), jnp.float32),
        ),
        grid_spec=pltpu.PrefetchScalarGridSpec(
            num_scalar_prefetch=0,
            grid=(N,),
            in_specs=[
                pl.BlockSpec((None, Lp, Cin), lambda n: (n, 0, 0)),
                pl.BlockSpec((K * K, Cin, Cp), lambda n: (0, 0, 0)),
                pl.BlockSpec((1, Cp), lambda n: (0, 0)),
                pl.BlockSpec((mrows, 1), lambda n: (0, 0)),
            ],
            out_specs=(
                pl.BlockSpec((None, mrows, Cp), lambda n: (n, 0, 0)),
                pl.BlockSpec((None, 1, Cp), lambda n: (n, 0, 0)),
                pl.BlockSpec((None, 1, Cp), lambda n: (n, 0, 0)),
            ),
        ),
        compiler_params=pltpu.CompilerParams(dimension_semantics=("parallel",)),
    )(xflat, w_taps, bias_p, mask)

    # BatchNorm2d training-mode statistics (biased variance), folded into scale/shift.
    cnt = jnp.float32(N * H * W)
    s = jnp.sum(ps[:, 0, :], axis=0)
    ss = jnp.sum(pss[:, 0, :], axis=0)
    mean = s / cnt
    var = jnp.maximum(ss / cnt - mean * mean, 0.0)
    inv = jax.lax.rsqrt(var + EPS)
    g = jnp.pad(gamma.astype(jnp.float32), (0, Cp - Cout))
    b = jnp.pad(beta.astype(jnp.float32), (0, Cp - Cout))
    scale = (g * inv).reshape(1, Cp)
    shift = (b - mean * g * inv).reshape(1, Cp)

    # Row-tiled elementwise BN + ReLU pass.
    tr = _pick_row_tile(mrows)
    n_row_tiles = mrows // tr

    out_pad = pl.pallas_call(
        bn_relu_kernel,
        out_shape=jax.ShapeDtypeStruct((N, mrows, Cp), jnp.float32),
        grid_spec=pltpu.PrefetchScalarGridSpec(
            num_scalar_prefetch=0,
            grid=(N, n_row_tiles),
            in_specs=[
                pl.BlockSpec((None, tr, Cp), lambda n, r: (n, r, 0)),
                pl.BlockSpec((1, Cp), lambda n, r: (0, 0)),
                pl.BlockSpec((1, Cp), lambda n, r: (0, 0)),
            ],
            out_specs=pl.BlockSpec((None, tr, Cp), lambda n, r: (n, r, 0)),
        ),
        compiler_params=pltpu.CompilerParams(
            dimension_semantics=("parallel", "parallel")),
    )(y_pad, scale, shift)

    # (N, H*Wp, Cp) -> drop junk columns / padded channels -> NCHW
    out = out_pad.reshape(N, H, Wp, Cp)[:, :, :W, :Cout]
    return jnp.transpose(out, (0, 3, 1, 2))


# ---------------------------------------------------------------------------
# Pure-numpy reference (direct ConvTranspose2d + training-mode BN + ReLU).
# ---------------------------------------------------------------------------
def ref_deconv_block(x, w, b, gamma, beta):
    N, Cin, H, W = x.shape
    Cout = w.shape[1]
    Ho = (H - 1) * STRIDE - 2 * PAD + K
    Wo = (W - 1) * STRIDE - 2 * PAD + K
    y = np.zeros((N, Cout, Ho, Wo), np.float32)
    for kh in range(K):
        for kw in range(K):
            wk = w[:, :, kh, kw]                     # (Cin, Cout)
            for i in range(H):
                oh = i * STRIDE + kh - PAD
                if not (0 <= oh < Ho):
                    continue
                for j in range(W):
                    ow = j * STRIDE + kw - PAD
                    if not (0 <= ow < Wo):
                        continue
                    y[:, :, oh, ow] += x[:, :, i, j] @ wk
    y += b[None, :, None, None]
    mean = y.mean(axis=(0, 2, 3), keepdims=True)
    var = y.var(axis=(0, 2, 3), keepdims=True)        # biased, as BN training uses
    yn = (y - mean) / np.sqrt(var + EPS)
    yn = yn * gamma[None, :, None, None] + beta[None, :, None, None]
    return np.maximum(yn, 0.0)


if __name__ == "__main__":
    N, Cin, Cout, H, W = 2, 4, 8, 16, 16

    key = jax.random.PRNGKey(0)
    kx, kw, kb = jax.random.split(key, 3)
    x = jax.random.normal(kx, (N, Cin, H, W), jnp.float32)
    w_pt = jax.random.normal(kw, (Cin, Cout, K, K), jnp.float32) * 0.1   # ConvTranspose2d weight
    bias = jax.random.normal(kb, (Cout,), jnp.float32) * 0.1
    gamma = jnp.ones((Cout,), jnp.float32)    # BatchNorm2d default affine init
    beta = jnp.zeros((Cout,), jnp.float32)

    out = deconv_block_forward(x, w_pt, bias, gamma, beta)
    out = jax.block_until_ready(out)

    ref = ref_deconv_block(np.asarray(x), np.asarray(w_pt), np.asarray(bias),
                           np.asarray(gamma), np.asarray(beta))
    # bf16 MXU operands + bf16 intermediate storage (f32 stats/accumulation)
    # -> slightly looser tolerance than pure f32.
    np.testing.assert_allclose(np.asarray(out), ref, rtol=3e-2, atol=3e-2)

    print("KERNEL_OK")
</pallas_src>

<mosaic_0001>
module attributes {stable_mosaic.version = 11 : i64} {
  func.func @deconv_kernel(%arg0: i32, %arg1: memref<1x328x4xbf16, #tpu.memory_space<vmem>>, %arg2: memref<9x4x128xbf16, #tpu.memory_space<vmem>>, %arg3: memref<1x128xf32, #tpu.memory_space<vmem>>, %arg4: memref<288x1xf32, #tpu.memory_space<vmem>>, %arg5: memref<1x288x128xbf16, #tpu.memory_space<vmem>>, %arg6: memref<1x1x128xf32, #tpu.memory_space<vmem>>, %arg7: memref<1x1x128xf32, #tpu.memory_space<vmem>>) attributes {dimension_semantics = [#tpu.dimension_semantics<parallel>], iteration_bounds = array<i64: 2>, scalar_prefetch = 0 : i64, scratch_operands = 0 : i64, tpu.core_type = #tpu.core_type<tc>, window_params = [{transform_indices = @transform_0, window_bounds = array<i64: 1, 328, 4>}, {pipeline_mode = #tpu.pipeline_mode<synchronous>, transform_indices = @transform_1, window_bounds = array<i64: 9, 4, 128>}, {pipeline_mode = #tpu.pipeline_mode<synchronous>, transform_indices = @transform_2, window_bounds = array<i64: 1, 128>}, {pipeline_mode = #tpu.pipeline_mode<synchronous>, transform_indices = @transform_3, window_bounds = array<i64: 288, 1>}, {transform_indices = @transform_4, window_bounds = array<i64: 1, 288, 128>}, {transform_indices = @transform_5, window_bounds = array<i64: 1, 1, 128>}, {transform_indices = @transform_6, window_bounds = array<i64: 1, 1, 128>}]} {
    %c0 = arith.constant 0 : index
    %c0_0 = arith.constant 0 : index
    %0 = vector.load %arg3[%c0, %c0_0] : memref<1x128xf32, #tpu.memory_space<vmem>>, vector<1x128xf32>
    %1 = vector.shape_cast %0 : vector<1x128xf32> to vector<1x128xf32>
    %2 = vector.broadcast %1 : vector<1x128xf32> to vector<288x128xf32>
    %c0_1 = arith.constant 0 : index
    %c0_2 = arith.constant 0 : index
    %c0_3 = arith.constant 0 : index
    %3 = vector.load %arg1[%c0_1, %c0_2, %c0_3] : memref<1x328x4xbf16, #tpu.memory_space<vmem>>, vector<1x288x4xbf16>
    %4 = vector.shape_cast %3 : vector<1x288x4xbf16> to vector<288x4xbf16>
    %c0_4 = arith.constant 0 : index
    %c0_5 = arith.constant 0 : index
    %c0_6 = arith.constant 0 : index
    %5 = vector.load %arg2[%c0_4, %c0_5, %c0_6] : memref<9x4x128xbf16, #tpu.memory_space<vmem>>, vector<1x4x128xbf16>
    %6 = vector.shape_cast %5 : vector<1x4x128xbf16> to vector<4x128xbf16>
    %cst = arith.constant dense<0.000000e+00> : vector<288x128xf32>
    %7 = tpu.matmul %4, %6, %cst {dimension_numbers = #tpu.dot_dimension_numbers<[1], [0], [0], [1], [0, 0, 1, 1], [], []>} : vector<288x4xbf16>, vector<4x128xbf16>, vector<288x128xf32> -> vector<288x128xf32>
    %8 = arith.addf %2, %7 : vector<288x128xf32>
    %c0_7 = arith.constant 0 : index
    %c1 = arith.constant 1 : index
    %c0_8 = arith.constant 0 : index
    %9 = vector.load %arg1[%c0_7, %c1, %c0_8] : memref<1x328x4xbf16, #tpu.memory_space<vmem>>, vector<1x288x4xbf16>
    %10 = vector.shape_cast %9 : vector<1x288x4xbf16> to vector<288x4xbf16>
    %c1_9 = arith.constant 1 : index
    %c0_10 = arith.constant 0 : index
    %c0_11 = arith.constant 0 : index
    %11 = vector.load %arg2[%c1_9, %c0_10, %c0_11] : memref<9x4x128xbf16, #tpu.memory_space<vmem>>, vector<1x4x128xbf16>
    %12 = vector.shape_cast %11 : vector<1x4x128xbf16> to vector<4x128xbf16>
    %cst_12 = arith.constant dense<0.000000e+00> : vector<288x128xf32>
    %13 = tpu.matmul %10, %12, %cst_12 {dimension_numbers = #tpu.dot_dimension_numbers<[1], [0], [0], [1], [0, 0, 1, 1], [], []>} : vector<288x4xbf16>, vector<4x128xbf16>, vector<288x128xf32> -> vector<288x128xf32>
    %14 = arith.addf %8, %13 : vector<288x128xf32>
    %c0_13 = arith.constant 0 : index
    %c2 = arith.constant 2 : index
    %c0_14 = arith.constant 0 : index
    %15 = vector.load %arg1[%c0_13, %c2, %c0_14] : memref<1x328x4xbf16, #tpu.memory_space<vmem>>, vector<1x288x4xbf16>
    %16 = vector.shape_cast %15 : vector<1x288x4xbf16> to vector<288x4xbf16>
    %c2_15 = arith.constant 2 : index
    %c0_16 = arith.constant 0 : index
    %c0_17 = arith.constant 0 : index
    %17 = vector.load %arg2[%c2_15, %c0_16, %c0_17] : memref<9x4x128xbf16, #tpu.memory_space<vmem>>, vector<1x4x128xbf16>
    %18 = vector.shape_cast %17 : vector<1x4x128xbf16> to vector<4x128xbf16>
    %cst_18 = arith.constant dense<0.000000e+00> : vector<288x128xf32>
    %19 = tpu.matmul %16, %18, %cst_18 {dimension_numbers = #tpu.dot_dimension_numbers<[1], [0], [0], [1], [0, 0, 1, 1], [], []>} : vector<288x4xbf16>, vector<4x128xbf16>, vector<288x128xf32> -> vector<288x128xf32>
    %20 = arith.addf %14, %19 : vector<288x128xf32>
    %c0_19 = arith.constant 0 : index
    %c18 = arith.constant 18 : index
    %c0_20 = arith.constant 0 : index
    %21 = vector.load %arg1[%c0_19, %c18, %c0_20] : memref<1x328x4xbf16, #tpu.memory_space<vmem>>, vector<1x288x4xbf16>
    %22 = vector.shape_cast %21 : vector<1x288x4xbf16> to vector<288x4xbf16>
    %c3 = arith.constant 3 : index
    %c0_21 = arith.constant 0 : index
    %c0_22 = arith.constant 0 : index
    %23 = vector.load %arg2[%c3, %c0_21, %c0_22] : memref<9x4x128xbf16, #tpu.memory_space<vmem>>, vector<1x4x128xbf16>
    %24 = vector.shape_cast %23 : vector<1x4x128xbf16> to vector<4x128xbf16>
    %cst_23 = arith.constant dense<0.000000e+00> : vector<288x128xf32>
    %25 = tpu.matmul %22, %24, %cst_23 {dimension_numbers = #tpu.dot_dimension_numbers<[1], [0], [0], [1], [0, 0, 1, 1], [], []>} : vector<288x4xbf16>, vector<4x128xbf16>, vector<288x128xf32> -> vector<288x128xf32>
    %26 = arith.addf %20, %25 : vector<288x128xf32>
    %c0_24 = arith.constant 0 : index
    %c19 = arith.constant 19 : index
    %c0_25 = arith.constant 0 : index
    %27 = vector.load %arg1[%c0_24, %c19, %c0_25] : memref<1x328x4xbf16, #tpu.memory_space<vmem>>, vector<1x288x4xbf16>
    %28 = vector.shape_cast %27 : vector<1x288x4xbf16> to vector<288x4xbf16>
    %c4 = arith.constant 4 : index
    %c0_26 = arith.constant 0 : index
    %c0_27 = arith.constant 0 : index
    %29 = vector.load %arg2[%c4, %c0_26, %c0_27] : memref<9x4x128xbf16, #tpu.memory_space<vmem>>, vector<1x4x128xbf16>
    %30 = vector.shape_cast %29 : vector<1x4x128xbf16> to vector<4x128xbf16>
    %cst_28 = arith.constant dense<0.000000e+00> : vector<288x128xf32>
    %31 = tpu.matmul %28, %30, %cst_28 {dimension_numbers = #tpu.dot_dimension_numbers<[1], [0], [0], [1], [0, 0, 1, 1], [], []>} : vector<288x4xbf16>, vector<4x128xbf16>, vector<288x128xf32> -> vector<288x128xf32>
    %32 = arith.addf %26, %31 : vector<288x128xf32>
    %c0_29 = arith.constant 0 : index
    %c20 = arith.constant 20 : index
    %c0_30 = arith.constant 0 : index
    %33 = vector.load %arg1[%c0_29, %c20, %c0_30] : memref<1x328x4xbf16, #tpu.memory_space<vmem>>, vector<1x288x4xbf16>
    %34 = vector.shape_cast %33 : vector<1x288x4xbf16> to vector<288x4xbf16>
    %c5 = arith.constant 5 : index
    %c0_31 = arith.constant 0 : index
    %c0_32 = arith.constant 0 : index
    %35 = vector.load %arg2[%c5, %c0_31, %c0_32] : memref<9x4x128xbf16, #tpu.memory_space<vmem>>, vector<1x4x128xbf16>
    %36 = vector.shape_cast %35 : vector<1x4x128xbf16> to vector<4x128xbf16>
    %cst_33 = arith.constant dense<0.000000e+00> : vector<288x128xf32>
    %37 = tpu.matmul %34, %36, %cst_33 {dimension_numbers = #tpu.dot_dimension_numbers<[1], [0], [0], [1], [0, 0, 1, 1], [], []>} : vector<288x4xbf16>, vector<4x128xbf16>, vector<288x128xf32> -> vector<288x128xf32>
    %38 = arith.addf %32, %37 : vector<288x128xf32>
    %c0_34 = arith.constant 0 : index
    %c36 = arith.constant 36 : index
    %c0_35 = arith.constant 0 : index
    %39 = vector.load %arg1[%c0_34, %c36, %c0_35] : memref<1x328x4xbf16, #tpu.memory_space<vmem>>, vector<1x288x4xbf16>
    %40 = vector.shape_cast %39 : vector<1x288x4xbf16> to vector<288x4xbf16>
    %c6 = arith.constant 6 : index
    %c0_36 = arith.constant 0 : index
    %c0_37 = arith.constant 0 : index
    %41 = vector.load %arg2[%c6, %c0_36, %c0_37] : memref<9x4x128xbf16, #tpu.memory_space<vmem>>, vector<1x4x128xbf16>
    %42 = vector.shape_cast %41 : vector<1x4x128xbf16> to vector<4x128xbf16>
    %cst_38 = arith.constant dense<0.000000e+00> : vector<288x128xf32>
    %43 = tpu.matmul %40, %42, %cst_38 {dimension_numbers = #tpu.dot_dimension_numbers<[1], [0], [0], [1], [0, 0, 1, 1], [], []>} : vector<288x4xbf16>, vector<4x128xbf16>, vector<288x128xf32> -> vector<288x128xf32>
    %44 = arith.addf %38, %43 : vector<288x128xf32>
    %c0_39 = arith.constant 0 : index
    %c37 = arith.constant 37 : index
    %c0_40 = arith.constant 0 : index
    %45 = vector.load %arg1[%c0_39, %c37, %c0_40] : memref<1x328x4xbf16, #tpu.memory_space<vmem>>, vector<1x288x4xbf16>
    %46 = vector.shape_cast %45 : vector<1x288x4xbf16> to vector<288x4xbf16>
    %c7 = arith.constant 7 : index
    %c0_41 = arith.constant 0 : index
    %c0_42 = arith.constant 0 : index
    %47 = vector.load %arg2[%c7, %c0_41, %c0_42] : memref<9x4x128xbf16, #tpu.memory_space<vmem>>, vector<1x4x128xbf16>
    %48 = vector.shape_cast %47 : vector<1x4x128xbf16> to vector<4x128xbf16>
    %cst_43 = arith.constant dense<0.000000e+00> : vector<288x128xf32>
    %49 = tpu.matmul %46, %48, %cst_43 {dimension_numbers = #tpu.dot_dimension_numbers<[1], [0], [0], [1], [0, 0, 1, 1], [], []>} : vector<288x4xbf16>, vector<4x128xbf16>, vector<288x128xf32> -> vector<288x128xf32>
    %50 = arith.addf %44, %49 : vector<288x128xf32>
    %c0_44 = arith.constant 0 : index
    %c38 = arith.constant 38 : index
    %c0_45 = arith.constant 0 : index
    %51 = vector.load %arg1[%c0_44, %c38, %c0_45] : memref<1x328x4xbf16, #tpu.memory_space<vmem>>, vector<1x288x4xbf16>
    %52 = vector.shape_cast %51 : vector<1x288x4xbf16> to vector<288x4xbf16>
    %c8 = arith.constant 8 : index
    %c0_46 = arith.constant 0 : index
    %c0_47 = arith.constant 0 : index
    %53 = vector.load %arg2[%c8, %c0_46, %c0_47] : memref<9x4x128xbf16, #tpu.memory_space<vmem>>, vector<1x4x128xbf16>
    %54 = vector.shape_cast %53 : vector<1x4x128xbf16> to vector<4x128xbf16>
    %cst_48 = arith.constant dense<0.000000e+00> : vector<288x128xf32>
    %55 = tpu.matmul %52, %54, %cst_48 {dimension_numbers = #tpu.dot_dimension_numbers<[1], [0], [0], [1], [0, 0, 1, 1], [], []>} : vector<288x4xbf16>, vector<4x128xbf16>, vector<288x128xf32> -> vector<288x128xf32>
    %56 = arith.addf %50, %55 : vector<288x128xf32>
    %57 = arith.truncf %56 : vector<288x128xf32> to vector<288x128xbf16>
    %c0_49 = arith.constant 0 : index
    %c0_50 = arith.constant 0 : index
    %c0_51 = arith.constant 0 : index
    %58 = vector.load %arg5[%c0_49, %c0_50, %c0_51] : memref<1x288x128xbf16, #tpu.memory_space<vmem>>, vector<1x288x128xbf16>
    %59 = vector.shape_cast %58 : vector<1x288x128xbf16> to vector<288x128xbf16>
    %60 = vector.shape_cast %57 : vector<288x128xbf16> to vector<1x288x128xbf16>
    tpu.vector_store %arg5[%c0_49, %c0_50, %c0_51], %60 {strides = array<i32>} : memref<1x288x128xbf16, #tpu.memory_space<vmem>>, vector<1x288x128xbf16>,
    %c0_52 = arith.constant 0 : index
    %c0_53 = arith.constant 0 : index
    %61 = vector.load %arg4[%c0_52, %c0_53] : memref<288x1xf32, #tpu.memory_space<vmem>>, vector<288x1xf32>
    %62 = vector.broadcast %61 : vector<288x1xf32> to vector<288x128xf32>
    %63 = arith.mulf %56, %62 : vector<288x128xf32>
    %cst_54 = arith.constant dense<0.000000e+00> : vector<128xf32>
    %64 = vector.multi_reduction <add>, %63, %cst_54 [0] : vector<288x128xf32> to vector<128xf32>
    %65 = vector.shape_cast %64 : vector<128xf32> to vector<1x128xf32>
    %c0_55 = arith.constant 0 : index
    %c0_56 = arith.constant 0 : index
    %c0_57 = arith.constant 0 : index
    %66 = vector.load %arg6[%c0_55, %c0_56, %c0_57] : memref<1x1x128xf32, #tpu.memory_space<vmem>>, vector<1x1x128xf32>
    %67 = vector.shape_cast %66 : vector<1x1x128xf32> to vector<1x128xf32>
    %68 = vector.shape_cast %65 : vector<1x128xf32> to vector<1x1x128xf32>
    tpu.vector_store %arg6[%c0_55, %c0_56, %c0_57], %68 {strides = array<i32>} : memref<1x1x128xf32, #tpu.memory_space<vmem>>, vector<1x1x128xf32>,
    %69 = arith.mulf %63, %56 : vector<288x128xf32>
    %cst_58 = arith.constant dense<0.000000e+00> : vector<128xf32>
    %70 = vector.multi_reduction <add>, %69, %cst_58 [0] : vector<288x128xf32> to vector<128xf32>
    %71 = vector.shape_cast %70 : vector<128xf32> to vector<1x128xf32>
    %c0_59 = arith.constant 0 : index
    %c0_60 = arith.constant 0 : index
    %c0_61 = arith.constant 0 : index
    %72 = vector.load %arg7[%c0_59, %c0_60, %c0_61] : memref<1x1x128xf32, #tpu.memory_space<vmem>>, vector<1x1x128xf32>
    %73 = vector.shape_cast %72 : vector<1x1x128xf32> to vector<1x128xf32>
    %74 = vector.shape_cast %71 : vector<1x128xf32> to vector<1x1x128xf32>
    tpu.vector_store %arg7[%c0_59, %c0_60, %c0_61], %74 {strides = array<i32>} : memref<1x1x128xf32, #tpu.memory_space<vmem>>, vector<1x1x128xf32>,
    return
  }
  func.func @transform_0(%arg0: i32) -> (i32, i32, i32) {
    %c0_i32 = arith.constant 0 : i32
    %c0_i32_0 = arith.constant 0 : i32
    %c0_i32_1 = arith.constant 0 : i32
    return %arg0, %c0_i32, %c0_i32_0 : i32, i32, i32
  }
  func.func @transform_1(%arg0: i32) -> (i32, i32, i32) {
    %c0_i32 = arith.constant 0 : i32
    %c0_i32_0 = arith.constant 0 : i32
    %c0_i32_1 = arith.constant 0 : i32
    %c0_i32_2 = arith.constant 0 : i32
    return %c0_i32, %c0_i32_0, %c0_i32_1 : i32, i32, i32
  }
  func.func @transform_2(%arg0: i32) -> (i32, i32) {
    %c0_i32 = arith.constant 0 : i32
    %c0_i32_0 = arith.constant 0 : i32
    %c0_i32_1 = arith.constant 0 : i32
    return %c0_i32, %c0_i32_0 : i32, i32
  }
  func.func @transform_3(%arg0: i32) -> (i32, i32) {
    %c0_i32 = arith.constant 0 : i32
    %c0_i32_0 = arith.constant 0 : i32
    %c0_i32_1 = arith.constant 0 : i32
    return %c0_i32, %c0_i32_0 : i32, i32
  }
  func.func @transform_4(%arg0: i32) -> (i32, i32, i32) {
    %c0_i32 = arith.constant 0 : i32
    %c0_i32_0 = arith.constant 0 : i32
    %c0_i32_1 = arith.constant 0 : i32
    return %arg0, %c0_i32, %c0_i32_0 : i32, i32, i32
  }
  func.func @transform_5(%arg0: i32) -> (i32, i32, i32) {
    %c0_i32 = arith.constant 0 : i32
    %c0_i32_0 = arith.constant 0 : i32
    %c0_i32_1 = arith.constant 0 : i32
    return %arg0, %c0_i32, %c0_i32_0 : i32, i32, i32
  }
  func.func @transform_6(%arg0: i32) -> (i32, i32, i32) {
    %c0_i32 = arith.constant 0 : i32
    %c0_i32_0 = arith.constant 0 : i32
    %c0_i32_1 = arith.constant 0 : i32
    return %arg0, %c0_i32, %c0_i32_0 : i32, i32, i32
  }
}

module attributes {stable_mosaic.version = 11 : i64} {
  func.func @bn_relu_kernel(%arg0: i32, %arg1: i32, %arg2: memref<1x288x128xbf16, #tpu.memory_space<vmem>>, %arg3: memref<1x128xf32, #tpu.memory_space<vmem>>, %arg4: memref<1x128xf32, #tpu.memory_space<vmem>>, %arg5: memref<1x288x128xf32, #tpu.memory_space<vmem>>) attributes {dimension_semantics = [#tpu.dimension_semantics<parallel>, #tpu.dimension_semantics<parallel>], iteration_bounds = array<i64: 2, 1>, scalar_prefetch = 0 : i64, scratch_operands = 0 : i64, tpu.core_type = #tpu.core_type<tc>, window_params = [{transform_indices = @transform_0, window_bounds = array<i64: 1, 288, 128>}, {pipeline_mode = #tpu.pipeline_mode<synchronous>, transform_indices = @transform_1, window_bounds = array<i64: 1, 128>}, {pipeline_mode = #tpu.pipeline_mode<synchronous>, transform_indices = @transform_2, window_bounds = array<i64: 1, 128>}, {transform_indices = @transform_3, window_bounds = array<i64: 1, 288, 128>}]} {
    %c0 = arith.constant 0 : index
    %c0_0 = arith.constant 0 : index
    %c0_1 = arith.constant 0 : index
    %0 = vector.load %arg2[%c0, %c0_0, %c0_1] : memref<1x288x128xbf16, #tpu.memory_space<vmem>>, vector<1x288x128xbf16>
    %1 = vector.shape_cast %0 : vector<1x288x128xbf16> to vector<288x128xbf16>
    %2 = arith.extf %1 : vector<288x128xbf16> to vector<288x128xf32>
    %c0_2 = arith.constant 0 : index
    %c0_3 = arith.constant 0 : index
    %3 = vector.load %arg3[%c0_2, %c0_3] : memref<1x128xf32, #tpu.memory_space<vmem>>, vector<1x128xf32>
    %4 = vector.broadcast %3 : vector<1x128xf32> to vector<288x128xf32>
    %5 = arith.mulf %2, %4 : vector<288x128xf32>
    %c0_4 = arith.constant 0 : index
    %c0_5 = arith.constant 0 : index
    %6 = vector.load %arg4[%c0_4, %c0_5] : memref<1x128xf32, #tpu.memory_space<vmem>>, vector<1x128xf32>
    %7 = vector.broadcast %6 : vector<1x128xf32> to vector<288x128xf32>
    %8 = arith.addf %5, %7 : vector<288x128xf32>
    %cst = arith.constant 0.000000e+00 : f32
    %9 = vector.broadcast %cst : f32 to vector<288x128xf32>
    %10 = arith.maximumf %8, %9 : vector<288x128xf32>
    %c0_6 = arith.constant 0 : index
    %c0_7 = arith.constant 0 : index
    %c0_8 = arith.constant 0 : index
    %11 = vector.load %arg5[%c0_6, %c0_7, %c0_8] : memref<1x288x128xf32, #tpu.memory_space<vmem>>, vector<1x288x128xf32>
    %12 = vector.shape_cast %11 : vector<1x288x128xf32> to vector<288x128xf32>
    %13 = vector.shape_cast %10 : vector<288x128xf32> to vector<1x288x128xf32>
    tpu.vector_store %arg5[%c0_6, %c0_7, %c0_8], %13 {strides = array<i32>} : memref<1x288x128xf32, #tpu.memory_space<vmem>>, vector<1x288x128xf32>,
    return
  }
  func.func @transform_0(%arg0: i32, %arg1: i32) -> (i32, i32, i32) {
    %c0_i32 = arith.constant 0 : i32
    %c0_i32_0 = arith.constant 0 : i32
    return %arg0, %arg1, %c0_i32 : i32, i32, i32
  }
  func.func @transform_1(%arg0: i32, %arg1: i32) -> (i32, i32) {
    %c0_i32 = arith.constant 0 : i32
    %c0_i32_0 = arith.constant 0 : i32
    %c0_i32_1 = arith.constant 0 : i32
    return %c0_i32, %c0_i32_0 : i32, i32
  }
  func.func @transform_2(%arg0: i32, %arg1: i32) -> (i32, i32) {
    %c0_i32 = arith.constant 0 : i32
    %c0_i32_0 = arith.constant 0 : i32
    %c0_i32_1 = arith.constant 0 : i32
    return %c0_i32, %c0_i32_0 : i32, i32
  }
  func.func @transform_3(%arg0: i32, %arg1: i32) -> (i32, i32, i32) {
    %c0_i32 = arith.constant 0 : i32
    %c0_i32_0 = arith.constant 0 : i32
    return %arg0, %arg1, %c0_i32 : i32, i32, i32
  }
}

</mosaic_0001>

<bundles_post_ra>
// kernel: deconv_block_forward.3
= control target key start
LH: loop header
LB: loop body
LE: loop exit
PB: predicated region body
PF: predicated region fallthrough
CT: control target
= control target key end

     0   :  { %s697_s12 = smov 0   ;;  %s699_s13 = smov 0   ;;  %s874_s0 = inlined_call_operand.vmem [shape: bf16[2,288,128], index: 0, kind: input, shape index: {}]   ;;  %s875_s1 = inlined_call_operand.vmem [shape: f32[1,128], index: 1, kind: input, shape index: {}]   ;;  %s876_s2 = inlined_call_operand.vmem [shape: f32[1,128], index: 2, kind: input, shape index: {}]   ;;  %s877_s3 = inlined_call_operand.vmem [shape: f32[2,288,128], index: 3, kind: output, shape index: {}]  }
   0x1   :  { %s701_s14 = smov 0  }
   0x2 LB: > { %s25_s15 = sadd.s32 1, %s671_s13  ;;  %p531_p0 = scmp.ge.s32.totalorder %s675_s14, 1  ;;  %s675_s14 = sphi %s701_s14, %s13_s14   ;;  %s671_s13 = sphi %s699_s13, %s879_s13   ;;  %s667_s12 = sphi %s697_s12, %s878_s12  }
   0x3   : > { %p27_p1 = scmp.ge.s32.totalorder %s25_s15, 2  ;;  %p158_p2 = scmp.lt.s32.totalorder %s675_s14, 3 }
   0x5   : > { %s881_s15 = smov (%p27_p1, %s25_s15), 0  ;;  %p159_p3 = pnand %p531_p0, %p158_p2 }
   0x6   : > { %p191_p4 = scmp.lt.s32.totalorder (!%p159_p3), %s667_s12, 1 }
   0x7   : > { %162 = sbr.rel (%p159_p3) target bundleno = 58 (0x3a), region = 32 }
   0xc   : > { %s883_s12 = smov (!%p191_p4, %s667_s12), 1  ;;  %v726_v0 = vld [vmem:[%s875_s1] ss:$0 sm:$0xff] }
   0xd   : > { %s627_s16 = smul.u32 144, %s883_s12  ;;  %v736_v9 = vld [vmem:[%s876_s2] ss:$0 sm:$0xff] }
   0xe   : > { %s628_s22 = smul.u32 288, %s883_s12 }
   0xf   : > { %s721_s19 = scalar_lea.vmem %s874_s0, %s627_s16 }
  0x10   : > { %v539_v1 = vld [vmem:[%s721_s19] sm:$0xff]   ;;  %v610_v2 = vld [vmem:[%s721_s19 + $0x8] sm:$0xff]   ;;  %v611_v3 = vld [vmem:[%s721_s19 + $0x10] sm:$0xff]   ;;  %s753_s27 = scalar_lea.vmem %s877_s3, %s628_s22 }
  0x11   : > { %v540_v4 = vunpack.c.l.bf16 %v539_v1  ;;  %v541_v5 = vunpack.c.h.bf16 %v539_v1  ;;  %v544_v6 = vunpack.c.l.bf16 %v610_v2  ;;  %v545_v7 = vunpack.c.h.bf16 %v610_v2  ;;  %v612_v8 = vld [vmem:[%s721_s19 + $0x18] sm:$0xff]   ;;  %v613_v30 = vld [vmem:[%s721_s19 + $0x20] sm:$0xff]   ;;  %v614_v31 = vld [vmem:[%s721_s19 + $0x28] sm:$0xff]  }
  0x12   : > { %v548_v10 = vunpack.c.l.bf16 %v611_v3  ;;  %v549_v11 = vunpack.c.h.bf16 %v611_v3  ;;  %v552_v12 = vunpack.c.l.bf16 %v612_v8  ;;  %v553_v13 = vunpack.c.h.bf16 %v612_v8  ;;  %v615_v36 = vld [vmem:[%s721_s19 + $0x30] sm:$0xff]   ;;  %v616_v37 = vld [vmem:[%s721_s19 + $0x38] sm:$0xff]   ;;  %v617_v3 = vld [vmem:[%s721_s19 + $0x40] sm:$0xff]  }
  0x13   : > { %v289_v14 = vmul.f32 %v540_v4, %v726_v0  ;;  %v290_v15 = vmul.f32 %v541_v5, %v726_v0  ;;  %v291_v16 = vmul.f32 %v544_v6, %v726_v0  ;;  %v292_v17 = vmul.f32 %v545_v7, %v726_v0  ;;  %v618_v4 = vld [vmem:[%s721_s19 + $0x48] sm:$0xff]  }
  0x14   : > { %v293_v18 = vmul.f32 %v548_v10, %v726_v0  ;;  %v294_v19 = vmul.f32 %v549_v11, %v726_v0  ;;  %v295_v20 = vmul.f32 %v552_v12, %v726_v0  ;;  %v296_v21 = vmul.f32 %v553_v13, %v726_v0  ;;  %v619_v10 = vld [vmem:[%s721_s19 + $0x50] sm:$0xff]   ;;  %v620_v11 = vld [vmem:[%s721_s19 + $0x58] sm:$0xff]  }
  0x15   : > { %v332_v22 = vadd.f32 %v736_v9, %v289_v14  ;;  %v333_v23 = vadd.f32 %v736_v9, %v290_v15  ;;  %v334_v24 = vadd.f32 %v736_v9, %v291_v16  ;;  %v335_v25 = vadd.f32 %v736_v9, %v292_v17 }
  0x16   : > { %v336_v26 = vadd.f32 %v736_v9, %v293_v18  ;;  %v337_v27 = vadd.f32 %v736_v9, %v294_v19  ;;  %v338_v28 = vadd.f32 %v736_v9, %v295_v20  ;;  %v339_v29 = vadd.f32 %v736_v9, %v296_v21 }
  0x17   : > { %v368_v32 = vmax.f32 %v332_v22, 0.0  ;;  %v369_v33 = vmax.f32 %v333_v23, 0.0  ;;  %v370_v34 = vmax.f32 %v334_v24, 0.0  ;;  %v371_v35 = vmax.f32 %v335_v25, 0.0 }
  0x18   : > { %v372_v38 = vmax.f32 %v336_v26, 0.0  ;;  %v373_v39 = vmax.f32 %v337_v27, 0.0  ;;  %v374_v40 = vmax.f32 %v338_v28, 0.0  ;;  %v375_v41 = vmax.f32 %v339_v29, 0.0 }
  0x19   : > { %404 = vst [vmem:[%s753_s27] sm:$0xff] %v368_v32  ;;  %405 = vst [vmem:[%s753_s27 + $0x8] sm:$0xff] %v369_v33  ;;  %v556_v42 = vunpack.c.l.bf16 %v613_v30  ;;  %v557_v43 = vunpack.c.h.bf16 %v613_v30  ;;  %v560_v44 = vunpack.c.l.bf16 %v614_v31  ;;  %v561_v45 = vunpack.c.h.bf16 %v614_v31 }
  0x1a   : > { %406 = vst [vmem:[%s753_s27 + $0x10] sm:$0xff] %v370_v34  ;;  %407 = vst [vmem:[%s753_s27 + $0x18] sm:$0xff] %v371_v35  ;;  %v564_v46 = vunpack.c.l.bf16 %v615_v36  ;;  %v565_v47 = vunpack.c.h.bf16 %v615_v36  ;;  %v568_v48 = vunpack.c.l.bf16 %v616_v37  ;;  %v569_v49 = vunpack.c.h.bf16 %v616_v37 }
  0x1b   : > { %408 = vst [vmem:[%s753_s27 + $0x20] sm:$0xff] %v372_v38  ;;  %409 = vst [vmem:[%s753_s27 + $0x28] sm:$0xff] %v373_v39  ;;  %v297_v50 = vmul.f32 %v556_v42, %v726_v0  ;;  %v298_v51 = vmul.f32 %v557_v43, %v726_v0  ;;  %v299_v52 = vmul.f32 %v560_v44, %v726_v0  ;;  %v572_v16 = vunpack.c.l.bf16 %v617_v3 }
  0x1c   : > { %410 = vst [vmem:[%s753_s27 + $0x30] sm:$0xff] %v374_v40  ;;  %411 = vst [vmem:[%s753_s27 + $0x38] sm:$0xff] %v375_v41  ;;  %v300_v53 = vmul.f32 %v561_v45, %v726_v0  ;;  %v301_v54 = vmul.f32 %v564_v46, %v726_v0  ;;  %v302_v55 = vmul.f32 %v565_v47, %v726_v0  ;;  %v573_v17 = vunpack.c.h.bf16 %v617_v3  ;;  %v621_v40 = vld [vmem:[%s721_s19 + $0x60] sm:$0xff]   ;;  %v622_v41 = vld [vmem:[%s721_s19 + $0x68] sm:$0xff]  }
  0x1d   : > { %v303_v56 = vmul.f32 %v568_v48, %v726_v0  ;;  %v304_v57 = vmul.f32 %v569_v49, %v726_v0  ;;  %v340_v58 = vadd.f32 %v736_v9, %v297_v50  ;;  %v341_v59 = vadd.f32 %v736_v9, %v298_v51  ;;  %v623_v46 = vld [vmem:[%s721_s19 + $0x70] sm:$0xff]   ;;  %v624_v47 = vld [vmem:[%s721_s19 + $0x78] sm:$0xff]  }
  0x1e   : > { %v342_v60 = vadd.f32 %v736_v9, %v299_v52  ;;  %v343_v61 = vadd.f32 %v736_v9, %v300_v53  ;;  %v344_v62 = vadd.f32 %v736_v9, %v301_v54  ;;  %v345_v63 = vadd.f32 %v736_v9, %v302_v55 }
  0x1f   : > { %v346_v1 = vadd.f32 %v736_v9, %v303_v56  ;;  %v347_v2 = vadd.f32 %v736_v9, %v304_v57  ;;  %v376_v5 = vmax.f32 %v340_v58, 0.0  ;;  %v377_v6 = vmax.f32 %v341_v59, 0.0 }
  0x20   : > { %v378_v7 = vmax.f32 %v342_v60, 0.0  ;;  %v379_v8 = vmax.f32 %v343_v61, 0.0  ;;  %v380_v12 = vmax.f32 %v344_v62, 0.0  ;;  %v381_v13 = vmax.f32 %v345_v63, 0.0 }
  0x21   : > { %v382_v14 = vmax.f32 %v346_v1, 0.0  ;;  %v383_v15 = vmax.f32 %v347_v2, 0.0  ;;  %412 = vst [vmem:[%s753_s27 + $0x40] sm:$0xff] %v376_v5  ;;  %413 = vst [vmem:[%s753_s27 + $0x48] sm:$0xff] %v377_v6  ;;  %v576_v18 = vunpack.c.l.bf16 %v618_v4  ;;  %v577_v19 = vunpack.c.h.bf16 %v618_v4 }
  0x22   : > { %414 = vst [vmem:[%s753_s27 + $0x50] sm:$0xff] %v378_v7  ;;  %415 = vst [vmem:[%s753_s27 + $0x58] sm:$0xff] %v379_v8  ;;  %v580_v20 = vunpack.c.l.bf16 %v619_v10  ;;  %v581_v21 = vunpack.c.h.bf16 %v619_v10  ;;  %v584_v22 = vunpack.c.l.bf16 %v620_v11  ;;  %v585_v23 = vunpack.c.h.bf16 %v620_v11 }
  0x23   : > { %416 = vst [vmem:[%s753_s27 + $0x60] sm:$0xff] %v380_v12  ;;  %417 = vst [vmem:[%s753_s27 + $0x68] sm:$0xff] %v381_v13  ;;  %v305_v24 = vmul.f32 %v572_v16, %v726_v0  ;;  %v306_v25 = vmul.f32 %v573_v17, %v726_v0  ;;  %v307_v26 = vmul.f32 %v576_v18, %v726_v0  ;;  %v588_v52 = vunpack.c.l.bf16 %v621_v40 }
  0x24   : > { %418 = vst [vmem:[%s753_s27 + $0x70] sm:$0xff] %v382_v14  ;;  %419 = vst [vmem:[%s753_s27 + $0x78] sm:$0xff] %v383_v15  ;;  %v308_v27 = vmul.f32 %v577_v19, %v726_v0  ;;  %v309_v28 = vmul.f32 %v580_v20, %v726_v0  ;;  %v310_v29 = vmul.f32 %v581_v21, %v726_v0  ;;  %v589_v53 = vunpack.c.h.bf16 %v621_v40  ;;  %v625_v14 = vld [vmem:[%s721_s19 + $0x80] sm:$0xff]   ;;  %v626_v15 = vld [vmem:[%s721_s19 + $0x88] sm:$0xff]  }
  0x25   : > { %v311_v30 = vmul.f32 %v584_v22, %v726_v0  ;;  %v312_v31 = vmul.f32 %v585_v23, %v726_v0  ;;  %v348_v32 = vadd.f32 %v736_v9, %v305_v24  ;;  %v349_v33 = vadd.f32 %v736_v9, %v306_v25 }
  0x26   : > { %v350_v34 = vadd.f32 %v736_v9, %v307_v26  ;;  %v351_v35 = vadd.f32 %v736_v9, %v308_v27  ;;  %v352_v36 = vadd.f32 %v736_v9, %v309_v28  ;;  %v353_v37 = vadd.f32 %v736_v9, %v310_v29 }
  0x27   : > { %v354_v38 = vadd.f32 %v736_v9, %v311_v30  ;;  %v355_v39 = vadd.f32 %v736_v9, %v312_v31  ;;  %v384_v42 = vmax.f32 %v348_v32, 0.0  ;;  %v385_v43 = vmax.f32 %v349_v33, 0.0 }
  0x28   : > { %v386_v44 = vmax.f32 %v350_v34, 0.0  ;;  %v387_v45 = vmax.f32 %v351_v35, 0.0  ;;  %v388_v48 = vmax.f32 %v352_v36, 0.0  ;;  %v389_v49 = vmax.f32 %v353_v37, 0.0 }
  0x29   : > { %v390_v50 = vmax.f32 %v354_v38, 0.0  ;;  %v391_v51 = vmax.f32 %v355_v39, 0.0  ;;  %420 = vst [vmem:[%s753_s27 + $0x80] sm:$0xff] %v384_v42  ;;  %421 = vst [vmem:[%s753_s27 + $0x88] sm:$0xff] %v385_v43  ;;  %v592_v54 = vunpack.c.l.bf16 %v622_v41  ;;  %v593_v55 = vunpack.c.h.bf16 %v622_v41 }
  0x2a   : > { %422 = vst [vmem:[%s753_s27 + $0x90] sm:$0xff] %v386_v44  ;;  %423 = vst [vmem:[%s753_s27 + $0x98] sm:$0xff] %v387_v45  ;;  %v596_v56 = vunpack.c.l.bf16 %v623_v46  ;;  %v597_v57 = vunpack.c.h.bf16 %v623_v46  ;;  %v600_v58 = vunpack.c.l.bf16 %v624_v47  ;;  %v601_v59 = vunpack.c.h.bf16 %v624_v47 }
  0x2b   : > { %424 = vst [vmem:[%s753_s27 + $0xa0] sm:$0xff] %v388_v48  ;;  %425 = vst [vmem:[%s753_s27 + $0xa8] sm:$0xff] %v389_v49  ;;  %v313_v60 = vmul.f32 %v588_v52, %v726_v0  ;;  %v314_v61 = vmul.f32 %v589_v53, %v726_v0  ;;  %v315_v62 = vmul.f32 %v592_v54, %v726_v0  ;;  %v604_v24 = vunpack.c.l.bf16 %v625_v14 }
  0x2c   : > { %426 = vst [vmem:[%s753_s27 + $0xb0] sm:$0xff] %v390_v50  ;;  %427 = vst [vmem:[%s753_s27 + $0xb8] sm:$0xff] %v391_v51  ;;  %v316_v63 = vmul.f32 %v593_v55, %v726_v0  ;;  %v317_v1 = vmul.f32 %v596_v56, %v726_v0  ;;  %v318_v2 = vmul.f32 %v597_v57, %v726_v0  ;;  %v605_v25 = vunpack.c.h.bf16 %v625_v14 }
  0x2d   : > { %v319_v3 = vmul.f32 %v600_v58, %v726_v0  ;;  %v320_v4 = vmul.f32 %v601_v59, %v726_v0  ;;  %v356_v5 = vadd.f32 %v736_v9, %v313_v60  ;;  %v357_v6 = vadd.f32 %v736_v9, %v314_v61 }
  0x2e   : > { %v358_v7 = vadd.f32 %v736_v9, %v315_v62  ;;  %v359_v8 = vadd.f32 %v736_v9, %v316_v63  ;;  %v360_v10 = vadd.f32 %v736_v9, %v317_v1  ;;  %v361_v11 = vadd.f32 %v736_v9, %v318_v2 }
  0x2f   : > { %v362_v12 = vadd.f32 %v736_v9, %v319_v3  ;;  %v363_v13 = vadd.f32 %v736_v9, %v320_v4  ;;  %v392_v16 = vmax.f32 %v356_v5, 0.0  ;;  %v393_v17 = vmax.f32 %v357_v6, 0.0 }
  0x30   : > { %v394_v18 = vmax.f32 %v358_v7, 0.0  ;;  %v395_v19 = vmax.f32 %v359_v8, 0.0  ;;  %v396_v20 = vmax.f32 %v360_v10, 0.0  ;;  %v397_v21 = vmax.f32 %v361_v11, 0.0 }
  0x31   : > { %v398_v22 = vmax.f32 %v362_v12, 0.0  ;;  %v399_v23 = vmax.f32 %v363_v13, 0.0  ;;  %428 = vst [vmem:[%s753_s27 + $0xc0] sm:$0xff] %v392_v16  ;;  %429 = vst [vmem:[%s753_s27 + $0xc8] sm:$0xff] %v393_v17  ;;  %v608_v26 = vunpack.c.l.bf16 %v626_v15  ;;  %v609_v27 = vunpack.c.h.bf16 %v626_v15 }
  0x32   : > { %430 = vst [vmem:[%s753_s27 + $0xd0] sm:$0xff] %v394_v18  ;;  %431 = vst [vmem:[%s753_s27 + $0xd8] sm:$0xff] %v395_v19  ;;  %v321_v28 = vmul.f32 %v604_v24, %v726_v0  ;;  %v322_v29 = vmul.f32 %v605_v25, %v726_v0 }
  0x33   : > { %432 = vst [vmem:[%s753_s27 + $0xe0] sm:$0xff] %v396_v20  ;;  %433 = vst [vmem:[%s753_s27 + $0xe8] sm:$0xff] %v397_v21  ;;  %v323_v30 = vmul.f32 %v608_v26, %v726_v0  ;;  %v324_v31 = vmul.f32 %v609_v27, %v726_v0 }
  0x34   : > { %434 = vst [vmem:[%s753_s27 + $0xf0] sm:$0xff] %v398_v22  ;;  %435 = vst [vmem:[%s753_s27 + $0xf8] sm:$0xff] %v399_v23  ;;  %v364_v32 = vadd.f32 %v736_v9, %v321_v28  ;;  %v365_v33 = vadd.f32 %v736_v9, %v322_v29 }
  0x35   : > { %v366_v34 = vadd.f32 %v736_v9, %v323_v30  ;;  %v367_v35 = vadd.f32 %v736_v9, %v324_v31 }
  0x36   : > { %v400_v36 = vmax.f32 %v364_v32, 0.0  ;;  %v401_v37 = vmax.f32 %v365_v33, 0.0 }
  0x37   : > { %v402_v38 = vmax.f32 %v366_v34, 0.0  ;;  %v403_v39 = vmax.f32 %v367_v35, 0.0 }
  0x38   : > { %436 = vst [vmem:[%s753_s27 + $0x100] sm:$0xff] %v400_v36  ;;  %437 = vst [vmem:[%s753_s27 + $0x108] sm:$0xff] %v401_v37 }
  0x39   : > { %438 = vst [vmem:[%s753_s27 + $0x110] sm:$0xff] %v402_v38  ;;  %439 = vst [vmem:[%s753_s27 + $0x118] sm:$0xff] %v403_v39 }
  0x3a PF: > { %s13_s14 = sadd.s32 1, %s675_s14   ;;  %s878_s12 = smov %s671_s13 }
  0x3b   : > { %p10_p5 = scmp.ge.s32.totalorder %s13_s14, 4   ;;  %s879_s13 = smov %s881_s15 }
  0x3d   :  { %12 = sbr.rel (!%p10_p5) target bundleno = 2 (0x2), region = 62 }

// kernel: deconv_block_forward.2
= control target key start
LH: loop header
LB: loop body
LE: loop exit
PB: predicated region body
PF: predicated region fallthrough
CT: control target
= control target key end

     0   :  { %s5699_s21 = smov 0   ;;  %s7228_s0 = inlined_call_operand.vmem [shape: bf16[2,328,4], index: 0, kind: input, shape index: {}]   ;;  %s7229_s1 = inlined_call_operand.vmem [shape: bf16[9,4,128], index: 1, kind: input, shape index: {}]   ;;  %s7230_s2 = inlined_call_operand.vmem [shape: f32[1,128], index: 2, kind: input, shape index: {}]   ;;  %s7231_s3 = inlined_call_operand.vmem [shape: f32[288,1], index: 3, kind: input, shape index: {}]   ;;  %s7232_s4 = inlined_call_operand.vmem [shape: bf16[2,288,128], index: 4, kind: output, shape index: {0}]   ;;  %s7233_s5 = inlined_call_operand.vmem [shape: f32[2,1,128], index: 5, kind: output, shape index: {1}]   ;;  %s7234_s6 = inlined_call_operand.vmem [shape: f32[2,1,128], index: 6, kind: output, shape index: {2}]  }
   0x1 LB: > { %s4598_s22 = sadd.s32 4294967295, %s5661_s21   ;;  %p4602_p0 = scmp.ge.s32.totalorder %s5661_s21, 1  ;;  %s5661_s21 = sphi %s5699_s21, %s17_s21  }
   0x2   : > { %p217_p1 = scmp.lt.s32.totalorder %s5661_s21, 3 }
   0x4   : > { %p218_p2 = pnand %p4602_p0, %p217_p1 }
   0x6   : > { %221 = sbr.rel (%p218_p2) target bundleno = 563 (0x233), region = 36 }
   0xb   : > { %v313_v0 = vld [vmem:[%s7229_s1] sm:$0x3]  ;;  %vm459_vm0 = vcmask 1041408   ;;  %p253_p3 = scmp.lt.s32.totalorder %s4598_s22, 1  ;;  %v4680_v2 = vld [vmem:[%s7229_s1 + $0x4] sm:$0x3] }
   0xc   : > { %5552 = vmatprep.subr.msk.bf16.mxu0 %vm459_vm0, %v313_v0  ;;  %5553 = vmatprep.subr.msk.bf16.mxu1 %vm459_vm0, %v313_v0  ;;  %v461_v1 = vsel %vm459_vm0, %v313_v0, 0  ;;  %v4642_v3 = vld [vmem:[%s7229_s1 + $0x2] sm:$0x3]  ;;  %vm404_vm1 = vcmask 31744   ;;  %v1326_v7 = vsel %vm459_vm0, %v4680_v2, 0  ;;  %vm1233_vm3 = vcmask 1046528  }
   0xd   : > { %5209 = vmatpush3.bf16.msra.mxu0 %v461_v1  ;;  %5551 = vmatpush3.bf16.msra.mxu1 %v461_v1  ;;  %s7304_s22 = smov (!%p253_p3, %s4598_s22), 1  ;;  %v5737_v8 = vld [vmem:[%s7229_s1 + $0x6] sm:$0x3]  ;;  %v1012_v10 = vsel %vm459_vm0, %v4642_v3, 0  ;;  %v5745_v11 = vld [vmem:[%s7229_s1 + $0x8] sm:$0x3] }
   0xe   : > { %5555 = vmatprep.subr.msk.bf16.mxu0 %vm459_vm0, %v4680_v2  ;;  %5554 = vmatprep.subr.msk.bf16.mxu1 %vm459_vm0, %v4642_v3  ;;  %s5562_s29 = smul.u32 164, %s7304_s22  ;;  %vm808_vm2 = vsmask.f32 7424  ;;  %v1765_v55 = vsel %vm459_vm0, %v5737_v8, 0  ;;  %v5811_v62 = vld [vmem:[%s7229_s1 + $0xa] sm:$0x3]  ;;  %s265_s16 = scalar_lea.vmem %s7233_s5, %s7304_s22 }
   0xf   : > { %vm2433_vm4 = vcmask 1045504   ;;  %vm1986_vm5 = vsmask.f32 6400  ;;  %vm3633_vm6 = vcmask 1044480   ;;  %vm3186_vm7 = vsmask.f32 5376  ;;  %s268_s19 = scalar_lea.vmem %s7234_s6, %s7304_s22 }
  0x10   : > { %s5727_s8 = scalar_lea.vmem %s7228_s0, %s5562_s29 }
  0x11   : > { %v5575_v4 = vld [vmem:[%s5727_s8] sm:$0xff]   ;;  %v5576_v5 = vld [vmem:[%s5727_s8 + $0x50] sm:$0xff]   ;;  %v5577_v6 = vld [vmem:[%s5727_s8 + $0x8] sm:$0xff]  }
  0x12   : > { %5210 = vmatprep.mubr.msk.bf16.mxu0 %vm404_vm1, %v5575_v4  ;;  %5230 = vmatprep.mubr.msk.bf16.mxu1 %vm404_vm1, %v5576_v5  ;;  %v5578_v9 = vld [vmem:[%s5727_s8 + $0x58] sm:$0xff]   ;;  %v5579_v12 = vld [vmem:[%s5727_s8 + $0x10] sm:$0xff]   ;;  %v5580_v13 = vld [vmem:[%s5727_s8 + $0x60] sm:$0xff]  }
  0x13   : > { %5211 = vmatmul.mubr.msk.bf16.vlgmr.msra.gmra.mxu0 %vm404_vm1, %v5577_v6  ;;  %5231 = vmatmul.mubr.msk.bf16.vlgmr.msra.gmra.mxu1 %vm404_vm1, %v5578_v9  ;;  %v5581_v14 = vld [vmem:[%s5727_s8 + $0x18] sm:$0xff]   ;;  %v5582_v15 = vld [vmem:[%s5727_s8 + $0x68] sm:$0xff]   ;;  %v5583_v16 = vld [vmem:[%s5727_s8 + $0x20] sm:$0xff]   ;;  %v2212_v9 = vsel %vm459_vm0, %v5745_v11, 0 }
  0x14   : > { %5285 = vmatpush3.bf16.msra.mxu0 %v1326_v7  ;;  %5247 = vmatpush3.bf16.msra.mxu1 %v1012_v10  ;;  %v5584_v17 = vld [vmem:[%s5727_s8 + $0x70] sm:$0xff]   ;;  %v5585_v18 = vld [vmem:[%s5727_s8 + $0x28] sm:$0xff]   ;;  %v5586_v19 = vld [vmem:[%s5727_s8 + $0x78] sm:$0xff]  }
  0x15   : > { %5214 = vmatprep.mubr.msk.bf16.mxu0 %vm404_vm1, %v5579_v12  ;;  %5234 = vmatprep.mubr.msk.bf16.mxu1 %vm404_vm1, %v5580_v13  ;;  %v5587_v20 = vld [vmem:[%s5727_s8 + $0x30] sm:$0xff]   ;;  %v5588_v21 = vld [vmem:[%s5727_s8 + $0x80] sm:$0xff]   ;;  %v5772_v25 = vld [vmem:[%s5727_s8 + $0x8] sm:$0xff]  }
  0x16   : > { %5556 = vmatprep.subr.msk.bf16.mxu1 %vm459_vm0, %v5737_v8  ;;  %5557 = vmatprep.subr.msk.bf16.mxu0 %vm459_vm0, %v5745_v11  ;;  %v676_v22 = vld [vmem:[%s5727_s8] sm:$0xf]  ;;  %v677_v23 = vld [vmem:[%s5727_s8 + $0x4] sm:$0xf]  ;;  %v817_v28 = vshll.u32 %v5772_v25, 16  ;;  %v5595_v29 = vld [vmem:[%s5727_s8 + $0x10] sm:$0xff]  }
  0x17   : > { %v4643_v24 = vcombine.low %v676_v22, %v677_v23  ;;  %v5781_v32 = vld [vmem:[%s5727_s8 + $0x18] sm:$0xff]   ;;  %v1227_v33 = vld [vmem:[%s5727_s8] sm:$0xe]  ;;  %v5590_v36 = vld [vmem:[%s5727_s8 + $0x88] sm:$0xff]   ;;  %v825_v38 = vshll.u32 %v5595_v29, 16  ;;  %v821_v39 = vshrl.u32 %v5772_v25, 16 }
  0x18   : > { %v819_v31 = vrot.slane %v817_v28, 1  ;;  %v5589_v34 = vld [vmem:[%s5727_s8 + $0x38] sm:$0xff]   ;;  %v5591_v37 = vld [vmem:[%s5727_s8 + $0x40] sm:$0xff]   ;;  %v4681_v40 = vcombine.low %v1227_v33, %v677_v23  ;;  %v829_v42 = vshrl.u32 %v5595_v29, 16  ;;  %v833_v43 = vshll.u32 %v5781_v32, 16  ;;  %v5797_v51 = vld [vmem:[%s5727_s8 + $0x28] sm:$0xff]  }
  0x19   : > { %v810_v26 = vshrl.u32 %v4643_v24, 16  ;;  %v812_v27 = vshll.u32 %v4643_v24, 16  ;;  %v827_v44 = vrot.slane %v825_v38, 1  ;;  %v5598_v45 = vld [vmem:[%s5727_s8 + $0x20] sm:$0xff]   ;;  %v1235_v48 = vrot.slane %v5772_v25, 1  ;;  %v5594_v52 = vld [vmem:[%s5727_s8 + $0x48] sm:$0xff]  }
  0x1a   : > { %v823_v46 = vor.u32 %v821_v39, %v819_v31  ;;  %v1234_v47 = vrot.slane %v4681_v40, 1  ;;  %v835_v50 = vrot.slane %v833_v43, 1  ;;  %v841_v53 = vshll.u32 %v5598_v45, 16  ;;  %v5600_v0 = vld [vmem:[%s5727_s8 + $0x30] sm:$0xff]   ;;  %v5819_v5 = vld [vmem:[%s5727_s8 + $0x38] sm:$0xff]   ;;  %v5843_v23 = vld [vmem:[%s5727_s8 + $0x48] sm:$0xff]  }
  0x1b   : > { %5215 = vmatmul.mubr.msk.bf16.gmra.mxu0 %vm404_vm1, %v5581_v14  ;;  %5235 = vmatmul.mubr.msk.bf16.gmra.mxu1 %vm404_vm1, %v5582_v15  ;;  %v814_v30 = vrot.slane %v812_v27, 1  ;;  %v831_v49 = vor.u32 %v829_v42, %v827_v44  ;;  %v837_v57 = vshrl.u32 %v5781_v32, 16  ;;  %v845_v59 = vshrl.u32 %v5598_v45, 16  ;;  %v5860_v39 = vld [vmem:[%s5727_s8 + $0x58] sm:$0xff]  }
  0x1c   : > { %5218 = vmatprep.mubr.msk.bf16.mxu0 %vm404_vm1, %v5583_v16  ;;  %5238 = vmatprep.mubr.msk.bf16.mxu1 %vm404_vm1, %v5584_v17  ;;  %v828_v54 = vsel %vm808_vm2, %v823_v46, %v827_v44  ;;  %v1236_v56 = vsel %vm1233_vm3, %v1234_v47, %v1235_v48  ;;  %v849_v60 = vshll.u32 %v5797_v51, 16  ;;  %v1237_v61 = vrot.slane %v5595_v29, 1  ;;  %v5602_v16 = vld [vmem:[%s5727_s8 + $0x40] sm:$0xff]   ;;  %v5836_v17 = vld [vmem:[%s7229_s1 + $0xc] sm:$0x3] }
  0x1d   : > { %v815_v35 = vor.u32 %v814_v30, %v810_v26  ;;  %v836_v58 = vsel %vm808_vm2, %v831_v49, %v835_v50  ;;  %v843_v63 = vrot.slane %v841_v53, 1  ;;  %v839_v1 = vor.u32 %v837_v57, %v835_v50  ;;  %v5606_v50 = vld [vmem:[%s5727_s8 + $0x60] sm:$0xff]  }
  0x1e   : > { %v851_v3 = vrot.slane %v849_v60, 1  ;;  %v1239_v4 = vrot.slane %v5781_v32, 1  ;;  %v1238_v6 = vsel %vm1233_vm3, %v1235_v48, %v1237_v61  ;;  %v857_v7 = vshll.u32 %v5600_v0, 16  ;;  %v5604_v32 = vld [vmem:[%s5727_s8 + $0x50] sm:$0xff]  }
  0x1f   : > { %v820_v41 = vsel %vm808_vm2, %v815_v35, %v819_v31  ;;  %v847_v2 = vor.u32 %v845_v59, %v843_v63  ;;  %v844_v8 = vsel %vm808_vm2, %v839_v1, %v843_v63  ;;  %v853_v10 = vshrl.u32 %v5797_v51, 16 }
  0x20   : > { %v1240_v13 = vsel %vm1233_vm3, %v1237_v61, %v1239_v4  ;;  %v861_v14 = vshrl.u32 %v5600_v0, 16  ;;  %v865_v15 = vshll.u32 %v5819_v5, 16  ;;  %v859_v11 = vrot.slane %v857_v7, 1 }
  0x21   : > { %v852_v12 = vsel %vm808_vm2, %v847_v2, %v851_v3  ;;  %v873_v25 = vshll.u32 %v5602_v16, 16  ;;  %v869_v28 = vshrl.u32 %v5819_v5, 16  ;;  %v877_v30 = vshrl.u32 %v5602_v16, 16 }
  0x22   : > { %v867_v22 = vrot.slane %v865_v15, 1  ;;  %v881_v31 = vshll.u32 %v5843_v23, 16  ;;  %v885_v44 = vshrl.u32 %v5843_v23, 16  ;;  %v893_v46 = vshrl.u32 %v5604_v32, 16 }
  0x23   : > { %5219 = vmatmul.mubr.msk.bf16.gmra.mxu0 %vm404_vm1, %v5585_v18  ;;  %5239 = vmatmul.mubr.msk.bf16.gmra.mxu1 %vm404_vm1, %v5586_v19  ;;  %v1241_v18 = vrot.slane %v5598_v45, 1  ;;  %v855_v19 = vor.u32 %v853_v10, %v851_v3  ;;  %v875_v33 = vrot.slane %v873_v25, 1  ;;  %v897_v47 = vshll.u32 %v5860_v39, 16  ;;  %v5608_v3 = vld [vmem:[%s5727_s8 + $0x70] sm:$0xff]   ;;  %v5907_v25 = vld [vmem:[%s5727_s8 + $0x88] sm:$0xff]  }
  0x24   : > { %5222 = vmatprep.mubr.msk.bf16.mxu0 %vm404_vm1, %v5587_v20  ;;  %5242 = vmatprep.mubr.msk.bf16.mxu1 %vm404_vm1, %v5588_v21  ;;  %v1243_v20 = vrot.slane %v5797_v51, 1  ;;  %v863_v21 = vor.u32 %v861_v14, %v859_v11  ;;  %v871_v35 = vor.u32 %v869_v28, %v867_v22  ;;  %v883_v38 = vrot.slane %v881_v31, 1  ;;  %v5915_v31 = vld [vmem:[%s5727_s8 + $0x90] ss:$0 sps:$4 sm:$0x11]  }
  0x25   : > { %v1242_v24 = vsel %vm1233_vm3, %v1239_v4, %v1241_v18  ;;  %v860_v26 = vsel %vm808_vm2, %v855_v19, %v859_v11  ;;  %v1249_v49 = vrot.slane %v5602_v16, 1  ;;  %v905_v57 = vshll.u32 %v5606_v50, 16 }
  0x26   : > { %v1244_v27 = vsel %vm1233_vm3, %v1241_v18, %v1243_v20  ;;  %v868_v29 = vsel %vm808_vm2, %v863_v21, %v867_v22  ;;  %v876_v42 = vsel %vm808_vm2, %v871_v35, %v875_v33  ;;  %v887_v51 = vor.u32 %v885_v44, %v883_v38  ;;  %v5929_v44 = vld [vmem:[%s5727_s8 + $0x10] sm:$0xff]  }
  0x27   : > { %v901_v60 = vshrl.u32 %v5860_v39, 16  ;;  %v909_v63 = vshrl.u32 %v5606_v50, 16  ;;  %v907_v1 = vrot.slane %v905_v57, 1  ;;  %v1253_v2 = vrot.slane %v5604_v32, 1 }
  0x28   : > { %v921_v10 = vshll.u32 %v5608_v3, 16  ;;  %v925_v16 = vshrl.u32 %v5608_v3, 16  ;;  %v1257_v19 = vrot.slane %v5606_v50, 1  ;;  %v5936_v50 = vld [vmem:[%s5727_s8 + $0x18] sm:$0xff]  }
  0x2a   : > { %v923_v18 = vrot.slane %v921_v10, 1  ;;  %v5973_v10 = vld [vmem:[%s5727_s8 + $0x40] sm:$0xff]  }
  0x2b   : > { %5223 = vmatmul.mubr.msk.bf16.gmra.mxu0 %vm404_vm1, %v5589_v34  ;;  %5243 = vmatmul.mubr.msk.bf16.gmra.mxu1 %vm404_vm1, %v5590_v36  ;;  %v1245_v34 = vrot.slane %v5600_v0, 1  ;;  %v1247_v36 = vrot.slane %v5819_v5, 1  ;;  %v1255_v5 = vrot.slane %v5860_v39, 1  ;;  %v1542_v39 = vld [vmem:[%s5727_s8 + $0xc] sm:$0xf] }
  0x2c   : > { %5226 = vmatprep.mubr.msk.bf16.mxu0 %vm404_vm1, %v5591_v37  ;;  %5248 = vmatprep.mubr.msk.bf16.mxu1 %vm404_vm1, %v820_v41  ;;  %v879_v37 = vor.u32 %v877_v30, %v875_v33  ;;  %v889_v41 = vshll.u32 %v5604_v32, 16 }
  0x2d   : > { %v1246_v40 = vsel %vm1233_vm3, %v1243_v20, %v1245_v34  ;;  %v1248_v43 = vsel %vm1233_vm3, %v1245_v34, %v1247_v36  ;;  %v5902_v20 = vld [vmem:[%s5727_s8 + $0x80] sm:$0xff]   ;;  %v945_v34 = vshll.u32 %v5907_v25, 16 }
  0x2e   : > { %v884_v45 = vsel %vm808_vm2, %v879_v37, %v883_v38  ;;  %v891_v48 = vrot.slane %v889_v41, 1  ;;  %v937_v28 = vshll.u32 %v5902_v20, 16  ;;  %v941_v33 = vshrl.u32 %v5902_v20, 16  ;;  %v1541_v38 = vld [vmem:[%s5727_s8 + $0x8] sm:$0xe] }
  0x2f   : > { %v1261_v37 = vrot.slane %v5608_v3, 1 }
  0x30   : > { %v895_v53 = vor.u32 %v893_v46, %v891_v48  ;;  %v953_v46 = vshll.u32 %v5915_v31, 16 }
  0x33   : > { %5227 = vmatmul.mubr.msk.bf16.gmra.mxu0 %vm404_vm1, %v5594_v52  ;;  %5249 = vmatmul.mubr.msk.bf16.vlgmr.msra.gmra.mxu1 %vm404_vm1, %v828_v54  ;;  %v1251_v52 = vrot.slane %v5843_v23, 1  ;;  %v899_v54 = vrot.slane %v897_v47, 1  ;;  %v927_v23 = vor.u32 %v925_v16, %v923_v18  ;;  %v5981_v16 = vld [vmem:[%s5727_s8 + $0x50] sm:$0xff]  }
  0x34   : > { %5286 = vmatprep.mubr.msk.bf16.mxu0 %vm404_vm1, %v1236_v56  ;;  %5323 = vmatpush3.bf16.msra.mxu1 %v1765_v55  ;;  %v5875_v55 = vld [vmem:[%s5727_s8 + $0x68] sm:$0xff]   ;;  %v1250_v56 = vsel %vm1233_vm3, %v1247_v36, %v1249_v49  ;;  %v939_v36 = vrot.slane %v937_v28, 1 }
  0x35   : > { %5252 = vmatprep.mubr.msk.bf16.mxu1 %vm404_vm1, %v836_v58  ;;  %5558 = vmatprep.subr.msk.bf16.mxu1 %vm459_vm0, %v5811_v62  ;;  %v892_v58 = vsel %vm808_vm2, %v887_v51, %v891_v48  ;;  %v1252_v59 = vsel %vm1233_vm3, %v1249_v49, %v1251_v52  ;;  %v900_v61 = vsel %vm808_vm2, %v895_v53, %v899_v54  ;;  %v913_v0 = vshll.u32 %v5875_v55, 16  ;;  %v5939_v51 = vld [vmem:[%s5727_s8 + $0x20] sm:$0xff]  }
  0x36   : > { %v903_v4 = vor.u32 %v901_v60, %v899_v54  ;;  %v917_v14 = vshrl.u32 %v5875_v55, 16  ;;  %v1259_v22 = vrot.slane %v5875_v55, 1  ;;  %v1265_v54 = vrot.slane %v5902_v20, 1  ;;  %v5950_v60 = vld [vmem:[%s5727_s8 + $0x30] sm:$0xff]  }
  0x37   : > { %v915_v7 = vrot.slane %v913_v0, 1  ;;  %v4701_v55 = vcombine.low %v1541_v38, %v1542_v39  ;;  %v2439_v0 = vrot.slane %v5939_v51, 2  ;;  %v2451_v38 = vrot.slane %v5981_v16, 2 }
  0x38   : > { %v1260_v30 = vsel %vm1233_vm3, %v1257_v19, %v1259_v22  ;;  %v1262_v49 = vsel %vm1233_vm3, %v1259_v22, %v1261_v37  ;;  %v5991_v22 = vld [vmem:[%s5727_s8 + $0x58] sm:$0xff]  }
  0x39   : > { %v919_v21 = vor.u32 %v917_v14, %v915_v7  ;;  %v1988_v3 = vshrl.u32 %v4701_v55, 16  ;;  %v1674_v14 = vrot.slane %v5929_v44, 1 }
  0x3b   : > { %5287 = vmatmul.mubr.msk.bf16.vlgmr.msra.gmra.mxu0 %vm404_vm1, %v1238_v6  ;;  %5253 = vmatmul.mubr.msk.bf16.gmra.mxu1 %vm404_vm1, %v844_v8  ;;  %v911_v6 = vor.u32 %v909_v63, %v907_v1  ;;  %v5890_v8 = vld [vmem:[%s5727_s8 + $0x78] sm:$0xff]   ;;  %v2437_v63 = vrot.slane %v5936_v50, 2 }
  0x3c   : > { %5361 = vmatpush3.bf16.msra.mxu0 %v2212_v9  ;;  %5256 = vmatprep.mubr.msk.bf16.mxu1 %vm404_vm1, %v852_v12  ;;  %v1254_v9 = vsel %vm1233_vm3, %v1251_v52, %v1253_v2  ;;  %v908_v12 = vsel %vm808_vm2, %v903_v4, %v907_v1  ;;  %v929_v11 = vshll.u32 %v5890_v8, 16  ;;  %v1263_v41 = vrot.slane %v5890_v8, 1 }
  0x3d   : > { %5290 = vmatprep.mubr.msk.bf16.mxu0 %vm404_vm1, %v1240_v13  ;;  %5559 = vmatprep.subr.msk.bf16.mxu0 %vm459_vm0, %v5836_v17  ;;  %v1256_v13 = vsel %vm1233_vm3, %v1253_v2, %v1255_v5  ;;  %v916_v15 = vsel %vm808_vm2, %v911_v6, %v915_v7  ;;  %v2435_v52 = vrot.slane %v5929_v44, 2  ;;  %v955_v2 = vrot.slane %v953_v46, 1 }
  0x3e   : > { %v1264_v53 = vsel %vm1233_vm3, %v1261_v37, %v1263_v41  ;;  %v1996_v6 = vshrl.u32 %v5929_v44, 16  ;;  %v1266_v20 = vsel %vm1233_vm3, %v1263_v41, %v1265_v54  ;;  %v6008_v37 = vld [vmem:[%s5727_s8 + $0x60] sm:$0xff]  }
  0x3f   : > { %v5965_v7 = vsel %vm2433_vm4, %v2435_v52, %v2437_v63 }
  0x43   : > { %5291 = vmatmul.mubr.msk.bf16.gmra.mxu0 %vm404_vm1, %v1242_v24  ;;  %5257 = vmatmul.mubr.msk.bf16.gmra.mxu1 %vm404_vm1, %v860_v26  ;;  %v931_v24 = vrot.slane %v929_v11, 1  ;;  %v1258_v26 = vsel %vm1233_vm3, %v1255_v5, %v1257_v19  ;;  %v1991_v5 = vshll.u32 %v4701_v55, 16  ;;  %v2443_v11 = vrot.slane %v5950_v60, 2 }
  0x44   : > { %5294 = vmatprep.mubr.msk.bf16.mxu0 %vm404_vm1, %v1244_v27  ;;  %5260 = vmatprep.mubr.msk.bf16.mxu1 %vm404_vm1, %v868_v29  ;;  %v933_v27 = vshrl.u32 %v5890_v8, 16  ;;  %v924_v29 = vsel %vm808_vm2, %v919_v21, %v923_v18  ;;  %v5968_v8 = vsel %vm2433_vm4, %v2437_v63, %v2439_v0  ;;  %v6049_v63 = vld [vmem:[%s5727_s8 + $0x80] sm:$0xff]  }
  0x45   : > { %v932_v32 = vsel %vm808_vm2, %v927_v23, %v931_v24 }
  0x46   : > { %v935_v35 = vor.u32 %v933_v27, %v931_v24  ;;  %v1990_v24 = vrot.slane %v1988_v3, 1 }
  0x48   : > { %v940_v48 = vsel %vm808_vm2, %v935_v35, %v939_v36  ;;  %v1269_v35 = vrot.slane %v5915_v31, 1 }
  0x4b   : > { %5295 = vmatmul.mubr.msk.bf16.gmra.mxu0 %vm404_vm1, %v1246_v40  ;;  %5261 = vmatmul.mubr.msk.bf16.gmra.mxu1 %vm404_vm1, %v876_v42  ;;  %v2427_v40 = vld [vmem:[%s5727_s8 + $0x8] sm:$0xc]  ;;  %v943_v42 = vor.u32 %v941_v33, %v939_v36  ;;  %v1676_v36 = vrot.slane %v5936_v50, 1 }
  0x4c   : > { %5298 = vmatprep.mubr.msk.bf16.mxu0 %vm404_vm1, %v1248_v43  ;;  %5264 = vmatprep.mubr.msk.bf16.mxu1 %vm404_vm1, %v884_v45  ;;  %v947_v43 = vrot.slane %v945_v34, 1  ;;  %v949_v45 = vshrl.u32 %v5907_v25, 16  ;;  %v4759_v47 = vcombine.low %v2427_v40, %v1542_v39  ;;  %v6013_v39 = vld [vmem:[%s5727_s8 + $0x68] sm:$0xff]  }
  0x4e   : > { %v2434_v57 = vrot.slane %v4759_v47, 2  ;;  %v951_v1 = vor.u32 %v949_v45, %v947_v43  ;;  %v6027_v45 = vld [vmem:[%s5727_s8 + $0x70] sm:$0xff]  }
  0x50   : > { %v5959_v4 = vsel %vm2433_vm4, %v2434_v57, %v2435_v52  ;;  %v956_v19 = vsel %vm808_vm2, %v951_v1, %v955_v2  ;;  %v2455_v52 = vrot.slane %v6008_v37, 2  ;;  %v2459_v57 = vrot.slane %v6027_v45, 2 }
  0x53   : > { %5299 = vmatmul.mubr.msk.bf16.gmra.mxu0 %vm404_vm1, %v1250_v56  ;;  %5265 = vmatmul.mubr.msk.bf16.gmra.mxu1 %vm404_vm1, %v892_v58  ;;  %v5945_v56 = vld [vmem:[%s5727_s8 + $0x28] sm:$0xff]   ;;  %v948_v58 = vsel %vm808_vm2, %v943_v42, %v947_v43  ;;  %v2453_v42 = vrot.slane %v5991_v22, 2  ;;  %v2005_v43 = vshrl.u32 %v5936_v50, 16 }
  0x54   : > { %5302 = vmatprep.mubr.msk.bf16.mxu0 %vm404_vm1, %v1252_v59  ;;  %5268 = vmatprep.mubr.msk.bf16.mxu1 %vm404_vm1, %v900_v61  ;;  %v1267_v59 = vrot.slane %v5907_v25, 1  ;;  %v5953_v61 = vld [vmem:[%s5727_s8 + $0x38] sm:$0xff]  }
  0x55   : > { %v2445_v18 = vrot.slane %v5953_v61, 2  ;;  %v6055_v1 = vsel %vm2433_vm4, %v2453_v42, %v2455_v52 }
  0x56   : > { %v1268_v21 = vsel %vm1233_vm3, %v1265_v54, %v1267_v59  ;;  %v1678_v54 = vrot.slane %v5939_v51, 1 }
  0x57   : > { %v6000_v28 = vsel %vm2433_vm4, %v2443_v11, %v2445_v18 }
  0x5b   : > { %5303 = vmatmul.mubr.msk.bf16.gmra.mxu0 %vm404_vm1, %v1254_v9  ;;  %5269 = vmatmul.mubr.msk.bf16.gmra.mxu1 %vm404_vm1, %v908_v12  ;;  %v1999_v9 = vshll.u32 %v5929_v44, 16  ;;  %v2441_v12 = vrot.slane %v5945_v56, 2  ;;  %v2008_v44 = vshll.u32 %v5936_v50, 16  ;;  %v2014_v50 = vshrl.u32 %v5939_v51, 16 }
  0x5c   : > { %5306 = vmatprep.mubr.msk.bf16.mxu0 %vm404_vm1, %v1256_v13  ;;  %5272 = vmatprep.mubr.msk.bf16.mxu1 %vm404_vm1, %v916_v15  ;;  %v1673_v13 = vrot.slane %v4701_v55, 1  ;;  %v5978_v15 = vld [vmem:[%s5727_s8 + $0x48] sm:$0xff]   ;;  %v2017_v55 = vshll.u32 %v5939_v51, 16  ;;  %v1677_v51 = vsel %vm1233_vm3, %v1674_v14, %v1676_v36 }
  0x5d   : > { %v5994_v23 = vsel %vm2433_vm4, %v2439_v0, %v2441_v12  ;;  %v5997_v27 = vsel %vm2433_vm4, %v2441_v12, %v2443_v11  ;;  %v2449_v33 = vrot.slane %v5978_v15, 2  ;;  %v6052_v0 = vld [vmem:[%s5727_s8 + $0x88] sm:$0xff]   ;;  %v2463_v12 = vrot.slane %v6049_v63, 2 }
  0x5e   : > { %v1675_v34 = vsel %vm1233_vm3, %v1673_v13, %v1674_v14  ;;  %v2465_v13 = vrot.slane %v6052_v0, 2  ;;  %v2526_v11 = vsel %vm459_vm0, %v5811_v62, 0  ;;  %v2016_v14 = vrot.slane %v2014_v50, 1 }
  0x5f   : > { %v6030_v46 = vsel %vm2433_vm4, %v2449_v33, %v2451_v38 }
  0x63   : > { %5307 = vmatmul.mubr.msk.bf16.gmra.mxu0 %vm404_vm1, %v1258_v26  ;;  %5273 = vmatmul.mubr.msk.bf16.gmra.mxu1 %vm404_vm1, %v924_v29  ;;  %v1993_v26 = vrot.slane %v1991_v5, 2  ;;  %v1998_v29 = vrot.slane %v1996_v6, 1  ;;  %v2007_v5 = vrot.slane %v2005_v43, 1  ;;  %v2010_v6 = vrot.slane %v2008_v44, 2 }
  0x64   : > { %5310 = vmatprep.mubr.msk.bf16.mxu0 %vm404_vm1, %v1260_v30  ;;  %5276 = vmatprep.mubr.msk.bf16.mxu1 %vm404_vm1, %v932_v32  ;;  %v2001_v30 = vrot.slane %v1999_v9, 2  ;;  %v2447_v32 = vrot.slane %v5973_v10, 2 }
  0x65   : > { %v1994_v31 = vor.u32 %v1993_v26, %v1990_v24  ;;  %v6084_v24 = vsel %vm2433_vm4, %v2463_v12, %v2465_v13  ;;  %v2011_v62 = vor.u32 %v2010_v6, %v2007_v5  ;;  %v2023_v26 = vshrl.u32 %v5945_v56, 16 }
  0x66   : > { %v6016_v40 = vsel %vm2433_vm4, %v2445_v18, %v2447_v32  ;;  %v6019_v41 = vsel %vm2433_vm4, %v2447_v32, %v2449_v33  ;;  %v2002_v47 = vor.u32 %v2001_v30, %v1998_v29  ;;  %v1679_v18 = vsel %vm1233_vm3, %v1676_v36, %v1678_v54  ;;  %v6096_v36 = vld [vmem:[%s5727_s8 + $0x90] sm:$0xff]  }
  0x67   : > { %v2026_v29 = vshll.u32 %v5945_v56, 16  ;;  %v1680_v30 = vrot.slane %v5945_v56, 1  ;;  %v2032_v32 = vshrl.u32 %v5950_v60, 16  ;;  %v2035_v33 = vshll.u32 %v5950_v60, 16 }
  0x68   : > { %v2025_v56 = vrot.slane %v2023_v26, 1  ;;  %v2467_v44 = vrot.slane %v6096_v36, 2  ;;  %v2050_v5 = vshrl.u32 %v5973_v10, 16  ;;  %v2053_v6 = vshll.u32 %v5973_v10, 16 }
  0x69   : > { %v2028_v43 = vrot.slane %v2026_v29, 2 }
  0x6b   : > { %5311 = vmatmul.mubr.msk.bf16.gmra.mxu0 %vm404_vm1, %v1262_v49  ;;  %5277 = vmatmul.mubr.msk.bf16.gmra.mxu1 %vm404_vm1, %v940_v48  ;;  %v6034_v48 = vld [vmem:[%s5727_s8 + $0x78] sm:$0xff]   ;;  %v6037_v49 = vsel %vm2433_vm4, %v2451_v38, %v2453_v42  ;;  %v2965_v38 = vsel %vm459_vm0, %v5836_v17, 0  ;;  %v6112_v17 = vsel %vm2433_vm4, %v2465_v13, %v2467_v44  ;;  %v1686_v13 = vrot.slane %v5973_v10, 1 }
  0x6c   : > { %5314 = vmatprep.mubr.msk.bf16.mxu0 %vm404_vm1, %v1264_v53  ;;  %5280 = vmatprep.mubr.msk.bf16.mxu1 %vm404_vm1, %v948_v58  ;;  %v2457_v53 = vrot.slane %v6013_v39, 2  ;;  %v1270_v58 = vsel %vm1233_vm3, %v1267_v59, %v1269_v35  ;;  %v2461_v3 = vrot.slane %v6034_v48, 2  ;;  %v2003_v59 = vsel %vm1986_vm5, %v1994_v31, %v2002_v47  ;;  %v6103_v42 = vld [vmem:[%s5727_s8 + $0x98] ss:$0 sps:$4 sm:$0x33]  }
  0x6d   : > { %v2012_v31 = vsel %vm1986_vm5, %v2002_v47, %v2011_v62  ;;  %v2469_v50 = vrot.slane %v6103_v42, 2  ;;  %v2041_v47 = vshrl.u32 %v5953_v61, 16  ;;  %v1688_v10 = vrot.slane %v5978_v15, 1 }
  0x6e   : > { %v6058_v2 = vsel %vm2433_vm4, %v2455_v52, %v2457_v53  ;;  %v6063_v25 = vsel %vm2433_vm4, %v2457_v53, %v2459_v57  ;;  %v6067_v9 = vsel %vm2433_vm4, %v2459_v57, %v2461_v3  ;;  %v1681_v52 = vsel %vm1233_vm3, %v1678_v54, %v1680_v30  ;;  %v6120_v54 = vld [vmem:[%s7229_s1 + $0x10] sm:$0x3] }
  0x6f   : > { %v2037_v53 = vrot.slane %v2035_v33, 2 }
  0x73   : > { %5315 = vmatmul.mubr.msk.bf16.gmra.mxu0 %vm404_vm1, %v1266_v20  ;;  %5281 = vmatmul.mubr.msk.bf16.gmra.mxu1 %vm404_vm1, %v956_v19  ;;  %v2019_v19 = vrot.slane %v2017_v55, 2  ;;  %v6078_v20 = vld [vmem:[%s7229_s1 + $0xe] sm:$0x3] }
  0x74   : > { %5318 = vmatprep.mubr.msk.bf16.mxu0 %vm404_vm1, %v1268_v21  ;;  %5324 = vmatprep.mubr.msk.bf16.mxu1 %vm404_vm1, %v1675_v34  ;;  %v6081_v21 = vsel %vm2433_vm4, %v2461_v3, %v2463_v12  ;;  %v1682_v34 = vrot.slane %v5950_v60, 1  ;;  %v2034_v60 = vrot.slane %v2032_v32, 1  ;;  %v6123_v3 = vsel %vm2433_vm4, %v2467_v44, %v2469_v50  ;;  %v6153_v44 = vld [vmem:[%s5727_s8 + $0x18] sm:$0xff]   ;;  %v6159_v50 = vld [vmem:[%s5727_s8 + $0x20] sm:$0xff]  }
  0x75   : > { %v2020_v35 = vor.u32 %v2019_v19, %v2016_v14  ;;  %v2052_v19 = vrot.slane %v2050_v5, 1  ;;  %v2059_v32 = vshrl.u32 %v5978_v15, 16 }
  0x76   : > { %v1683_v55 = vsel %vm1233_vm3, %v1680_v30, %v1682_v34  ;;  %v2038_v12 = vor.u32 %v2037_v53, %v2034_v60  ;;  %v1689_v60 = vsel %vm1233_vm3, %v1686_v13, %v1688_v10 }
  0x77   : > { %v2021_v57 = vsel %vm1986_vm5, %v2011_v62, %v2020_v35  ;;  %v2055_v62 = vrot.slane %v2053_v6, 2 }
  0x79   : > { %v2056_v33 = vor.u32 %v2055_v62, %v2052_v19  ;;  %v2086_v62 = vshrl.u32 %v6008_v37, 16 }
  0x7b   : > { %5319 = vmatmul.mubr.msk.bf16.gmra.mxu0 %vm404_vm1, %v1270_v58  ;;  %5325 = vmatmul.mubr.msk.bf16.vlgmr.msra.gmra.mxu1 %vm404_vm1, %v1677_v51  ;;  %v2044_v58 = vshll.u32 %v5953_v61, 16  ;;  %v2029_v51 = vor.u32 %v2028_v43, %v2025_v56  ;;  %v3627_v56 = vld [vmem:[%s5727_s8 + $0x10] sm:$0x8]  ;;  %v1690_v43 = vrot.slane %v5981_v16, 1 }
  0x7c   : > { %5362 = vmatprep.mubr.msk.bf16.mxu0 %vm404_vm1, %v2003_v59  ;;  %5399 = vmatpush3.bf16.msra.mxu1 %v2526_v11  ;;  %v1684_v59 = vrot.slane %v5953_v61, 1  ;;  %v2043_v11 = vrot.slane %v2041_v47, 1 }
  0x7d   : > { %5328 = vmatprep.mubr.msk.bf16.mxu1 %vm404_vm1, %v1679_v18  ;;  %5560 = vmatprep.subr.msk.bf16.mxu1 %vm459_vm0, %v6078_v20  ;;  %v2046_v18 = vrot.slane %v2044_v58, 2  ;;  %v2030_v14 = vsel %vm1986_vm5, %v2020_v35, %v2029_v51  ;;  %v2039_v29 = vsel %vm1986_vm5, %v2029_v51, %v2038_v12  ;;  %v2068_v35 = vshrl.u32 %v5981_v16, 16 }
  0x7e   : > { %v1685_v26 = vsel %vm1233_vm3, %v1682_v34, %v1684_v59  ;;  %v1687_v61 = vsel %vm1233_vm3, %v1684_v59, %v1686_v13  ;;  %v2062_v34 = vshll.u32 %v5978_v15, 16  ;;  %v2061_v15 = vrot.slane %v2059_v32, 1 }
  0x7f   : > { %v2047_v30 = vor.u32 %v2046_v18, %v2043_v11  ;;  %v3635_v58 = vrot.slane %v6153_v44, 3  ;;  %v2070_v51 = vrot.slane %v2068_v35, 1  ;;  %v1691_v6 = vsel %vm1233_vm3, %v1688_v10, %v1690_v43 }
  0x80   : > { %v2077_v18 = vshrl.u32 %v5991_v22, 16 }
  0x81   : > { %v2048_v53 = vsel %vm1986_vm5, %v2038_v12, %v2047_v30  ;;  %v1692_v12 = vrot.slane %v5991_v22, 1 }
  0x83   : > { %5363 = vmatmul.mubr.msk.bf16.vlgmr.msra.gmra.mxu0 %vm404_vm1, %v2012_v31  ;;  %5329 = vmatmul.mubr.msk.bf16.gmra.mxu1 %vm404_vm1, %v1681_v52  ;;  %v6148_v31 = vld [vmem:[%s5727_s8 + $0x14] sm:$0xf]  ;;  %v1693_v10 = vsel %vm1233_vm3, %v1690_v43, %v1692_v12 }
  0x84   : > { %5437 = vmatpush3.bf16.msra.mxu0 %v2965_v38  ;;  %5332 = vmatprep.mubr.msk.bf16.mxu1 %vm404_vm1, %v1683_v55  ;;  %v2071_v38 = vshll.u32 %v5981_v16, 16  ;;  %v4837_v52 = vcombine.low %v3627_v56, %v6148_v31  ;;  %v2057_v55 = vsel %vm1986_vm5, %v2047_v30, %v2056_v33  ;;  %v3637_v16 = vrot.slane %v6159_v50, 3  ;;  %v6186_v30 = vld [vmem:[%s5727_s8 + $0x30] sm:$0xff]  }
  0x85   : > { %5366 = vmatprep.mubr.msk.bf16.mxu0 %vm404_vm1, %v2021_v57  ;;  %5561 = vmatprep.subr.msk.bf16.mxu0 %vm459_vm0, %v6120_v54  ;;  %v2064_v57 = vrot.slane %v2062_v34, 2  ;;  %v2079_v34 = vrot.slane %v2077_v18, 1  ;;  %v3641_v43 = vrot.slane %v6186_v30, 3  ;;  %v6219_v18 = vld [vmem:[%s5727_s8 + $0x38] sm:$0xff]  }
  0x86   : > { %v3634_v47 = vrot.slane %v4837_v52, 3  ;;  %v2073_v5 = vrot.slane %v2071_v38, 2  ;;  %v6171_v13 = vsel %vm3633_vm6, %v3635_v58, %v3637_v16  ;;  %v4121_v38 = vld [vmem:[%s7231_s3] sm:$0xff]  ;;  %v2088_v52 = vrot.slane %v2086_v62, 1 }
  0x87   : > { %v2065_v11 = vor.u32 %v2064_v57, %v2061_v15  ;;  %v1696_v15 = vrot.slane %v6013_v39, 1 }
  0x88   : > { %v6166_v59 = vsel %vm3633_vm6, %v3634_v47, %v3635_v58  ;;  %v2074_v19 = vor.u32 %v2073_v5, %v2070_v51  ;;  %v2095_v47 = vshrl.u32 %v6013_v39, 16  ;;  %v2098_v58 = vshll.u32 %v6013_v39, 16  ;;  %v4123_v51 = vld [vmem:[%s7231_s3 + $0x10] sm:$0xff]  ;;  %v4122_v5 = vld [vmem:[%s7231_s3 + $0x8] sm:$0xff] }
  0x89   : > { %v2066_v32 = vsel %vm1986_vm5, %v2056_v33, %v2065_v11 }
  0x8b   : > { %5367 = vmatmul.mubr.msk.bf16.gmra.mxu0 %vm404_vm1, %v2030_v14  ;;  %5333 = vmatmul.mubr.msk.bf16.gmra.mxu1 %vm404_vm1, %v1685_v26  ;;  %v2080_v14 = vshll.u32 %v5991_v22, 16  ;;  %v2089_v26 = vshll.u32 %v6008_v37, 16  ;;  %v5663_v22 = vmov 0  }
  0x8c   : > { %5370 = vmatprep.mubr.msk.bf16.mxu0 %vm404_vm1, %v2039_v29  ;;  %5336 = vmatprep.mubr.msk.bf16.mxu1 %vm404_vm1, %v1687_v61  ;;  %v1694_v29 = vrot.slane %v6008_v37, 1  ;;  %v6182_v61 = vld [vmem:[%s5727_s8 + $0x28] sm:$0xff]   ;;  %v2075_v37 = vsel %vm1986_vm5, %v2065_v11, %v2074_v19  ;;  %v1698_v11 = vrot.slane %v6027_v45, 1 }
  0x8d   : > { %v2082_v35 = vrot.slane %v2080_v14, 2  ;;  %5573 = vset.pattern.permute.xlu0 %v5663_v22  ;;  %v3639_v56 = vrot.slane %v6182_v61, 3  ;;  %5574 = vset.pattern.permute.xlu1 %v5663_v22  ;;  %v6223_v14 = vld [vmem:[%s5727_s8 + $0x40] sm:$0xff]  }
  0x8e   : > { %4159 = vperm.xlu0 %5573, %v4121_v38   ;;  %v1695_v33 = vsel %vm1233_vm3, %v1692_v12, %v1694_v29  ;;  %v2107_v12 = vshll.u32 %v6027_v45, 16  ;;  %4169 = vperm.xlu1 %5574, %v4123_v51   ;;  %v1697_v39 = vsel %vm1233_vm3, %v1694_v29, %v1696_v15  ;;  %v3645_v38 = vrot.slane %v6223_v14, 3 }
  0x8f   : > { %v2083_v57 = vor.u32 %v2082_v35, %v2079_v34  ;;  %v4125_v34 = vld [vmem:[%s7231_s3 + $0x20] sm:$0xff]  ;;  %v2125_v51 = vshll.u32 %v6049_v63, 16 }
  0x90   : > { %v2109_v29 = vrot.slane %v2107_v12, 2  ;;  %v6263_v12 = vld [vmem:[%s5727_s8 + $0x50] sm:$0xff]  }
  0x91   : > { %v2084_v62 = vsel %vm1986_vm5, %v2074_v19, %v2083_v57  ;;  %v1699_v19 = vsel %vm1233_vm3, %v1696_v15, %v1698_v11  ;;  %v2116_v15 = vshll.u32 %v6034_v48, 16 }
  0x92   : > { %4164 = vperm.xlu0 %5573, %v4122_v5   ;;  %v1702_v5 = vrot.slane %v6049_v63, 1 }
  0x93   : > { %5371 = vmatmul.mubr.msk.bf16.gmra.mxu0 %vm404_vm1, %v2048_v53  ;;  %5337 = vmatmul.mubr.msk.bf16.gmra.mxu1 %vm404_vm1, %v1689_v60  ;;  %v2091_v60 = vrot.slane %v2089_v26, 2  ;;  %v6197_v53 = vsel %vm3633_vm6, %v3637_v16, %v3639_v56  ;;  %v2097_v26 = vrot.slane %v2095_v47, 1 }
  0x94   : > { %5374 = vmatprep.mubr.msk.bf16.mxu0 %vm404_vm1, %v2057_v55  ;;  %5340 = vmatprep.mubr.msk.bf16.mxu1 %vm404_vm1, %v1691_v6  ;;  %v6202_v55 = vsel %vm3633_vm6, %v3639_v56, %v3641_v43  ;;  %v2104_v6 = vshrl.u32 %v6027_v45, 16  ;;  %v3643_v45 = vrot.slane %v6219_v18, 3 }
  0x95   : > { %v2092_v16 = vor.u32 %v2091_v60, %v2088_v52 }
  0x96   : > { %v2106_v22 = vrot.slane %v2104_v6, 1  ;;  %4179 = vperm.xlu0 %5573, %v4125_v34   ;;  %v6237_v56 = vsel %vm3633_vm6, %v3641_v43, %v3643_v45  ;;  %v6242_v52 = vsel %vm3633_vm6, %v3643_v45, %v3645_v38  ;;  %v4126_v43 = vld [vmem:[%s7231_s3 + $0x28] sm:$0xff] }
  0x97   : > { %v2093_v35 = vsel %vm1986_vm5, %v2083_v57, %v2092_v16  ;;  %7244 = vst [vmem:[#allocation2_spill] sm:$0xff] %v6242_v52  ;;  %v4127_v57 = vld [vmem:[%s7231_s3 + $0x30] sm:$0xff]  ;;  %v6259_v6 = vld [vmem:[%s5727_s8 + $0x48] sm:$0xff]  }
  0x98   : > { %v2110_v47 = vor.u32 %v2109_v29, %v2106_v22  ;;  %v1704_v29 = vrot.slane %v6052_v0, 1 }
  0x9a   : > { %4189 = vperm.xlu0 %5573, %v4127_v57   ;;  %v2140_v57 = vshrl.u32 %v6096_v36, 16 }
  0x9b   : > { %5375 = vmatmul.mubr.msk.bf16.gmra.mxu0 %vm404_vm1, %v2066_v32  ;;  %5341 = vmatmul.mubr.msk.bf16.gmra.mxu1 %vm404_vm1, %v1693_v10  ;;  %v2100_v10 = vrot.slane %v2098_v58, 2  ;;  %v4124_v32 = vld [vmem:[%s7231_s3 + $0x18] sm:$0xff]  ;;  %v2122_v58 = vshrl.u32 %v6049_v63, 16  ;;  %v3647_v63 = vrot.slane %v6259_v6, 3 }
  0x9c   : > { %5378 = vmatprep.mubr.msk.bf16.mxu0 %vm404_vm1, %v2075_v37  ;;  %5344 = vmatprep.mubr.msk.bf16.mxu1 %vm404_vm1, %v1695_v33  ;;  %v1700_v37 = vrot.slane %v6034_v48, 1  ;;  %v2113_v33 = vshrl.u32 %v6034_v48, 16 }
  0x9d   : > { %4174 = vperm.xlu1 %5574, %v4124_v32   ;;  %v2101_v60 = vor.u32 %v2100_v10, %v2097_v26  ;;  %v2118_v26 = vrot.slane %v2116_v15, 2  ;;  %v4128_v10 = vld [vmem:[%s7231_s3 + $0x38] sm:$0xff]  ;;  %v4129_v32 = vld [vmem:[%s7231_s3 + $0x40] sm:$0xff]  ;;  %v2124_v45 = vrot.slane %v2122_v58, 1  ;;  %v6277_v22 = vsel %vm3633_vm6, %v3645_v38, %v3647_v63  ;;  %v4130_v38 = vld [vmem:[%s7231_s3 + $0x48] sm:$0xff] }
  0x9e   : > { %v1701_v48 = vsel %vm1233_vm3, %v1698_v11, %v1700_v37  ;;  %v2127_v11 = vrot.slane %v2125_v51, 2  ;;  %4199 = vperm.xlu0 %5573, %v4129_v32   ;;  %7245 = vst [vmem:[#allocation3_spill] sm:$0xff] %v6277_v22  ;;  %v4131_v15 = vld [vmem:[%s7231_s3 + $0x50] sm:$0xff]  ;;  %v2143_v58 = vshll.u32 %v6096_v36, 16  ;;  %v1706_v51 = vrot.slane %v6096_v36, 1  ;;  %v4132_v32 = vld [vmem:[%s7231_s3 + $0x58] sm:$0xff] }
  0x9f   : > { %v2111_v34 = vsel %vm1986_vm5, %v2101_v60, %v2110_v47 }
  0xa1   : > { %4184 = vperm.xlu1 %5574, %v4126_v43   ;;  %v2128_v43 = vor.u32 %v2127_v11, %v2124_v45  ;;  %v5631_v45 = vld [vmem:[%s5727_s8 + $0x98] ss:$0 sps:$4 sm:$0x11]   ;;  %v2145_v11 = vrot.slane %v2143_v58, 2 }
  0xa2   : > { %4209 = vperm.xlu0 %5573, %v4131_v15   ;;  %v4135_v15 = vld [vmem:[%s7231_s3 + $0x70] sm:$0xff] }
  0xa3   : > { %5379 = vmatmul.mubr.msk.bf16.gmra.mxu0 %vm404_vm1, %v2084_v62  ;;  %5345 = vmatmul.mubr.msk.bf16.gmra.mxu1 %vm404_vm1, %v1697_v39  ;;  %v2102_v39 = vsel %vm1986_vm5, %v2092_v16, %v2101_v60  ;;  %v2115_v62 = vrot.slane %v2113_v33, 1  ;;  %v1703_v16 = vsel %vm1233_vm3, %v1700_v37, %v1702_v5  ;;  %v2131_v37 = vshrl.u32 %v6052_v0, 16 }
  0xa4   : > { %5382 = vmatprep.mubr.msk.bf16.mxu0 %vm404_vm1, %v2093_v35  ;;  %5348 = vmatprep.mubr.msk.bf16.mxu1 %vm404_vm1, %v1699_v19  ;;  %v3649_v35 = vrot.slane %v6263_v12, 3  ;;  %v2134_v33 = vshll.u32 %v6052_v0, 16  ;;  %v6299_v0 = vld [vmem:[%s5727_s8 + $0x58] sm:$0xff]  }
  0xa5   : > { %4194 = vperm.xlu1 %5574, %v4128_v10   ;;  %v2119_v60 = vor.u32 %v2118_v26, %v2115_v62  ;;  %v2133_v26 = vrot.slane %v2131_v37, 1  ;;  %v3651_v36 = vrot.slane %v6299_v0, 3 }
  0xa6   : > { %v6282_v19 = vsel %vm3633_vm6, %v3647_v63, %v3649_v35  ;;  %v2136_v10 = vrot.slane %v2134_v33, 2  ;;  %v4133_v63 = vld [vmem:[%s7231_s3 + $0x60] sm:$0xff] }
  0xa7   : > { %7246 = vst [vmem:[#allocation4_spill] sm:$0xff] %v6282_v19  ;;  %v2120_v62 = vsel %vm1986_vm5, %v2110_v47, %v2119_v60  ;;  %4219 = vperm.xlu0 %5573, %v4133_v63   ;;  %v6318_v37 = vsel %vm3633_vm6, %v3649_v35, %v3651_v36  ;;  %v4134_v35 = vld [vmem:[%s7231_s3 + $0x68] sm:$0xff] }
  0xa8   : > { %7247 = vst [vmem:[#allocation5_spill] sm:$0xff] %v6318_v37 }
  0xa9   : > { %4204 = vperm.xlu1 %5574, %v4130_v38   ;;  %v2149_v38 = vshrl.u32 %v6103_v42, 16 }
  0xab   : > { %5383 = vmatmul.mubr.msk.bf16.gmra.mxu0 %vm404_vm1, %v2102_v39  ;;  %5349 = vmatmul.mubr.msk.bf16.gmra.mxu1 %vm404_vm1, %v1701_v48  ;;  %v1705_v48 = vsel %vm1233_vm3, %v1702_v5, %v1704_v29  ;;  %v6303_v39 = vld [vmem:[%s5727_s8 + $0x60] sm:$0xff]   ;;  %v2142_v5 = vrot.slane %v2140_v57, 1  ;;  %v1708_v57 = vrot.slane %v5631_v45, 1  ;;  %v4138_v45 = vld [vmem:[%s7231_s3 + $0x88] sm:$0xff] }
  0xac   : > { %5386 = vmatprep.mubr.msk.bf16.mxu0 %vm404_vm1, %v2111_v34  ;;  %5352 = vmatprep.mubr.msk.bf16.mxu1 %vm404_vm1, %v1703_v16  ;;  %v2129_v34 = vsel %vm1986_vm5, %v2119_v60, %v2128_v43  ;;  %v7235_v47 = vrot.slane %v6303_v39, 3  ;;  %v1707_v16 = vsel %vm1233_vm3, %v1704_v29, %v1706_v51  ;;  %v2137_v60 = vor.u32 %v2136_v10, %v2133_v26 }
  0xad   : > { %4214 = vperm.xlu1 %5574, %v4132_v32   ;;  %v2152_v29 = vshll.u32 %v6103_v42, 16  ;;  %v2146_v58 = vor.u32 %v2145_v11, %v2142_v5  ;;  %4229 = vperm.xlu0 %5573, %v4135_v15   ;;  %v2151_v26 = vrot.slane %v2149_v38, 1  ;;  %v4136_v42 = vld [vmem:[%s7231_s3 + $0x78] sm:$0xff]  ;;  %v4137_v32 = vld [vmem:[%s7231_s3 + $0x80] sm:$0xff]  ;;  %v1709_v63 = vsel %vm1233_vm3, %v1706_v51, %v1708_v57  ;;  %v4139_v51 = vld [vmem:[%s7231_s3 + $0x90] sm:$0xff] }
  0xae   : > { %v6324_v33 = vsel %vm3633_vm6, %v3651_v36, %v7235_v47  ;;  %v2874_v5 = vrot.slane %v6153_v44, 2  ;;  %v4143_v15 = vld [vmem:[%s7231_s3 + $0xb0] sm:$0xff]  ;;  %v4144_v57 = vld [vmem:[%s7231_s3 + $0xb8] sm:$0xff] }
  0xaf   : > { %7248 = vst [vmem:[#allocation6_spill] sm:$0xff] %v6324_v33  ;;  %v2154_v10 = vrot.slane %v2152_v29, 2  ;;  %v2147_v36 = vsel %vm1986_vm5, %v2137_v60, %v2146_v58  ;;  %v2876_v29 = vrot.slane %v6159_v50, 2 }
  0xb1   : > { %4224 = vperm.xlu1 %5574, %v4134_v35   ;;  %4239 = vperm.xlu0 %5573, %v4137_v32   ;;  %v4142_v35 = vld [vmem:[%s7231_s3 + $0xa8] sm:$0xff]  ;;  %v4149_v32 = vld [vmem:[%s7231_s3 + $0xe0] sm:$0xff] }
  0xb3   : > { %5387 = vmatmul.mubr.msk.bf16.gmra.mxu0 %vm404_vm1, %v2120_v62  ;;  %5353 = vmatmul.mubr.msk.bf16.gmra.mxu1 %vm404_vm1, %v1705_v48  ;;  %v2741_v48 = vld [vmem:[%s5727_s8 + $0x10] sm:$0xc]  ;;  %v2138_v62 = vsel %vm1986_vm5, %v2128_v43, %v2137_v60  ;;  %v2155_v43 = vor.u32 %v2154_v10, %v2151_v26  ;;  %v4141_v60 = vld [vmem:[%s7231_s3 + $0xa0] sm:$0xff]  ;;  %v4146_v26 = vld [vmem:[%s7231_s3 + $0xc8] sm:$0xff]  ;;  %v2882_v10 = vrot.slane %v6219_v18, 2 }
  0xb4   : > { %5390 = vmatprep.mubr.msk.bf16.mxu0 %vm404_vm1, %v2129_v34  ;;  %5356 = vmatprep.mubr.msk.bf16.mxu1 %vm404_vm1, %v1707_v16  ;;  %v6348_v34 = vcombine.low %v2741_v48, %v6148_v31  ;;  %v4140_v16 = vld [vmem:[%s7231_s3 + $0x98] sm:$0xff]  ;;  %v3726_v48 = vsel %vm459_vm0, %v6120_v54, 0  ;;  %v4147_v54 = vld [vmem:[%s7231_s3 + $0xd0] sm:$0xff] }
  0xb5   : > { %4234 = vperm.xlu1 %5574, %v4136_v42   ;;  %4249 = vperm.xlu0 %5573, %v4139_v51   ;;  %v2156_v11 = vsel %vm1986_vm5, %v2146_v58, %v2155_v43  ;;  %v4145_v58 = vld [vmem:[%s7231_s3 + $0xc0] sm:$0xff]  ;;  %v4148_v42 = vld [vmem:[%s7231_s3 + $0xd8] sm:$0xff]  ;;  %v2884_v43 = vrot.slane %v6223_v14, 2  ;;  %v4151_v51 = vld [vmem:[%s7231_s3 + $0xf0] sm:$0xff] }
  0xb6   : > { %v2873_v31 = vrot.slane %v6348_v34, 2 }
  0xb8   : > { %v2875_v38 = vsel %vm2433_vm4, %v2873_v31, %v2874_v5 }
  0xb9   : > { %4244 = vperm.xlu1 %5574, %v4138_v45   ;;  %4259 = vperm.xlu0 %5573, %v4141_v60   ;;  %v4150_v45 = vld [vmem:[%s7231_s3 + $0xe8] sm:$0xff]  ;;  %v2885_v60 = vsel %vm2433_vm4, %v2882_v10, %v2884_v43 }
  0xbb   : > { %5391 = vmatmul.mubr.msk.bf16.gmra.mxu0 %vm404_vm1, %v2138_v62  ;;  %5357 = vmatmul.mubr.msk.bf16.gmra.mxu1 %vm404_vm1, %v1709_v63 }
  0xbc   : > { %5394 = vmatprep.mubr.msk.bf16.mxu0 %vm404_vm1, %v2147_v36  ;;  %5400 = vmatprep.mubr.msk.bf16.mxu1 %vm404_vm1, %v5959_v4  ;;  %v3412_v4 = vsel %vm459_vm0, %v6078_v20, 0  ;;  %v2878_v20 = vrot.slane %v6182_v61, 2 }
  0xbd   : > { %4254 = vperm.xlu1 %5574, %v4140_v16   ;;  %4269 = vperm.xlu0 %5573, %v4143_v15  }
  0xbe   : > { %v2879_v62 = vsel %vm2433_vm4, %v2876_v29, %v2878_v20 }
  0xc1   : > { %4264 = vperm.xlu1 %5574, %v4142_v35   ;;  %4279 = vperm.xlu0 %5573, %v4145_v58   ;;  %v4155_v58 = vld [vmem:[%s7231_s3 + $0x110] sm:$0xff] }
  0xc3   : > { %5395 = vmatmul.mubr.msk.bf16.gmra.mxu0 %vm404_vm1, %v2156_v11  ;;  %5401 = vmatmul.mubr.msk.bf16.vlgmr.msra.gmra.mxu1 %vm404_vm1, %v5965_v7  ;;  %v2877_v7 = vsel %vm2433_vm4, %v2874_v5, %v2876_v29  ;;  %v2886_v5 = vrot.slane %v6259_v6, 2 }
  0xc4   : > { %5438 = vmatprep.mubr.msk.bf16.mxu0 %vm404_vm1, %v2875_v38  ;;  %5475 = vmatpush3.bf16.msra.mxu1 %v3412_v4  ;;  %v4152_v38 = vld [vmem:[%s7231_s3 + $0xf8] sm:$0xff] }
  0xc5   : > { %5404 = vmatprep.mubr.msk.bf16.mxu1 %vm404_vm1, %v5968_v8  ;;  %4274 = vperm.xlu1 %5574, %v4144_v57   ;;  %v2880_v8 = vrot.slane %v6186_v30, 2  ;;  %v2887_v29 = vsel %vm2433_vm4, %v2884_v43, %v2886_v5  ;;  %v4154_v57 = vld [vmem:[%s7231_s3 + $0x108] sm:$0xff] }
  0xc6   : > { %4289 = vperm.xlu0 %5573, %v4147_v54  }
  0xc7   : > { %v2883_v63 = vsel %vm2433_vm4, %v2880_v8, %v2882_v10  ;;  %v4156_v10 = vld [vmem:[%s7231_s3 + $0x118] sm:$0xff] }
  0xc9   : > { %4284 = vperm.xlu1 %5574, %v4146_v26  }
  0xca   : > { %4299 = vperm.xlu0 %5573, %v4149_v32  }
  0xcb   : > { %5439 = vmatmul.mubr.msk.bf16.vlgmr.msra.gmra.mxu0 %vm404_vm1, %v2877_v7  ;;  %5405 = vmatmul.mubr.msk.bf16.gmra.mxu1 %vm404_vm1, %v5994_v23  ;;  %v2881_v23 = vsel %vm2433_vm4, %v2878_v20, %v2880_v8  ;;  %v2888_v7 = vrot.slane %v6263_v12, 2 }
  0xcc   : > { %5513 = vmatpush3.bf16.msra.mxu0 %v3726_v48  ;;  %5408 = vmatprep.mubr.msk.bf16.mxu1 %vm404_vm1, %v5997_v27 }
  0xcd   : > { %5442 = vmatprep.mubr.msk.bf16.mxu0 %vm404_vm1, %v2879_v62  ;;  %4294 = vperm.xlu1 %5574, %v4148_v42   ;;  %v2889_v54 = vsel %vm2433_vm4, %v2886_v5, %v2888_v7  ;;  %v6491_v42 = vld [vmem:[%s5727_s8 + $0x68] sm:$0xff]  }
  0xce   : > { %4309 = vperm.xlu0 %5573, %v4151_v51   ;;  %v2894_v5 = vrot.slane %v6491_v42, 2 }
  0xd1   : > { %4304 = vperm.xlu1 %5574, %v4150_v45   ;;  %v2892_v45 = vrot.slane %v6303_v39, 2 }
  0xd3   : > { %v6419_v27 = vpop.f32.mrf.mxu0  ;;  %5443 = vmatmul.mubr.msk.bf16.gmra.mxu0 %vm404_vm1, %v2881_v23  ;;  %v6422_v36 = vpop.f32.mrf.mxu1  ;;  %5409 = vmatmul.mubr.msk.bf16.gmra.mxu1 %vm404_vm1, %v6000_v28 }
  0xd4   : > { %5446 = vmatprep.mubr.msk.bf16.mxu0 %vm404_vm1, %v2883_v63  ;;  %5412 = vmatprep.mubr.msk.bf16.mxu1 %vm404_vm1, %v6016_v40  ;;  %v4153_v40 = vld [vmem:[%s7231_s3 + $0x100] sm:$0xff] }
  0xd5   : > { %v6434_v31 = vpop.f32.mrf.mxu0  ;;  %v6439_v28 = vpop.f32.mrf.mxu1  ;;  %4314 = vperm.xlu1 %5574, %v4152_v38   ;;  %4319 = vperm.xlu0 %5573, %v4153_v40  }
  0xd7   : > { %v6441_v11 = vpop.f32.mrf.mxu0  ;;  %v6443_v16 = vpop.f32.mrf.mxu1 }
  0xd9   : > { %v6452_v4 = vpop.f32.mrf.mxu0  ;;  %v6455_v35 = vpop.f32.mrf.mxu1  ;;  %4324 = vperm.xlu1 %5574, %v4154_v57   ;;  %4329 = vperm.xlu0 %5573, %v4155_v58   ;;  %v2895_v57 = vsel %vm2433_vm4, %v2892_v45, %v2894_v5  ;;  %v6523_v58 = vld [vmem:[%s5727_s8 + $0x78] sm:$0xff]  }
  0xda   : > { %7249 = vst [vmem:[#allocation7_spill] sm:$0xff] %v6455_v35  ;;  %7258 = vst [vmem:[#allocation16_spill] sm:$0xff] %v6523_v58 }
  0xdb   : > { %v6457_v15 = vpop.f32.mrf.mxu0  ;;  %5447 = vmatmul.mubr.msk.bf16.gmra.mxu0 %vm404_vm1, %v2885_v60  ;;  %v6460_v20 = vpop.f32.mrf.mxu1  ;;  %5413 = vmatmul.mubr.msk.bf16.gmra.mxu1 %vm404_vm1, %v6019_v41  ;;  %v2890_v41 = vrot.slane %v6299_v0, 2 }
  0xdc   : > { %7250 = vst [vmem:[#allocation8_spill] sm:$0xff] %v6460_v20  ;;  %5450 = vmatprep.mubr.msk.bf16.mxu0 %vm404_vm1, %v2887_v29  ;;  %5416 = vmatprep.mubr.msk.bf16.mxu1 %vm404_vm1, %v6030_v46 }
  0xdd   : > { %v6472_v48 = vpop.f32.mrf.mxu0  ;;  %v6477_v62 = vpop.f32.mrf.mxu1  ;;  %v2891_v46 = vsel %vm2433_vm4, %v2888_v7, %v2890_v41  ;;  %4334 = vperm.xlu1 %5574, %v4156_v10   ;;  %v2893_v29 = vsel %vm2433_vm4, %v2890_v41, %v2892_v45  ;;  %v6533_v41 = vld [vmem:[%s7230_s2] ss:$0 sm:$0xff] }
  0xde   : > { %7251 = vst [vmem:[#allocation9_spill] sm:$0xff] %v6477_v62 }
  0xdf   : > { %v6479_v8 = vpop.f32.mrf.mxu0  ;;  %v6481_v26 = vpop.f32.mrf.mxu1 }
  0xe0   : > { %7252 = vst [vmem:[#allocation10_spill] sm:$0xff] %v6481_v26  ;;  %v6595_v26 = vld [vmem:[%s5727_s8 + $0x90] sm:$0xff]  }
  0xe1   : > { %v6487_v23 = vpop.f32.mrf.mxu0  ;;  %v6493_v32 = vpop.f32.mrf.mxu1 }
  0xe2   : > { %7253 = vst [vmem:[#allocation11_spill] sm:$0xff] %v6493_v32 }
  0xe3   : > { %v6495_v63 = vpop.f32.mrf.mxu0  ;;  %5451 = vmatmul.mubr.msk.bf16.gmra.mxu0 %vm404_vm1, %v2889_v54  ;;  %v6498_v43 = vpop.f32.mrf.mxu1  ;;  %5417 = vmatmul.mubr.msk.bf16.gmra.mxu1 %vm404_vm1, %v6037_v49  ;;  %v6517_v49 = vld [vmem:[%s5727_s8 + $0x70] sm:$0xff]  }
  0xe4   : > { %7254 = vst [vmem:[#allocation12_spill] sm:$0xff] %v6498_v43  ;;  %5454 = vmatprep.mubr.msk.bf16.mxu0 %vm404_vm1, %v2891_v46  ;;  %5420 = vmatprep.mubr.msk.bf16.mxu1 %vm404_vm1, %v6055_v1  ;;  %7257 = vst [vmem:[#allocation15_spill] sm:$0xff] %v6517_v49  ;;  %v2896_v46 = vrot.slane %v6517_v49, 2 }
  0xe5   : > { %v6504_v51 = vpop.f32.mrf.mxu0  ;;  %v6509_v60 = vpop.f32.mrf.mxu1 }
  0xe6   : > { %7255 = vst [vmem:[#allocation13_spill] sm:$0xff] %v6509_v60  ;;  %v6554_v60 = vld [vmem:[%s5727_s8 + $0x80] sm:$0xff]  }
  0xe7   : > { %v6511_v38 = vpop.f32.mrf.mxu0  ;;  %v6513_v40 = vpop.f32.mrf.mxu1  ;;  %7262 = vst [vmem:[#allocation20_spill] sm:$0xff] %v6554_v60 }
  0xe8   : > { %7256 = vst [vmem:[#allocation14_spill] sm:$0xff] %v6513_v40 }
  0xe9   : > { %v6519_v7 = vpop.f32.mrf.mxu0  ;;  %v6525_v54 = vpop.f32.mrf.mxu1 }
  0xea   : > { %7259 = vst [vmem:[#allocation17_spill] sm:$0xff] %v6525_v54 }
  0xeb   : > { %v6527_v1 = vpop.f32.mrf.mxu0  ;;  %5455 = vmatmul.mubr.msk.bf16.gmra.mxu0 %vm404_vm1, %v2893_v29  ;;  %v5244_v10 = vpop.f32.mrf.mxu1  ;;  %5421 = vmatmul.mubr.msk.bf16.gmra.mxu1 %vm404_vm1, %v6058_v2  ;;  %v2898_v29 = vrot.slane %v6523_v58, 2 }
  0xec   : > { %5458 = vmatprep.mubr.msk.bf16.mxu0 %vm404_vm1, %v2895_v57  ;;  %v6540_v45 = vadd.f32 %v5244_v10, %v6533_v41  ;;  %5424 = vmatprep.mubr.msk.bf16.mxu1 %vm404_vm1, %v6063_v25  ;;  %v2897_v57 = vsel %vm2433_vm4, %v2894_v5, %v2896_v46  ;;  %v6557_v10 = vld [vmem:[%s5727_s8 + $0x88] sm:$0xff]  }
  0xed   : > { %v6542_v47 = vpop.f32.mrf.mxu0  ;;  %v625_v33 = vpop.f32.mrf.mxu1  ;;  %7263 = vst [vmem:[#allocation21_spill] sm:$0xff] %v6557_v10  ;;  %v2899_v25 = vsel %vm2433_vm4, %v2896_v46, %v2898_v29  ;;  %v2902_v46 = vrot.slane %v6557_v10, 2  ;;  %v3199_v10 = vshll.u32 %v6153_v44, 16 }
  0xee   : > { %7260 = vst [vmem:[#allocation18_spill] sm:$0xff] %v6540_v45  ;;  %v6548_v54 = vadd.f32 %v6533_v41, %v625_v33  ;;  %v642_v33 = vadd.f32 %v6419_v27, %v6533_v41  ;;  %v640_v27 = vadd.f32 %v6533_v41, %v6434_v31 }
  0xef   : > { %v6550_v40 = vpop.f32.mrf.mxu0  ;;  %v5245_v2 = vpop.f32.mrf.mxu1  ;;  %v3201_v22 = vrot.slane %v3199_v10, 3 }
  0xf0   : > { %7261 = vst [vmem:[#allocation19_spill] sm:$0xff] %v6548_v54  ;;  %v6560_v45 = vadd.f32 %v5245_v2, %v6533_v41  ;;  %v2900_v2 = vrot.slane %v6554_v60, 2  ;;  %v643_v60 = vadd.f32 %v6441_v11, %v6533_v41 }
  0xf1   : > { %v6562_v37 = vpop.f32.mrf.mxu0  ;;  %v628_v19 = vpop.f32.mrf.mxu1 }
  0xf2   : > { %7264 = vst [vmem:[#allocation22_spill] sm:$0xff] %v6560_v45  ;;  %v6568_v54 = vadd.f32 %v6533_v41, %v628_v19  ;;  %v3196_v45 = vshrl.u32 %v6153_v44, 16  ;;  %v2901_v32 = vsel %vm2433_vm4, %v2898_v29, %v2900_v2  ;;  %v6602_v44 = vld [vmem:[%s5727_s8 + $0x98] sm:$0xff]   ;;  %v646_v29 = vadd.f32 %v6457_v15, %v6533_v41 }
  0xf3   : > { %v6570_v43 = vpop.f32.mrf.mxu0  ;;  %5459 = vmatmul.mubr.msk.bf16.gmra.mxu0 %vm404_vm1, %v2897_v57  ;;  %v5250_v5 = vpop.f32.mrf.mxu1  ;;  %5425 = vmatmul.mubr.msk.bf16.gmra.mxu1 %vm404_vm1, %v6067_v9  ;;  %v3188_v57 = vshrl.u32 %v6348_v34, 16  ;;  %v3191_v9 = vshll.u32 %v6348_v34, 16  ;;  %v641_v34 = vadd.f32 %v6533_v41, %v6452_v4  ;;  %v2904_v4 = vrot.slane %v6595_v26, 2 }
  0xf4   : > { %7265 = vst [vmem:[#allocation23_spill] sm:$0xff] %v6568_v54  ;;  %5462 = vmatprep.mubr.msk.bf16.mxu0 %vm404_vm1, %v2899_v25  ;;  %v1193_v19 = vadd.f32 %v5250_v5, %v642_v33  ;;  %5428 = vmatprep.mubr.msk.bf16.mxu1 %vm404_vm1, %v6081_v21  ;;  %v2903_v21 = vsel %vm2433_vm4, %v2900_v2, %v2902_v46 }
  0xf5   : > { %v6580_v54 = vpop.f32.mrf.mxu0  ;;  %v1048_v25 = vpop.f32.mrf.mxu1  ;;  %v3190_v49 = vrot.slane %v3188_v57, 2  ;;  %v3193_v11 = vrot.slane %v3191_v9, 3  ;;  %v644_v15 = vadd.f32 %v6533_v41, %v6472_v48  ;;  %v647_v48 = vadd.f32 %v6479_v8, %v6533_v41 }
  0xf6   : > { %v1191_v31 = vadd.f32 %v1048_v25, %v640_v27  ;;  %v3198_v25 = vrot.slane %v3196_v45, 2  ;;  %v3208_v45 = vshll.u32 %v6159_v50, 16 }
  0xf7   : > { %v6590_v33 = vpop.f32.mrf.mxu0  ;;  %v5251_v5 = vpop.f32.mrf.mxu1 }
  0xf8   : > { %v1194_v58 = vadd.f32 %v5251_v5, %v643_v60  ;;  %v3205_v60 = vshrl.u32 %v6159_v50, 16  ;;  %v3202_v5 = vor.u32 %v3201_v22, %v3198_v25  ;;  %v3217_v50 = vshll.u32 %v6182_v61, 16 }
  0xf9   : > { %v6599_v62 = vpop.f32.mrf.mxu0  ;;  %v1051_v27 = vpop.f32.mrf.mxu1  ;;  %v645_v22 = vadd.f32 %v6533_v41, %v6487_v23 }
  0xfa   : > { %v1192_v52 = vadd.f32 %v1051_v27, %v641_v34 }
  0xfb   : > { %v5288_v2 = vpop.f32.mrf.mxu0  ;;  %5463 = vmatmul.mubr.msk.bf16.gmra.mxu0 %vm404_vm1, %v2901_v32  ;;  %v5254_v20 = vpop.f32.mrf.mxu1  ;;  %5429 = vmatmul.mubr.msk.bf16.gmra.mxu1 %vm404_vm1, %v6084_v24  ;;  %v2906_v32 = vrot.slane %v6602_v44, 2  ;;  %v3194_v24 = vor.u32 %v3193_v11, %v3190_v49  ;;  %v5652_v49 = vld [vmem:[%s5727_s8 + $0xa0] ss:$0 sps:$4 sm:$0x33]   ;;  %v3207_v11 = vrot.slane %v3205_v60, 2 }
  0xfc   : > { %v6607_v35 = vadd.f32 %v5288_v2, %v1193_v19  ;;  %5466 = vmatprep.mubr.msk.bf16.mxu0 %vm404_vm1, %v2903_v21  ;;  %v1197_v10 = vadd.f32 %v5254_v20, %v646_v29  ;;  %5432 = vmatprep.mubr.msk.bf16.mxu1 %vm404_vm1, %v6112_v17  ;;  %v3214_v21 = vshrl.u32 %v6182_v61, 16  ;;  %v2905_v17 = vsel %vm2433_vm4, %v2902_v46, %v2904_v4 }
  0xfd   : > { %v1362_v57 = vpop.f32.mrf.mxu0  ;;  %v1064_v19 = vpop.f32.mrf.mxu1  ;;  %v2907_v61 = vsel %vm2433_vm4, %v2904_v4, %v2906_v32  ;;  %v3210_v2 = vrot.slane %v3208_v45, 3  ;;  %v650_v46 = vadd.f32 %v6495_v63, %v6533_v41  ;;  %v3223_v4 = vshrl.u32 %v6186_v30, 16 }
  0xfe   : > { %v6620_v9 = vadd.f32 %v1362_v57, %v1191_v31  ;;  %v1195_v20 = vadd.f32 %v1064_v19, %v644_v15  ;;  %v3203_v15 = vsel %vm3186_vm7, %v3194_v24, %v3202_v5  ;;  %v3216_v19 = vrot.slane %v3214_v21, 2 }
  0xff   : > { %v5289_v34 = vpop.f32.mrf.mxu0  ;;  %v5255_v27 = vpop.f32.mrf.mxu1  ;;  %v3226_v45 = vshll.u32 %v6186_v30, 16  ;;  %v648_v63 = vadd.f32 %v6533_v41, %v6504_v51 }
 0x100   : > { %v6626_v29 = vadd.f32 %v5289_v34, %v1194_v58  ;;  %v1198_v31 = vadd.f32 %v5255_v27, %v647_v48  ;;  %v3219_v58 = vrot.slane %v3217_v50, 3  ;;  %v3211_v50 = vor.u32 %v3210_v2, %v3207_v11 }
 0x101   : > { %v1365_v25 = vpop.f32.mrf.mxu0  ;;  %v1067_v57 = vpop.f32.mrf.mxu1  ;;  %v3228_v11 = vrot.slane %v3226_v45, 3 }
 0x102   : > { %v6633_v8 = vadd.f32 %v1365_v25, %v1192_v52  ;;  %v1196_v34 = vadd.f32 %v1067_v57, %v645_v22  ;;  %v2908_v52 = vrot.slane %v5652_v49, 2  ;;  %v3235_v49 = vshll.u32 %v6219_v18, 16 }
 0x103   : > { %v5292_v60 = vpop.f32.mrf.mxu0  ;;  %5467 = vmatmul.mubr.msk.bf16.gmra.mxu0 %vm404_vm1, %v2905_v17  ;;  %v5258_v23 = vpop.f32.mrf.mxu1  ;;  %5433 = vmatmul.mubr.msk.bf16.gmra.mxu1 %vm404_vm1, %v6123_v3  ;;  %v3220_v17 = vor.u32 %v3219_v58, %v3216_v19  ;;  %v3232_v3 = vshrl.u32 %v6219_v18, 16  ;;  %v651_v22 = vadd.f32 %v6511_v38, %v6533_v41  ;;  %v3212_v58 = vsel %vm3186_vm7, %v3202_v5, %v3211_v50 }
 0x104   : > { %v6639_v48 = vadd.f32 %v5292_v60, %v1197_v10  ;;  %5470 = vmatprep.mubr.msk.bf16.mxu0 %vm404_vm1, %v2907_v61  ;;  %v1201_v24 = vadd.f32 %v5258_v23, %v650_v46  ;;  %5476 = vmatprep.mubr.msk.bf16.mxu1 %vm404_vm1, %v3203_v15  ;;  %v2909_v57 = vsel %vm2433_vm4, %v2906_v32, %v2908_v52  ;;  %v3225_v15 = vrot.slane %v3223_v4, 2 }
 0x105   : > { %v1378_v21 = vpop.f32.mrf.mxu0  ;;  %v1080_v10 = vpop.f32.mrf.mxu1  ;;  %v3221_v38 = vsel %vm3186_vm7, %v3211_v50, %v3220_v17  ;;  %v3234_v60 = vrot.slane %v3232_v3, 2  ;;  %v3237_v23 = vrot.slane %v3235_v49, 3  ;;  %v3250_v3 = vshrl.u32 %v6259_v6, 16 }
 0x106   : > { %v6649_v27 = vadd.f32 %v1378_v21, %v1195_v20  ;;  %v1199_v30 = vadd.f32 %v1080_v10, %v648_v63  ;;  %v649_v20 = vadd.f32 %v6533_v41, %v6519_v7  ;;  %v3229_v5 = vor.u32 %v3228_v11, %v3225_v15 }
 0x107   : > { %v5293_v25 = vpop.f32.mrf.mxu0  ;;  %v5259_v61 = vpop.f32.mrf.mxu1  ;;  %v3244_v21 = vshll.u32 %v6223_v14, 16  ;;  %v3238_v10 = vor.u32 %v3237_v23, %v3234_v60  ;;  %v655_v49 = vadd.f32 %v6550_v40, %v6533_v41  ;;  %v3252_v40 = vrot.slane %v3250_v3, 2 }
 0x108   : > { %v6655_v51 = vadd.f32 %v5293_v25, %v1198_v31  ;;  %v1202_v2 = vadd.f32 %v5259_v61, %v651_v22  ;;  %v654_v31 = vadd.f32 %v6527_v1, %v6533_v41  ;;  %v3241_v1 = vshrl.u32 %v6223_v14, 16 }
 0x109   : > { %v1381_v19 = vpop.f32.mrf.mxu0  ;;  %v1083_v18 = vpop.f32.mrf.mxu1  ;;  %v653_v14 = vadd.f32 %v6533_v41, %v6562_v37  ;;  %v3259_v23 = vshrl.u32 %v6263_v12, 16 }
 0x10a   : > { %v6661_v46 = vadd.f32 %v1381_v19, %v1196_v34  ;;  %v1200_v32 = vadd.f32 %v1083_v18, %v649_v20  ;;  %v652_v34 = vadd.f32 %v6533_v41, %v6542_v47  ;;  %v3243_v11 = vrot.slane %v3241_v1, 2 }
 0x10b   : > { %v5296_v52 = vpop.f32.mrf.mxu0  ;;  %5471 = vmatmul.mubr.msk.bf16.gmra.mxu0 %vm404_vm1, %v2909_v57  ;;  %v5262_v4 = vpop.f32.mrf.mxu1  ;;  %5477 = vmatmul.mubr.msk.bf16.vlgmr.msra.gmra.mxu1 %vm404_vm1, %v3212_v58  ;;  %v3230_v57 = vsel %vm3186_vm7, %v3220_v17, %v3229_v5  ;;  %v3246_v20 = vrot.slane %v3244_v21, 3 }
 0x10c   : > { %v6667_v7 = vadd.f32 %v5296_v52, %v1201_v24  ;;  %5514 = vmatprep.mubr.msk.bf16.mxu0 %vm404_vm1, %v6166_v59  ;;  %v1205_v45 = vadd.f32 %v5262_v4, %v654_v31  ;;  %5480 = vmatprep.mubr.msk.bf16.mxu1 %vm404_vm1, %v3221_v38  ;;  %v3253_v59 = vshll.u32 %v6259_v6, 16  ;;  %v3239_v6 = vsel %vm3186_vm7, %v3229_v5, %v3238_v10 }
 0x10d   : > { %v1394_v63 = vpop.f32.mrf.mxu0  ;;  %v1096_v50 = vpop.f32.mrf.mxu1  ;;  %v3262_v31 = vshll.u32 %v6263_v12, 16 }
 0x10e   : > { %v6677_v24 = vadd.f32 %v1394_v63, %v1199_v30  ;;  %v1203_v47 = vadd.f32 %v1096_v50, %v652_v34  ;;  %v3255_v18 = vrot.slane %v3253_v59, 3  ;;  %v659_v63 = vadd.f32 %v6590_v33, %v6533_v41 }
 0x10f   : > { %v5297_v22 = vpop.f32.mrf.mxu0  ;;  %v5263_v25 = vpop.f32.mrf.mxu1  ;;  %v3261_v50 = vrot.slane %v3259_v23, 2  ;;  %v3264_v3 = vrot.slane %v3262_v31, 3  ;;  %v657_v59 = vadd.f32 %v6533_v41, %v6599_v62 }
 0x110   : > { %v6683_v61 = vadd.f32 %v5297_v22, %v1202_v2  ;;  %v1206_v30 = vadd.f32 %v5263_v25, %v655_v49  ;;  %v658_v2 = vadd.f32 %v6570_v43, %v6533_v41  ;;  %v656_v43 = vadd.f32 %v6533_v41, %v6580_v54 }
 0x111   : > { %v1397_v15 = vpop.f32.mrf.mxu0  ;;  %v1099_v19 = vpop.f32.mrf.mxu1  ;;  %v3256_v34 = vor.u32 %v3255_v18, %v3252_v40 }
 0x112   : > { %v6688_v58 = vadd.f32 %v1397_v15, %v1200_v32  ;;  %v1204_v38 = vadd.f32 %v1099_v19, %v653_v14  ;;  %v660_v19 = vadd.f32 %v6533_v41, %v6439_v28 }
 0x113   : > { %v5300_v60 = vpop.f32.mrf.mxu0  ;;  %5515 = vmatmul.mubr.msk.bf16.vlgmr.msra.gmra.mxu0 %vm404_vm1, %v6171_v13  ;;  %v5266_v37 = vpop.f32.mrf.mxu1  ;;  %5481 = vmatmul.mubr.msk.bf16.gmra.mxu1 %vm404_vm1, %v3230_v57  ;;  %v3247_v13 = vor.u32 %v3246_v20, %v3243_v11 }
 0x114   : > { %v6695_v17 = vadd.f32 %v5300_v60, %v1205_v45  ;;  %5518 = vmatprep.mubr.msk.bf16.mxu0 %vm404_vm1, %v6197_v53  ;;  %v1209_v32 = vadd.f32 %v5266_v37, %v658_v2  ;;  %5484 = vmatprep.mubr.msk.bf16.mxu1 %vm404_vm1, %v3239_v6  ;;  %v3268_v45 = vshrl.u32 %v6299_v0, 16  ;;  %v3271_v53 = vshll.u32 %v6299_v0, 16 }
 0x115   : > { %v1410_v52 = vpop.f32.mrf.mxu0  ;;  %v1112_v4 = vpop.f32.mrf.mxu1  ;;  %v3248_v22 = vsel %vm3186_vm7, %v3238_v10, %v3247_v13  ;;  %v3257_v0 = vsel %vm3186_vm7, %v3247_v13, %v3256_v34  ;;  %v3265_v10 = vor.u32 %v3264_v3, %v3261_v50  ;;  %v3286_v60 = vshrl.u32 %v6491_v42, 16  ;;  %v7267_v3 = vld [vmem:[#allocation8_spill] sm:$0xff] }
 0x116   : > { %v6705_v5 = vadd.f32 %v1410_v52, %v1203_v47  ;;  %v1207_v12 = vadd.f32 %v1112_v4, %v656_v43  ;;  %v3270_v33 = vrot.slane %v3268_v45, 2  ;;  %v3273_v14 = vrot.slane %v3271_v53, 3  ;;  %v7266_v52 = vld [vmem:[#allocation7_spill] sm:$0xff] }
 0x117   : > { %v5301_v1 = vpop.f32.mrf.mxu0  ;;  %v5267_v21 = vpop.f32.mrf.mxu1  ;;  %v663_v37 = vadd.f32 %v6443_v16, %v6533_v41  ;;  %v661_v13 = vadd.f32 %v6533_v41, %v7266_v52  ;;  %v3288_v16 = vrot.slane %v3286_v60, 2 }
 0x118   : > { %v6711_v54 = vadd.f32 %v5301_v1, %v1206_v30  ;;  %v1210_v49 = vadd.f32 %v5267_v21, %v659_v63  ;;  %v662_v30 = vadd.f32 %v6422_v36, %v6533_v41  ;;  %v3277_v36 = vshrl.u32 %v6303_v39, 16 }
 0x119   : > { %v1413_v47 = vpop.f32.mrf.mxu0  ;;  %v1115_v25 = vpop.f32.mrf.mxu1 }
 0x11a   : > { %v6716_v57 = vadd.f32 %v1413_v47, %v1204_v38  ;;  %v1208_v15 = vadd.f32 %v1115_v25, %v657_v59  ;;  %v3274_v38 = vor.u32 %v3273_v14, %v3270_v33  ;;  %v3279_v53 = vrot.slane %v3277_v36, 2  ;;  %v7270_v33 = vld [vmem:[#allocation15_spill] sm:$0xff] }
 0x11b   : > { %v5304_v11 = vpop.f32.mrf.mxu0  ;;  %5519 = vmatmul.mubr.msk.bf16.gmra.mxu0 %vm404_vm1, %v6202_v55  ;;  %v5270_v62 = vpop.f32.mrf.mxu1  ;;  %5485 = vmatmul.mubr.msk.bf16.gmra.mxu1 %vm404_vm1, %v3248_v22  ;;  %v3280_v55 = vshll.u32 %v6303_v39, 16  ;;  %v666_v59 = vadd.f32 %v7267_v3, %v6533_v41  ;;  %v3295_v14 = vshrl.u32 %v7270_v33, 16 }
 0x11c   : > { %v6723_v20 = vadd.f32 %v5304_v11, %v1209_v32  ;;  %5522 = vmatprep.mubr.msk.bf16.mxu0 %vm404_vm1, %v6237_v56  ;;  %v1213_v6 = vadd.f32 %v5270_v62, %v662_v30  ;;  %5488 = vmatprep.mubr.msk.bf16.mxu1 %vm404_vm1, %v3257_v0  ;;  %v3289_v56 = vshll.u32 %v6491_v42, 16  ;;  %v3266_v32 = vsel %vm3186_vm7, %v3256_v34, %v3265_v10  ;;  %v7268_v34 = vld [vmem:[#allocation2_spill] sm:$0xff]  ;;  %v7269_v0 = vld [vmem:[#allocation3_spill] sm:$0xff] }
 0x11d   : > { %v1426_v40 = vpop.f32.mrf.mxu0  ;;  %v1128_v18 = vpop.f32.mrf.mxu1  ;;  %v3282_v63 = vrot.slane %v3280_v55, 3  ;;  %v3275_v21 = vsel %vm3186_vm7, %v3265_v10, %v3274_v38  ;;  %v3298_v30 = vshll.u32 %v7270_v33, 16  ;;  %v7272_v55 = vld [vmem:[#allocation16_spill] sm:$0xff] }
 0x11e   : > { %v6733_v2 = vadd.f32 %v1426_v40, %v1207_v12  ;;  %v1211_v28 = vadd.f32 %v1128_v18, %v660_v19  ;;  %v3291_v50 = vrot.slane %v3289_v56, 3  ;;  %v3304_v18 = vshrl.u32 %v7272_v55, 16  ;;  %v7273_v56 = vld [vmem:[#allocation10_spill] sm:$0xff] }
 0x11f   : > { %v5305_v23 = vpop.f32.mrf.mxu0  ;;  %v5271_v31 = vpop.f32.mrf.mxu1  ;;  %v3283_v19 = vor.u32 %v3282_v63, %v3279_v53  ;;  %v3307_v60 = vshll.u32 %v7272_v55, 16 }
 0x120   : > { %v6739_v43 = vadd.f32 %v5305_v23, %v1210_v49  ;;  %v1214_v4 = vadd.f32 %v5271_v31, %v663_v37  ;;  %v3292_v36 = vor.u32 %v3291_v50, %v3288_v16  ;;  %v667_v37 = vadd.f32 %v7273_v56, %v6533_v41 }
 0x121   : > { %v1429_v45 = vpop.f32.mrf.mxu0  ;;  %v1131_v12 = vpop.f32.mrf.mxu1  ;;  %v3655_v56 = vrot.slane %v6491_v42, 3 }
 0x122   : > { %v6744_v1 = vadd.f32 %v1429_v45, %v1208_v15  ;;  %v1212_v49 = vadd.f32 %v1131_v12, %v661_v13  ;;  %v7271_v15 = vld [vmem:[#allocation9_spill] sm:$0xff]  ;;  %v3297_v13 = vrot.slane %v3295_v14, 2  ;;  %v3300_v45 = vrot.slane %v3298_v30, 3  ;;  %v7274_v12 = vld [vmem:[#allocation11_spill] sm:$0xff]  ;;  %v7276_v14 = vld [vmem:[#allocation4_spill] sm:$0xff] }
 0x123   : > { %v5308_v47 = vpop.f32.mrf.mxu0  ;;  %5523 = vmatmul.mubr.msk.bf16.gmra.mxu0 %vm404_vm1, %v7268_v34  ;;  %v5274_v22 = vpop.f32.mrf.mxu1  ;;  %5489 = vmatmul.mubr.msk.bf16.gmra.mxu1 %vm404_vm1, %v3266_v32  ;;  %v664_v11 = vadd.f32 %v6533_v41, %v7271_v15  ;;  %v665_v53 = vadd.f32 %v6533_v41, %v7274_v12  ;;  %v3293_v3 = vsel %vm3186_vm7, %v3283_v19, %v3292_v36  ;;  %v7275_v34 = vld [vmem:[#allocation12_spill] sm:$0xff]  ;;  %v7280_v12 = vld [vmem:[#allocation21_spill] sm:$0xff] }
 0x124   : > { %v6751_v25 = vadd.f32 %v5308_v47, %v1213_v6  ;;  %5526 = vmatprep.mubr.msk.bf16.mxu0 %vm404_vm1, %v7269_v0  ;;  %v1217_v62 = vadd.f32 %v5274_v22, %v666_v59  ;;  %5492 = vmatprep.mubr.msk.bf16.mxu1 %vm404_vm1, %v3275_v21  ;;  %v3284_v21 = vsel %vm3186_vm7, %v3274_v38, %v3283_v19  ;;  %v3306_v59 = vrot.slane %v3304_v18, 2  ;;  %v7277_v38 = vld [vmem:[#allocation5_spill] sm:$0xff] }
 0x125   : > { %v1442_v10 = vpop.f32.mrf.mxu0  ;;  %v1144_v40 = vpop.f32.mrf.mxu1  ;;  %v3309_v47 = vrot.slane %v3307_v60, 3  ;;  %v7279_v19 = vld [vmem:[#allocation13_spill] sm:$0xff] }
 0x126   : > { %v6761_v6 = vadd.f32 %v1442_v10, %v1211_v28  ;;  %v1215_v23 = vadd.f32 %v1144_v40, %v664_v11  ;;  %v7278_v11 = vld [vmem:[#allocation20_spill] sm:$0xff]  ;;  %v668_v40 = vadd.f32 %v6533_v41, %v7279_v19 }
 0x127   : > { %v5309_v31 = vpop.f32.mrf.mxu0  ;;  %v5275_v32 = vpop.f32.mrf.mxu1  ;;  %v3313_v10 = vshrl.u32 %v7278_v11, 16 }
 0x128   : > { %v6767_v52 = vadd.f32 %v5309_v31, %v1214_v4  ;;  %v1218_v28 = vadd.f32 %v5275_v32, %v667_v37  ;;  %v670_v4 = vadd.f32 %v7275_v34, %v6533_v41  ;;  %v3310_v32 = vor.u32 %v3309_v47, %v3306_v59 }
 0x129   : > { %v1445_v63 = vpop.f32.mrf.mxu0  ;;  %v1147_v16 = vpop.f32.mrf.mxu1  ;;  %v7283_v47 = vrot.slane %v6303_v39, 3  ;;  %v3657_v39 = vrot.slane %v7270_v33, 3  ;;  %v3343_v33 = vshll.u32 %v6602_v44, 16 }
 0x12a   : > { %v6772_v50 = vadd.f32 %v1445_v63, %v1212_v49  ;;  %v1216_v22 = vadd.f32 %v1147_v16, %v665_v53  ;;  %v3301_v49 = vor.u32 %v3300_v45, %v3297_v13  ;;  %v3322_v53 = vshrl.u32 %v7280_v12, 16  ;;  %v7281_v45 = vld [vmem:[#allocation14_spill] sm:$0xff] }
 0x12b   : > { %v5312_v0 = vpop.f32.mrf.mxu0  ;;  %5527 = vmatmul.mubr.msk.bf16.gmra.mxu0 %vm404_vm1, %v7276_v14  ;;  %v5278_v30 = vpop.f32.mrf.mxu1  ;;  %5493 = vmatmul.mubr.msk.bf16.gmra.mxu1 %vm404_vm1, %v3284_v21  ;;  %v3325_v13 = vshll.u32 %v7280_v12, 16  ;;  %v671_v63 = vadd.f32 %v7281_v45, %v6533_v41 }
 0x12c   : > { %v6779_v15 = vadd.f32 %v5312_v0, %v1217_v62  ;;  %5530 = vmatprep.mubr.msk.bf16.mxu0 %vm404_vm1, %v7277_v38  ;;  %v1221_v18 = vadd.f32 %v5278_v30, %v670_v4  ;;  %5496 = vmatprep.mubr.msk.bf16.mxu1 %vm404_vm1, %v3293_v3  ;;  %v3316_v62 = vshll.u32 %v7278_v11, 16  ;;  %v3302_v42 = vsel %vm3186_vm7, %v3292_v36, %v3301_v49  ;;  %v7282_v0 = vld [vmem:[#allocation17_spill] sm:$0xff] }
 0x12d   : > { %v1458_v60 = vpop.f32.mrf.mxu0  ;;  %v1160_v37 = vpop.f32.mrf.mxu1  ;;  %v3315_v3 = vrot.slane %v3313_v10, 2  ;;  %v3656_v30 = vsel %vm3633_vm6, %v7283_v47, %v3655_v56  ;;  %v7284_v10 = vld [vmem:[#allocation6_spill] sm:$0xff] }
 0x12e   : > { %v6790_v31 = vadd.f32 %v1458_v60, %v1215_v23  ;;  %v1219_v21 = vadd.f32 %v1160_v37, %v668_v40  ;;  %v669_v23 = vadd.f32 %v6533_v41, %v7282_v0  ;;  %v3318_v38 = vrot.slane %v3316_v62, 3  ;;  %v7285_v62 = vld [vmem:[#allocation18_spill] sm:$0xff] }
 0x12f   : > { %v5313_v16 = vpop.f32.mrf.mxu0  ;;  %v5279_v34 = vpop.f32.mrf.mxu1  ;;  %v3311_v40 = vsel %vm3186_vm7, %v3301_v49, %v3310_v32  ;;  %v3327_v37 = vrot.slane %v3325_v13, 3  ;;  %v3334_v49 = vshll.u32 %v6595_v26, 16 }
 0x130   : > { %v6796_v4 = vadd.f32 %v5313_v16, %v1218_v28  ;;  %v1222_v14 = vadd.f32 %v5279_v34, %v671_v63  ;;  %v3324_v28 = vrot.slane %v3322_v53, 2  ;;  %v3319_v16 = vor.u32 %v3318_v38, %v3315_v3 }
 0x131   : > { %v1461_v59 = vpop.f32.mrf.mxu0  ;;  %v1163_v19 = vpop.f32.mrf.mxu1  ;;  %v3659_v34 = vrot.slane %v7272_v55, 3  ;;  %v3336_v38 = vrot.slane %v3334_v49, 3  ;;  %v7287_v55 = vld [vmem:[#allocation22_spill] sm:$0xff] }
 0x132   : > { %v6804_v60 = vadd.f32 %v1461_v59, %v1216_v22  ;;  %v1220_v45 = vadd.f32 %v1163_v19, %v669_v23  ;;  %v3331_v22 = vshrl.u32 %v6595_v26, 16  ;;  %v3340_v23 = vshrl.u32 %v6602_v44, 16  ;;  %v7286_v59 = vld [vmem:[#allocation19_spill] sm:$0xff] }
 0x133   : > { %v5316_v36 = vpop.f32.mrf.mxu0  ;;  %5531 = vmatmul.mubr.msk.bf16.gmra.mxu0 %vm404_vm1, %v7284_v10  ;;  %v5282_v41 = vpop.f32.mrf.mxu1  ;;  %5497 = vmatmul.mubr.msk.bf16.gmra.mxu1 %vm404_vm1, %v3302_v42  ;;  %v3328_v42 = vor.u32 %v3327_v37, %v3324_v28  ;;  %v3660_v28 = vsel %vm3633_vm6, %v3657_v39, %v3659_v34  ;;  %v6831_v37 = vld [vmem:[%s5727_s8 + $0xa0] ss:$0 sps:$4 sm:$0x77]   ;;  %s5563_s8 = smul.u32 144, %s7304_s22 }
 0x134   : > { %v6809_v63 = vadd.f32 %v5316_v36, %v1221_v18  ;;  %5534 = vmatprep.mubr.msk.bf16.mxu0 %vm404_vm1, %v3656_v30  ;;  %v1225_v53 = vadd.f32 %v5282_v41, %v7285_v62  ;;  %5500 = vmatprep.mubr.msk.bf16.mxu1 %vm404_vm1, %v3311_v40  ;;  %v3658_v40 = vsel %vm3633_vm6, %v3655_v56, %v3657_v39  ;;  %v3333_v3 = vrot.slane %v3331_v22, 2 }
 0x135   : > { %v1474_v13 = vpop.f32.mrf.mxu0  ;;  %v1176_v18 = vpop.f32.mrf.mxu1  ;;  %s7121_s13 = scalar_lea.vmem %s7232_s4, %s5563_s8 }
 0x136   : > { %v6819_v0 = vadd.f32 %v1474_v13, %v1219_v21  ;;  %v1223_v47 = vadd.f32 %v1176_v18, %v7286_v59  ;;  %v3320_v21 = vsel %vm3186_vm7, %v3310_v32, %v3319_v16  ;;  %v3329_v18 = vsel %vm3186_vm7, %v3319_v16, %v3328_v42 }
 0x137   : > { %v5317_v30 = vpop.f32.mrf.mxu0  ;;  %v5283_v19 = vpop.f32.mrf.mxu1  ;;  %v3345_v59 = vrot.slane %v3343_v33, 3  ;;  %v3337_v32 = vor.u32 %v3336_v38, %v3333_v3  ;;  %v3349_v33 = vshrl.u32 %v6831_v37, 16 }
 0x138   : > { %v6824_v36 = vadd.f32 %v5317_v30, %v1222_v14  ;;  %v1226_v10 = vadd.f32 %v5283_v19, %v7287_v55  ;;  %v3342_v14 = vrot.slane %v3340_v23, 2  ;;  %v7288_v30 = vld [vmem:[#allocation23_spill] sm:$0xff]  ;;  %v3663_v23 = vrot.slane %v7280_v12, 3 }
 0x139   : > { %v1477_v41 = vpop.f32.mrf.mxu0  ;;  %v1179_v62 = vpop.f32.mrf.mxu1 }
 0x13a   : > { %v6833_v13 = vadd.f32 %v1477_v41, %v1220_v45  ;;  %v1224_v56 = vadd.f32 %v1179_v62, %v7288_v30  ;;  %v3661_v45 = vrot.slane %v7278_v11, 3  ;;  %v3346_v41 = vor.u32 %v3345_v59, %v3342_v14 }
 0x13b   : > { %v5320_v22 = vpop.f32.mrf.mxu0  ;;  %5535 = vmatmul.mubr.msk.bf16.gmra.mxu0 %vm404_vm1, %v3658_v40  ;;  %v5326_v19 = vpop.f32.mrf.mxu1  ;;  %5501 = vmatmul.mubr.msk.bf16.gmra.mxu1 %vm404_vm1, %v3320_v21  ;;  %v3351_v30 = vrot.slane %v3349_v33, 2 }
 0x13c   : > { %v6838_v49 = vadd.f32 %v5320_v22, %v1225_v53  ;;  %5538 = vmatprep.mubr.msk.bf16.mxu0 %vm404_vm1, %v3660_v28  ;;  %v1946_v39 = vadd.f32 %v5326_v19, %v6607_v35  ;;  %5504 = vmatprep.mubr.msk.bf16.mxu1 %vm404_vm1, %v3329_v18  ;;  %v3352_v53 = vshll.u32 %v6831_v37, 16  ;;  %v3338_v35 = vsel %vm3186_vm7, %v3328_v42, %v3337_v32 }
 0x13d   : > { %v1490_v16 = vpop.f32.mrf.mxu0  ;;  %v1801_v55 = vpop.f32.mrf.mxu1  ;;  %v3662_v28 = vsel %vm3633_vm6, %v3659_v34, %v3661_v45  ;;  %v3664_v18 = vsel %vm3633_vm6, %v3661_v45, %v3663_v23 }
 0x13e   : > { %v6848_v40 = vadd.f32 %v1490_v16, %v1223_v47  ;;  %v1944_v21 = vadd.f32 %v1801_v55, %v6620_v9  ;;  %v3354_v47 = vrot.slane %v3352_v53, 3  ;;  %v3347_v9 = vsel %vm3186_vm7, %v3337_v32, %v3346_v41 }
 0x13f   : > { %v5321_v3 = vpop.f32.mrf.mxu0  ;;  %v5327_v11 = vpop.f32.mrf.mxu1 }
 0x140   : > { %v6851_v38 = vadd.f32 %v5321_v3, %v1226_v10  ;;  %v1947_v12 = vadd.f32 %v5327_v11, %v6626_v29  ;;  %v3665_v29 = vrot.slane %v6595_v26, 3  ;;  %v3355_v32 = vor.u32 %v3354_v47, %v3351_v30 }
 0x141   : > { %v1493_v62 = vpop.f32.mrf.mxu0  ;;  %v1804_v14 = vpop.f32.mrf.mxu1 }
 0x142   : > { %v6857_v22 = vadd.f32 %v1493_v62, %v1224_v56  ;;  %v1945_v10 = vadd.f32 %v1804_v14, %v6633_v8  ;;  %v3667_v8 = vrot.slane %v6602_v44, 3  ;;  %v3666_v3 = vsel %vm3633_vm6, %v3663_v23, %v3665_v29 }
 0x143   : > { %v5364_v59 = vpop.f32.mrf.mxu0  ;;  %5539 = vmatmul.mubr.msk.bf16.gmra.mxu0 %vm404_vm1, %v3662_v28  ;;  %v5330_v42 = vpop.f32.mrf.mxu1  ;;  %5505 = vmatmul.mubr.msk.bf16.gmra.mxu1 %vm404_vm1, %v3338_v35  ;;  %v3356_v11 = vsel %vm3186_vm7, %v3346_v41, %v3355_v32 }
 0x144   : > { %v6862_v19 = vadd.f32 %v5364_v59, %v1946_v39  ;;  %5542 = vmatprep.mubr.msk.bf16.mxu0 %vm404_vm1, %v3664_v18  ;;  %v1950_v34 = vadd.f32 %v5330_v42, %v6639_v48  ;;  %5508 = vmatprep.mubr.msk.bf16.mxu1 %vm404_vm1, %v3347_v9  ;;  %v3668_v35 = vsel %vm3633_vm6, %v3665_v29, %v3667_v8 }
 0x145   : > { %v2248_v56 = vpop.f32.mrf.mxu0  ;;  %v1817_v45 = vpop.f32.mrf.mxu1 }
 0x146   : > { %v6870_v16 = vadd.f32 %v2248_v56, %v1944_v21  ;;  %v1948_v39 = vadd.f32 %v1817_v45, %v6649_v27 }
 0x147   : > { %v5365_v33 = vpop.f32.mrf.mxu0  ;;  %v5331_v53 = vpop.f32.mrf.mxu1 }
 0x148   : > { %v6873_v55 = vadd.f32 %v5365_v33, %v1947_v12  ;;  %v1951_v26 = vadd.f32 %v5331_v53, %v6655_v51  ;;  %v3669_v51 = vrot.slane %v6831_v37, 3 }
 0x149   : > { %v2251_v48 = vpop.f32.mrf.mxu0  ;;  %v1820_v28 = vpop.f32.mrf.mxu1 }
 0x14a   : > { %v6879_v44 = vadd.f32 %v2251_v48, %v1945_v10  ;;  %v1949_v21 = vadd.f32 %v1820_v28, %v6661_v46  ;;  %v3670_v10 = vsel %vm3633_vm6, %v3667_v8, %v3669_v51 }
 0x14b   : > { %v5368_v62 = vpop.f32.mrf.mxu0  ;;  %5543 = vmatmul.mubr.msk.bf16.gmra.mxu0 %vm404_vm1, %v3666_v3  ;;  %v5334_v27 = vpop.f32.mrf.mxu1  ;;  %5509 = vmatmul.mubr.msk.bf16.gmra.mxu1 %vm404_vm1, %v3356_v11 }
 0x14c   : > { %v6883_v12 = vadd.f32 %v5368_v62, %v1950_v34  ;;  %5546 = vmatprep.mubr.msk.bf16.mxu0 %vm404_vm1, %v3668_v35  ;;  %v1954_v23 = vadd.f32 %v5334_v27, %v6667_v7 }
 0x14d   : > { %v2264_v41 = vpop.f32.mrf.mxu0  ;;  %v1833_v18 = vpop.f32.mrf.mxu1 }
 0x14e   : > { %v6889_v30 = vadd.f32 %v2264_v41, %v1948_v39  ;;  %v1952_v46 = vadd.f32 %v1833_v18, %v6677_v24 }
 0x14f   : > { %v5369_v47 = vpop.f32.mrf.mxu0  ;;  %v5335_v14 = vpop.f32.mrf.mxu1 }
 0x150   : > { %v6892_v9 = vadd.f32 %v5369_v47, %v1951_v26  ;;  %v1955_v59 = vadd.f32 %v5335_v14, %v6683_v61 }
 0x151   : > { %v2267_v42 = vpop.f32.mrf.mxu0  ;;  %v1836_v29 = vpop.f32.mrf.mxu1 }
 0x152   : > { %v6896_v34 = vadd.f32 %v2267_v42, %v1949_v21  ;;  %v1953_v7 = vadd.f32 %v1836_v29, %v6688_v58 }
 0x153   : > { %v5372_v37 = vpop.f32.mrf.mxu0  ;;  %5547 = vmatmul.mubr.msk.bf16.gmra.mxu0 %vm404_vm1, %v3670_v10  ;;  %v5338_v56 = vpop.f32.mrf.mxu1 }
 0x154   : > { %v6900_v32 = vadd.f32 %v5372_v37, %v1954_v23  ;;  %v1958_v24 = vadd.f32 %v5338_v56, %v6695_v17 }
 0x155   : > { %v2280_v45 = vpop.f32.mrf.mxu0  ;;  %v1849_v39 = vpop.f32.mrf.mxu1 }
 0x156   : > { %v6903_v33 = vadd.f32 %v2280_v45, %v1952_v46  ;;  %v1956_v61 = vadd.f32 %v1849_v39, %v6705_v5 }
 0x157   : > { %v5373_v8 = vpop.f32.mrf.mxu0  ;;  %v5339_v53 = vpop.f32.mrf.mxu1 }
 0x158   : > { %v6906_v3 = vadd.f32 %v5373_v8, %v1955_v59  ;;  %v1959_v58 = vadd.f32 %v5339_v53, %v6711_v54 }
 0x159   : > { %v2283_v26 = vpop.f32.mrf.mxu0  ;;  %v1852_v48 = vpop.f32.mrf.mxu1 }
 0x15a   : > { %v6909_v11 = vadd.f32 %v2283_v26, %v1953_v7  ;;  %v1957_v35 = vadd.f32 %v1852_v48, %v6716_v57 }
 0x15b   : > { %v5376_v28 = vpop.f32.mrf.mxu0  ;;  %v5342_v17 = vpop.f32.mrf.mxu1 }
 0x15c   : > { %v6912_v21 = vadd.f32 %v5376_v28, %v1958_v24  ;;  %v1962_v62 = vadd.f32 %v5342_v17, %v6723_v20 }
 0x15d   : > { %v2296_v27 = vpop.f32.mrf.mxu0  ;;  %v1865_v5 = vpop.f32.mrf.mxu1 }
 0x15e   : > { %v6915_v51 = vadd.f32 %v2296_v27, %v1956_v61  ;;  %v1960_v23 = vadd.f32 %v1865_v5, %v6733_v2 }
 0x15f   : > { %v5377_v41 = vpop.f32.mrf.mxu0  ;;  %v5343_v54 = vpop.f32.mrf.mxu1 }
 0x160   : > { %v6918_v18 = vadd.f32 %v5377_v41, %v1959_v58  ;;  %v1963_v46 = vadd.f32 %v5343_v54, %v6739_v43 }
 0x161   : > { %v2299_v47 = vpop.f32.mrf.mxu0  ;;  %v1868_v57 = vpop.f32.mrf.mxu1 }
 0x162   : > { %v6921_v14 = vadd.f32 %v2299_v47, %v1957_v35  ;;  %v1961_v10 = vadd.f32 %v1868_v57, %v6744_v1 }
 0x163   : > { %v5380_v59 = vpop.f32.mrf.mxu0  ;;  %v5346_v20 = vpop.f32.mrf.mxu1 }
 0x164   : > { %v6924_v42 = vadd.f32 %v5380_v59, %v1962_v62  ;;  %v1966_v29 = vadd.f32 %v5346_v20, %v6751_v25 }
 0x165   : > { %v2312_v7 = vpop.f32.mrf.mxu0  ;;  %v1881_v2 = vpop.f32.mrf.mxu1 }
 0x166   : > { %v6927_v37 = vadd.f32 %v2312_v7, %v1960_v23  ;;  %v1964_v56 = vadd.f32 %v1881_v2, %v6761_v6 }
 0x167   : > { %v5381_v24 = vpop.f32.mrf.mxu0  ;;  %v5347_v43 = vpop.f32.mrf.mxu1 }
 0x168   : > { %v6930_v45 = vadd.f32 %v5381_v24, %v1963_v46  ;;  %v1967_v39 = vadd.f32 %v5347_v43, %v6767_v52 }
 0x169   : > { %v2315_v61 = vpop.f32.mrf.mxu0  ;;  %v1884_v1 = vpop.f32.mrf.mxu1 }
 0x16a   : > { %v6933_v8 = vadd.f32 %v2315_v61, %v1961_v10  ;;  %v1965_v53 = vadd.f32 %v1884_v1, %v6772_v50 }
 0x16b   : > { %v5384_v58 = vpop.f32.mrf.mxu0  ;;  %v5350_v25 = vpop.f32.mrf.mxu1 }
 0x16c   : > { %v6936_v26 = vadd.f32 %v5384_v58, %v1966_v29  ;;  %v1970_v48 = vadd.f32 %v5350_v25, %v6779_v15 }
 0x16d   : > { %v2328_v35 = vpop.f32.mrf.mxu0  ;;  %v1897_v6 = vpop.f32.mrf.mxu1 }
 0x16e   : > { %v6939_v28 = vadd.f32 %v2328_v35, %v1964_v56  ;;  %v1968_v17 = vadd.f32 %v1897_v6, %v6790_v31 }
 0x16f   : > { %v5385_v62 = vpop.f32.mrf.mxu0  ;;  %v5351_v52 = vpop.f32.mrf.mxu1 }
 0x170   : > { %v6942_v27 = vadd.f32 %v5385_v62, %v1967_v39  ;;  %v1971_v5 = vadd.f32 %v5351_v52, %v6796_v4 }
 0x171   : > { %v2331_v23 = vpop.f32.mrf.mxu0  ;;  %v1900_v50 = vpop.f32.mrf.mxu1 }
 0x172   : > { %v6945_v41 = vadd.f32 %v2331_v23, %v1965_v53  ;;  %v1969_v54 = vadd.f32 %v1900_v50, %v6804_v60 }
 0x173   : > { %v5388_v46 = vpop.f32.mrf.mxu0  ;;  %v5354_v15 = vpop.f32.mrf.mxu1 }
 0x174   : > { %v6948_v47 = vadd.f32 %v5388_v46, %v1970_v48  ;;  %v1974_v57 = vadd.f32 %v5354_v15, %v6809_v63 }
 0x175   : > { %v2344_v10 = vpop.f32.mrf.mxu0  ;;  %v1913_v31 = vpop.f32.mrf.mxu1 }
 0x176   : > { %v6951_v59 = vadd.f32 %v2344_v10, %v1968_v17  ;;  %v1972_v20 = vadd.f32 %v1913_v31, %v6819_v0 }
 0x177   : > { %v5389_v29 = vpop.f32.mrf.mxu0  ;;  %v5355_v4 = vpop.f32.mrf.mxu1 }
 0x178   : > { %v6954_v7 = vadd.f32 %v5389_v29, %v1971_v5  ;;  %v1975_v2 = vadd.f32 %v5355_v4, %v6824_v36 }
 0x179   : > { %v2347_v56 = vpop.f32.mrf.mxu0  ;;  %v1916_v60 = vpop.f32.mrf.mxu1 }
 0x17a   : > { %v6957_v24 = vadd.f32 %v2347_v56, %v1969_v54  ;;  %v1973_v43 = vadd.f32 %v1916_v60, %v6833_v13 }
 0x17b   : > { %v5392_v39 = vpop.f32.mrf.mxu0  ;;  %v5358_v63 = vpop.f32.mrf.mxu1 }
 0x17c   : > { %v6960_v61 = vadd.f32 %v5392_v39, %v1974_v57  ;;  %v1978_v1 = vadd.f32 %v5358_v63, %v6838_v49 }
 0x17d   : > { %v2360_v53 = vpop.f32.mrf.mxu0  ;;  %v1929_v0 = vpop.f32.mrf.mxu1 }
 0x17e   : > { %v6963_v58 = vadd.f32 %v2360_v53, %v1972_v20  ;;  %v1976_v25 = vadd.f32 %v1929_v0, %v6848_v40 }
 0x17f   : > { %v5393_v48 = vpop.f32.mrf.mxu0  ;;  %v5359_v36 = vpop.f32.mrf.mxu1 }
 0x180   : > { %v6966_v35 = vadd.f32 %v5393_v48, %v1975_v2  ;;  %v1979_v6 = vadd.f32 %v5359_v36, %v6851_v38 }
 0x181   : > { %v2363_v17 = vpop.f32.mrf.mxu0  ;;  %v1932_v13 = vpop.f32.mrf.mxu1 }
 0x182   : > { %v6969_v62 = vadd.f32 %v2363_v17, %v1973_v43  ;;  %v1977_v52 = vadd.f32 %v1932_v13, %v6857_v22 }
 0x183   : > { %v5396_v5 = vpop.f32.mrf.mxu0  ;;  %v5402_v23 = vpop.f32.mrf.mxu1 }
 0x184   : > { %v6972_v49 = vadd.f32 %v5396_v5, %v1978_v1  ;;  %v2707_v50 = vadd.f32 %v5402_v23, %v6862_v19 }
 0x185   : > { %v2376_v54 = vpop.f32.mrf.mxu0  ;;  %v2562_v46 = vpop.f32.mrf.mxu1 }
 0x186   : > { %v6975_v40 = vadd.f32 %v2376_v54, %v1976_v25  ;;  %v2705_v15 = vadd.f32 %v2562_v46, %v6870_v16 }
 0x187   : > { %v5397_v57 = vpop.f32.mrf.mxu0  ;;  %v5403_v10 = vpop.f32.mrf.mxu1 }
 0x188   : > { %v6978_v38 = vadd.f32 %v5397_v57, %v1979_v6  ;;  %v2708_v31 = vadd.f32 %v5403_v10, %v6873_v55 }
 0x189   : > { %v2379_v20 = vpop.f32.mrf.mxu0  ;;  %v2565_v29 = vpop.f32.mrf.mxu1 }
 0x18a   : > { %v6981_v22 = vadd.f32 %v2379_v20, %v1977_v52  ;;  %v2706_v4 = vadd.f32 %v2565_v29, %v6879_v44 }
 0x18b   : > { %v5440_v2 = vpop.f32.mrf.mxu0  ;;  %v5406_v19 = vpop.f32.mrf.mxu1 }
 0x18c   : > { %v6984_v56 = vadd.f32 %v5440_v2, %v2707_v50  ;;  %v2711_v60 = vadd.f32 %v5406_v19, %v6883_v12 }
 0x18d   : > { %v3001_v43 = vpop.f32.mrf.mxu0  ;;  %v2578_v16 = vpop.f32.mrf.mxu1 }
 0x18e   : > { %v6987_v39 = vadd.f32 %v3001_v43, %v2705_v15  ;;  %v2709_v63 = vadd.f32 %v2578_v16, %v6889_v30 }
 0x18f   : > { %v5441_v1 = vpop.f32.mrf.mxu0  ;;  %v5407_v55 = vpop.f32.mrf.mxu1 }
 0x190   : > { %v6990_v53 = vadd.f32 %v5441_v1, %v2708_v31  ;;  %v2712_v0 = vadd.f32 %v5407_v55, %v6892_v9 }
 0x191   : > { %v3004_v25 = vpop.f32.mrf.mxu0  ;;  %v2581_v44 = vpop.f32.mrf.mxu1 }
 0x192   : > { %v6993_v48 = vadd.f32 %v3004_v25, %v2706_v4  ;;  %v2710_v36 = vadd.f32 %v2581_v44, %v6896_v34 }
 0x193   : > { %v5444_v6 = vpop.f32.mrf.mxu0  ;;  %v5410_v12 = vpop.f32.mrf.mxu1 }
 0x194   : > { %v6996_v17 = vadd.f32 %v5444_v6, %v2711_v60  ;;  %v2715_v13 = vadd.f32 %v5410_v12, %v6900_v32 }
 0x195   : > { %v3017_v52 = vpop.f32.mrf.mxu0  ;;  %v2594_v30 = vpop.f32.mrf.mxu1 }
 0x196   : > { %v6999_v5 = vadd.f32 %v3017_v52, %v2709_v63  ;;  %v2713_v23 = vadd.f32 %v2594_v30, %v6903_v33 }
 0x197   : > { %v5445_v50 = vpop.f32.mrf.mxu0  ;;  %v5411_v9 = vpop.f32.mrf.mxu1 }
 0x198   : > { %v7002_v54 = vadd.f32 %v5445_v50, %v2712_v0  ;;  %v2716_v46 = vadd.f32 %v5411_v9, %v6906_v3 }
 0x199   : > { %v3020_v15 = vpop.f32.mrf.mxu0  ;;  %v2597_v34 = vpop.f32.mrf.mxu1 }
 0x19a   : > { %v7005_v57 = vadd.f32 %v3020_v15, %v2710_v36  ;;  %v2714_v10 = vadd.f32 %v2597_v34, %v6909_v11 }
 0x19b   : > { %v5448_v31 = vpop.f32.mrf.mxu0  ;;  %v5414_v32 = vpop.f32.mrf.mxu1 }
 0x19c   : > { %v7008_v20 = vadd.f32 %v5448_v31, %v2715_v13  ;;  %v2719_v29 = vadd.f32 %v5414_v32, %v6912_v21 }
 0x19d   : > { %v3033_v4 = vpop.f32.mrf.mxu0  ;;  %v2610_v33 = vpop.f32.mrf.mxu1 }
 0x19e   : > { %v7011_v2 = vadd.f32 %v3033_v4, %v2713_v23  ;;  %v2717_v19 = vadd.f32 %v2610_v33, %v6915_v51 }
 0x19f   : > { %v5449_v60 = vpop.f32.mrf.mxu0  ;;  %v5415_v3 = vpop.f32.mrf.mxu1 }
 0x1a0   : > { %v7014_v43 = vadd.f32 %v5449_v60, %v2716_v46  ;;  %v2720_v16 = vadd.f32 %v5415_v3, %v6918_v18 }
 0x1a1   : > { %v3036_v63 = vpop.f32.mrf.mxu0  ;;  %v2613_v11 = vpop.f32.mrf.mxu1 }
 0x1a2   : > { %v7017_v1 = vadd.f32 %v3036_v63, %v2714_v10  ;;  %v2718_v55 = vadd.f32 %v2613_v11, %v6921_v14 }
 0x1a3   : > { %v5452_v0 = vpop.f32.mrf.mxu0  ;;  %v5418_v21 = vpop.f32.mrf.mxu1 }
 0x1a4   : > { %v7020_v25 = vadd.f32 %v5452_v0, %v2719_v29  ;;  %v2723_v44 = vadd.f32 %v5418_v21, %v6924_v42 }
 0x1a5   : > { %v3049_v36 = vpop.f32.mrf.mxu0  ;;  %v2626_v51 = vpop.f32.mrf.mxu1 }
 0x1a6   : > { %v7023_v6 = vadd.f32 %v3049_v36, %v2717_v19  ;;  %v2721_v12 = vadd.f32 %v2626_v51, %v6927_v37  ;;  %v7052_v36 = vpop.permute.xlu1 %4169 }
 0x1a7   : > { %v5453_v13 = vpop.f32.mrf.mxu0  ;;  %v5419_v18 = vpop.f32.mrf.mxu1 }
 0x1a8   : > { %v7026_v52 = vadd.f32 %v5453_v13, %v2720_v16  ;;  %v2724_v30 = vadd.f32 %v5419_v18, %v6930_v45 }
 0x1a9   : > { %v3052_v23 = vpop.f32.mrf.mxu0  ;;  %v2629_v14 = vpop.f32.mrf.mxu1 }
 0x1aa   : > { %v7029_v50 = vadd.f32 %v3052_v23, %v2718_v55  ;;  %v2722_v9 = vadd.f32 %v2629_v14, %v6933_v8 }
 0x1ab   : > { %v5456_v46 = vpop.f32.mrf.mxu0  ;;  %v5422_v42 = vpop.f32.mrf.mxu1 }
 0x1ac   : > { %v7032_v15 = vadd.f32 %v5456_v46, %v2723_v44  ;;  %v2727_v34 = vadd.f32 %v5422_v42, %v6936_v26 }
 0x1ad   : > { %v3065_v10 = vpop.f32.mrf.mxu0  ;;  %v2642_v37 = vpop.f32.mrf.mxu1 }
 0x1ae   : > { %v7035_v31 = vadd.f32 %v3065_v10, %v2721_v12  ;;  %v2725_v32 = vadd.f32 %v2642_v37, %v6939_v28  ;;  %v7047_v28 = vpop.permute.xlu0 %4159 }
 0x1af   : > { %v5457_v29 = vpop.f32.mrf.mxu0  ;;  %v5423_v45 = vpop.f32.mrf.mxu1 }
 0x1b0   : > { %v7038_v4 = vadd.f32 %v5457_v29, %v2724_v30  ;;  %v2728_v33 = vadd.f32 %v5423_v45, %v6942_v27 }
 0x1b1   : > { %v3068_v19 = vpop.f32.mrf.mxu0  ;;  %v2645_v8 = vpop.f32.mrf.mxu1 }
 0x1b2   : > { %v7041_v60 = vadd.f32 %v3068_v19, %v2722_v9  ;;  %v2726_v3 = vadd.f32 %v2645_v8, %v6945_v41  ;;  %v7060_v14 = vpop.permute.xlu0 %4164 }
 0x1b3   : > { %v5460_v16 = vpop.f32.mrf.mxu0  ;;  %v5426_v26 = vpop.f32.mrf.mxu1 }
 0x1b4   : > { %v7044_v63 = vadd.f32 %v5460_v16, %v2727_v34  ;;  %v2731_v11 = vadd.f32 %v5426_v26, %v6948_v47  ;;  %v7065_v34 = vpop.permute.xlu1 %4174 }
 0x1b5   : > { %v3081_v55 = vpop.f32.mrf.mxu0  ;;  %v2658_v0 = vpop.f32.mrf.mxu1 }
 0x1b6   : > { %v7049_v21 = vadd.f32 %v3081_v55, %v2725_v32  ;;  %v2729_v27 = vadd.f32 %v2658_v0, %v6951_v59  ;;  %v7073_v19 = vpop.permute.xlu0 %4179 }
 0x1b7   : > { %v5461_v44 = vpop.f32.mrf.mxu0  ;;  %v5427_v51 = vpop.f32.mrf.mxu1 }
 0x1b8   : > { %v7054_v12 = vadd.f32 %v5461_v44, %v2728_v33  ;;  %v2732_v41 = vadd.f32 %v5427_v51, %v6954_v7  ;;  %v7078_v26 = vpop.permute.xlu1 %4184 }
 0x1b9   : > { %v3084_v13 = vpop.f32.mrf.mxu0  ;;  %v2661_v18 = vpop.f32.mrf.mxu1 }
 0x1ba   : > { %v7057_v30 = vadd.f32 %v3084_v13, %v2726_v3  ;;  %v2730_v47 = vadd.f32 %v2661_v18, %v6957_v24 }
 0x1bb   : > { %v5464_v23 = vpop.f32.mrf.mxu0  ;;  %v5430_v9 = vpop.f32.mrf.mxu1 }
 0x1bc   : > { %v7062_v46 = vadd.f32 %v5464_v23, %v2731_v11  ;;  %v2735_v59 = vadd.f32 %v5430_v9, %v6960_v61  ;;  %v7091_v23 = vpop.permute.xlu1 %4194 }
 0x1bd   : > { %v3097_v42 = vpop.f32.mrf.mxu0  ;;  %v2674_v10 = vpop.f32.mrf.mxu1 }
 0x1be   : > { %v7067_v37 = vadd.f32 %v3097_v42, %v2729_v27  ;;  %v2733_v7 = vadd.f32 %v2674_v10, %v6963_v58 }
 0x1bf   : > { %v5465_v32 = vpop.f32.mrf.mxu0  ;;  %v5431_v29 = vpop.f32.mrf.mxu1 }
 0x1c0   : > { %v7070_v45 = vadd.f32 %v5465_v32, %v2732_v41  ;;  %v2736_v24 = vadd.f32 %v5431_v29, %v6966_v35  ;;  %v7086_v41 = vpop.permute.xlu0 %4189 }
 0x1c1   : > { %v3100_v33 = vpop.f32.mrf.mxu0  ;;  %v2677_v8 = vpop.f32.mrf.mxu1 }
 0x1c2   : > { %v7075_v3 = vadd.f32 %v3100_v33, %v2730_v47  ;;  %v2734_v61 = vadd.f32 %v2677_v8, %v6969_v62  ;;  %v7102_v33 = vpop.permute.xlu1 %4204 }
 0x1c3   : > { %v5468_v16 = vpop.f32.mrf.mxu0  ;;  %v5434_v11 = vpop.f32.mrf.mxu1 }
 0x1c4   : > { %v7080_v55 = vadd.f32 %v5468_v16, %v2735_v59  ;;  %v2739_v58 = vadd.f32 %v5434_v11, %v6972_v49  ;;  %v7098_v32 = vpop.permute.xlu0 %4199 }
 0x1c5   : > { %v3113_v0 = vpop.f32.mrf.mxu0  ;;  %v2690_v27 = vpop.f32.mrf.mxu1 }
 0x1c6   : > { %7289 = vst [vmem:[#allocation7_spill] sm:$0xff] %v7080_v55  ;;  %v7083_v44 = vadd.f32 %v3113_v0, %v2733_v7  ;;  %v2737_v35 = vadd.f32 %v2690_v27, %v6975_v40 }
 0x1c7   : > { %v5469_v51 = vpop.f32.mrf.mxu0  ;;  %v5435_v13 = vpop.f32.mrf.mxu1 }
 0x1c8   : > { %v7088_v18 = vadd.f32 %v5469_v51, %v2736_v24  ;;  %v2740_v62 = vadd.f32 %v5435_v13, %v6978_v38  ;;  %v7108_v0 = vpop.permute.xlu0 %4209 }
 0x1c9   : > { %v3116_v47 = vpop.f32.mrf.mxu0  ;;  %v2693_v9 = vpop.f32.mrf.mxu1 }
 0x1ca   : > { %7290 = vst [vmem:[#allocation8_spill] sm:$0xff] %v7088_v18  ;;  %v7093_v59 = vadd.f32 %v3116_v47, %v2734_v61  ;;  %v2738_v49 = vadd.f32 %v2693_v9, %v6981_v22  ;;  %v7113_v47 = vpop.permute.xlu1 %4214 }
 0x1cb   : > { %v5472_v42 = vpop.f32.mrf.mxu0  ;;  %v5478_v40 = vpop.f32.mrf.mxu1 }
 0x1cc   : > { %7291 = vst [vmem:[#allocation2_spill] sm:$0xff] %v7093_v59  ;;  %v7096_v10 = vadd.f32 %v5472_v42, %v2739_v58 }
 0x1cd   : > { %v3129_v7 = vpop.f32.mrf.mxu0  ;;  %v3448_v24 = vpop.f32.mrf.mxu1 }
 0x1ce   : > { %7292 = vst [vmem:[#allocation3_spill] sm:$0xff] %v7096_v10  ;;  %v7100_v29 = vadd.f32 %v3129_v7, %v2737_v35  ;;  %v3591_v27 = vadd.f32 %v3448_v24, %v6987_v39  ;;  %v3593_v35 = vadd.f32 %v5478_v40, %v6984_v56  ;;  %v7123_v39 = vpop.permute.xlu0 %4219 }
 0x1cf   : > { %v5473_v38 = vpop.f32.mrf.mxu0  ;;  %v5479_v61 = vpop.f32.mrf.mxu1 }
 0x1d0   : > { %7293 = vst [vmem:[#allocation15_spill] sm:$0xff] %v7100_v29  ;;  %v7104_v8 = vadd.f32 %v5473_v38, %v2740_v62  ;;  %v3594_v62 = vadd.f32 %v5479_v61, %v6990_v53 }
 0x1d1   : > { %v3132_v16 = vpop.f32.mrf.mxu0  ;;  %v3451_v22 = vpop.f32.mrf.mxu1 }
 0x1d2   : > { %7294 = vst [vmem:[#allocation9_spill] sm:$0xff] %v7104_v8  ;;  %v7106_v11 = vadd.f32 %v3132_v16, %v2738_v49  ;;  %v3592_v38 = vadd.f32 %v3451_v22, %v6993_v48  ;;  %v7126_v22 = vpop.permute.xlu1 %4224 }
 0x1d3   : > { %v5516_v58 = vpop.f32.mrf.mxu0  ;;  %v5482_v51 = vpop.f32.mrf.mxu1 }
 0x1d4   : > { %7295 = vst [vmem:[#allocation16_spill] sm:$0xff] %v7106_v11  ;;  %v3907_v7 = vadd.f32 %v5516_v58, %v3593_v35 }
 0x1d5   : > { %v3762_v13 = vpop.f32.mrf.mxu0  ;;  %v3464_v9 = vpop.f32.mrf.mxu1 }
 0x1d6   : > { %v3905_v42 = vadd.f32 %v3762_v13, %v3591_v27  ;;  %v4339_v61 = vmul.f32 %v7052_v36, %v3907_v7  ;;  %v3597_v13 = vadd.f32 %v5482_v51, %v6996_v17 }
 0x1d7   : > { %v5517_v49 = vpop.f32.mrf.mxu0  ;;  %v5483_v16 = vpop.f32.mrf.mxu1 }
 0x1d8   : > { %v3908_v11 = vadd.f32 %v5517_v49, %v3594_v62  ;;  %v4337_v8 = vmul.f32 %v7047_v28, %v3905_v42  ;;  %v3595_v28 = vadd.f32 %v3464_v9, %v6999_v5  ;;  %v4417_v59 = vmul.f32 %v4339_v61, %v3907_v7 }
 0x1d9   : > { %v3765_v56 = vpop.f32.mrf.mxu0  ;;  %v3467_v40 = vpop.f32.mrf.mxu1  ;;  %v3598_v18 = vadd.f32 %v5483_v16, %v7002_v54 }
 0x1da   : > { %v4938_v53 = vpack.c.bf16 %v3908_v11, %v3907_v7  ;;  %v3906_v24 = vadd.f32 %v3765_v56, %v3592_v38  ;;  %v4415_v62 = vmul.f32 %v4337_v8, %v3905_v42  ;;  %v4340_v10 = vmul.f32 %v7065_v34, %v3908_v11 }
 0x1db   : > { %v5520_v48 = vpop.f32.mrf.mxu0  ;;  %v5486_v35 = vpop.f32.mrf.mxu1 }
 0x1dc   : > { %5020 = vst [vmem:[%s7121_s13 + $0x8] sm:$0xff] %v4938_v53   ;;  %v4933_v58 = vpack.c.bf16 %v3906_v24, %v3905_v42  ;;  %v4338_v27 = vmul.f32 %v7060_v14, %v3906_v24  ;;  %v3911_v5 = vadd.f32 %v5520_v48, %v3597_v13  ;;  %v7135_v53 = vpop.permute.xlu0 %4229  ;;  %v3596_v14 = vadd.f32 %v3467_v40, %v7005_v57 }
 0x1dd   : > { %v3778_v49 = vpop.f32.mrf.mxu0  ;;  %v3480_v36 = vpop.f32.mrf.mxu1 }
 0x1de   : > { %4934 = vst [vmem:[%s7121_s13] sm:$0xff] %v4933_v58   ;;  %v4373_v38 = vadd.f32 %v4338_v27, %v4337_v8  ;;  %v4416_v56 = vmul.f32 %v4338_v27, %v3906_v24  ;;  %v3909_v29 = vadd.f32 %v3778_v49, %v3595_v28  ;;  %v7139_v8 = vpop.permute.xlu1 %4234  ;;  %v4418_v24 = vmul.f32 %v4340_v10, %v3908_v11 }
 0x1df   : > { %v5521_v9 = vpop.f32.mrf.mxu0  ;;  %v5487_v42 = vpop.f32.mrf.mxu1  ;;  %v4343_v48 = vmul.f32 %v7086_v41, %v3911_v5  ;;  %v3599_v27 = vadd.f32 %v3480_v36, %v7011_v2 }
 0x1e0   : > { %v4374_v55 = vadd.f32 %v4373_v38, %v4339_v61  ;;  %v4451_v17 = vadd.f32 %v4416_v56, %v4415_v62  ;;  %v4341_v51 = vmul.f32 %v7073_v19, %v3909_v29  ;;  %v3912_v34 = vadd.f32 %v5521_v9, %v3598_v18  ;;  %v7148_v11 = vpop.permute.xlu0 %4239 }
 0x1e1   : > { %v3781_v58 = vpop.f32.mrf.mxu0  ;;  %v3483_v54 = vpop.f32.mrf.mxu1 }
 0x1e2   : > { %v4452_v28 = vadd.f32 %v4451_v17, %v4417_v59  ;;  %v4375_v7 = vadd.f32 %v4374_v55, %v4340_v10  ;;  %v3910_v16 = vadd.f32 %v3781_v58, %v3596_v14  ;;  %v4419_v57 = vmul.f32 %v4341_v51, %v3909_v29  ;;  %v7151_v17 = vpop.permute.xlu1 %4244 }
 0x1e3   : > { %v4948_v40 = vpack.c.bf16 %v3912_v34, %v3911_v5  ;;  %v5524_v61 = vpop.f32.mrf.mxu0  ;;  %v5490_v49 = vpop.f32.mrf.mxu1  ;;  %v3601_v59 = vadd.f32 %v5486_v35, %v7008_v20  ;;  %v3602_v55 = vadd.f32 %v5487_v42, %v7014_v43  ;;  %v4344_v10 = vmul.f32 %v7091_v23, %v3912_v34 }
 0x1e4   : > { %v4376_v19 = vadd.f32 %v4375_v7, %v4341_v51  ;;  %v4453_v13 = vadd.f32 %v4452_v28, %v4418_v24  ;;  %v4943_v18 = vpack.c.bf16 %v3910_v16, %v3909_v29  ;;  %v4342_v62 = vmul.f32 %v7078_v26, %v3910_v16 }
 0x1e5   : > { %5022 = vst [vmem:[%s7121_s13 + $0x18] sm:$0xff] %v4948_v40   ;;  %v3794_v41 = vpop.f32.mrf.mxu0  ;;  %v3496_v36 = vpop.f32.mrf.mxu1  ;;  %v4421_v29 = vmul.f32 %v4343_v48, %v3911_v5  ;;  %v3915_v14 = vadd.f32 %v5524_v61, %v3601_v59  ;;  %v3600_v42 = vadd.f32 %v3483_v54, %v7017_v1  ;;  %v4422_v24 = vmul.f32 %v4344_v10, %v3912_v34 }
 0x1e6   : > { %v4454_v2 = vadd.f32 %v4453_v13, %v4419_v57  ;;  %5021 = vst [vmem:[%s7121_s13 + $0x10] sm:$0xff] %v4943_v18   ;;  %v4377_v38 = vadd.f32 %v4376_v19, %v4342_v62  ;;  %v4420_v56 = vmul.f32 %v4342_v62, %v3910_v16  ;;  %v3913_v9 = vadd.f32 %v3794_v41, %v3599_v27  ;;  %v7155_v40 = vpop.permute.xlu0 %4249  ;;  %v7161_v62 = vpop.permute.xlu1 %4254 }
 0x1e7   : > { %v5525_v26 = vpop.f32.mrf.mxu0  ;;  %v5491_v51 = vpop.f32.mrf.mxu1  ;;  %v4347_v1 = vmul.f32 %v7108_v0, %v3915_v14  ;;  %v3605_v59 = vadd.f32 %v5490_v49, %v7020_v25 }
 0x1e8   : > { %v4378_v20 = vadd.f32 %v4377_v38, %v4343_v48  ;;  %v4455_v35 = vadd.f32 %v4454_v2, %v4420_v56  ;;  %v4345_v43 = vmul.f32 %v7098_v32, %v3913_v9  ;;  %v3916_v23 = vadd.f32 %v5525_v26, %v3602_v55 }
 0x1e9   : > { %v3797_v58 = vpop.f32.mrf.mxu0  ;;  %v3499_v27 = vpop.f32.mrf.mxu1  ;;  %v3603_v48 = vadd.f32 %v3496_v36, %v7023_v6  ;;  %v4425_v26 = vmul.f32 %v4347_v1, %v3915_v14 }
 0x1ea   : > { %v4456_v28 = vadd.f32 %v4455_v35, %v4421_v29  ;;  %v4379_v7 = vadd.f32 %v4378_v20, %v4344_v10  ;;  %v4958_v16 = vpack.c.bf16 %v3916_v23, %v3915_v14  ;;  %v3914_v5 = vadd.f32 %v3797_v58, %v3600_v42  ;;  %v7169_v35 = vpop.permute.xlu0 %4259 }
 0x1eb   : > { %v5528_v57 = vpop.f32.mrf.mxu0  ;;  %v4423_v32 = vmul.f32 %v4345_v43, %v3913_v9  ;;  %v5494_v13 = vpop.f32.mrf.mxu1  ;;  %v3606_v10 = vadd.f32 %v5491_v51, %v7026_v52  ;;  %v4348_v2 = vmul.f32 %v7113_v47, %v3916_v23  ;;  %v3604_v0 = vadd.f32 %v3499_v27, %v7029_v50 }
 0x1ec   : > { %v4380_v61 = vadd.f32 %v4379_v7, %v4345_v43  ;;  %v4457_v19 = vadd.f32 %v4456_v28, %v4422_v24  ;;  %5024 = vst [vmem:[%s7121_s13 + $0x28] sm:$0xff] %v4958_v16   ;;  %v4953_v54 = vpack.c.bf16 %v3914_v5, %v3913_v9  ;;  %v4346_v34 = vmul.f32 %v7102_v33, %v3914_v5  ;;  %v7171_v28 = vpop.permute.xlu1 %4264 }
 0x1ed   : > { %v3810_v18 = vpop.f32.mrf.mxu0  ;;  %v3512_v6 = vpop.f32.mrf.mxu1  ;;  %v3919_v9 = vadd.f32 %v5528_v57, %v3605_v59  ;;  %v4426_v42 = vmul.f32 %v4348_v2, %v3916_v23  ;;  %v3609_v23 = vadd.f32 %v5494_v13, %v7032_v15 }
 0x1ee   : > { %v4458_v55 = vadd.f32 %v4457_v19, %v4423_v32  ;;  %v3917_v41 = vadd.f32 %v3810_v18, %v3603_v48  ;;  %5023 = vst [vmem:[%s7121_s13 + $0x20] sm:$0xff] %v4953_v54   ;;  %v4381_v38 = vadd.f32 %v4380_v61, %v4346_v34  ;;  %v4424_v56 = vmul.f32 %v4346_v34, %v3914_v5  ;;  %v4270_v59 = vpop.permute.xlu0 %4269 }
 0x1ef   : > { %v5529_v36 = vpop.f32.mrf.mxu0  ;;  %v5495_v33 = vpop.f32.mrf.mxu1  ;;  %v3607_v7 = vadd.f32 %v3512_v6, %v7035_v31  ;;  %v4351_v27 = vmul.f32 %v7135_v53, %v3919_v9 }
 0x1f0   : > { %v3920_v29 = vadd.f32 %v5529_v36, %v3606_v10  ;;  %v4382_v20 = vadd.f32 %v4381_v38, %v4347_v1  ;;  %v4459_v25 = vadd.f32 %v4458_v55, %v4424_v56  ;;  %v4349_v49 = vmul.f32 %v7123_v39, %v3917_v41  ;;  %v7183_v38 = vpop.permute.xlu1 %4274 }
 0x1f1   : > { %v3813_v52 = vpop.f32.mrf.mxu0  ;;  %v3515_v47 = vpop.f32.mrf.mxu1  ;;  %v3610_v32 = vadd.f32 %v5495_v33, %v7038_v4 }
 0x1f2   : > { %v4968_v43 = vpack.c.bf16 %v3920_v29, %v3919_v9  ;;  %v3918_v51 = vadd.f32 %v3813_v52, %v3604_v0  ;;  %v4460_v58 = vadd.f32 %v4459_v25, %v4425_v26  ;;  %v4383_v24 = vadd.f32 %v4382_v20, %v4348_v2 }
 0x1f3   : > { %v5532_v50 = vpop.f32.mrf.mxu0  ;;  %v5498_v39 = vpop.f32.mrf.mxu1  ;;  %v4427_v57 = vmul.f32 %v4349_v49, %v3917_v41  ;;  %v4352_v34 = vmul.f32 %v7139_v8, %v3920_v29  ;;  %v3608_v53 = vadd.f32 %v3515_v47, %v7041_v60 }
 0x1f4   : > { %5026 = vst [vmem:[%s7121_s13 + $0x38] sm:$0xff] %v4968_v43   ;;  %v4963_v14 = vpack.c.bf16 %v3918_v51, %v3917_v41  ;;  %v4350_v16 = vmul.f32 %v7126_v22, %v3918_v51  ;;  %v4384_v5 = vadd.f32 %v4383_v24, %v4349_v49  ;;  %v4461_v48 = vadd.f32 %v4460_v58, %v4426_v42  ;;  %v4280_v42 = vpop.permute.xlu0 %4279 }
 0x1f5   : > { %v3826_v61 = vpop.f32.mrf.mxu0  ;;  %v3528_v1 = vpop.f32.mrf.mxu1  ;;  %v3923_v55 = vadd.f32 %v5532_v50, %v3609_v23  ;;  %v4429_v41 = vmul.f32 %v4351_v27, %v3919_v9  ;;  %v4430_v0 = vmul.f32 %v4352_v34, %v3920_v29  ;;  %v3613_v29 = vadd.f32 %v5498_v39, %v7044_v63 }
 0x1f6   : > { %5025 = vst [vmem:[%s7121_s13 + $0x30] sm:$0xff] %v4963_v14   ;;  %v4428_v19 = vmul.f32 %v4350_v16, %v3918_v51  ;;  %v3921_v54 = vadd.f32 %v3826_v61, %v3607_v7  ;;  %v4462_v31 = vadd.f32 %v4461_v48, %v4427_v57  ;;  %v4385_v18 = vadd.f32 %v4384_v5, %v4350_v16 }
 0x1f7   : > { %v5533_v22 = vpop.f32.mrf.mxu0  ;;  %v5499_v10 = vpop.f32.mrf.mxu1  ;;  %v3611_v20 = vadd.f32 %v3528_v1, %v7049_v21 }
 0x1f8   : > { %v3924_v6 = vadd.f32 %v5533_v22, %v3610_v32  ;;  %v4386_v15 = vadd.f32 %v4385_v18, %v4351_v27  ;;  %v4463_v13 = vadd.f32 %v4462_v31, %v4428_v19  ;;  %v4353_v4 = vmul.f32 %v7148_v11, %v3921_v54  ;;  %v4285_v27 = vpop.permute.xlu1 %4284  ;;  %v4290_v18 = vpop.permute.xlu0 %4289 }
 0x1f9   : > { %v3829_v2 = vpop.f32.mrf.mxu0  ;;  %v3531_v36 = vpop.f32.mrf.mxu1  ;;  %v4355_v11 = vmul.f32 %v7155_v40, %v3923_v55  ;;  %v3614_v58 = vadd.f32 %v5499_v10, %v7054_v12 }
 0x1fa   : > { %v4978_v56 = vpack.c.bf16 %v3924_v6, %v3923_v55  ;;  %v3922_v8 = vadd.f32 %v3829_v2, %v3608_v53  ;;  %v4464_v33 = vadd.f32 %v4463_v13, %v4429_v41  ;;  %v4387_v26 = vadd.f32 %v4386_v15, %v4352_v34 }
 0x1fb   : > { %v5536_v60 = vpop.f32.mrf.mxu0  ;;  %v5502_v49 = vpop.f32.mrf.mxu1  ;;  %v4431_v43 = vmul.f32 %v4353_v4, %v3921_v54  ;;  %v4356_v14 = vmul.f32 %v7161_v62, %v3924_v6  ;;  %v3612_v40 = vadd.f32 %v3531_v36, %v7057_v30  ;;  %v4433_v61 = vmul.f32 %v4355_v11, %v3923_v55 }
 0x1fc   : > { %5028 = vst [vmem:[%s7121_s13 + $0x48] sm:$0xff] %v4978_v56   ;;  %v4973_v25 = vpack.c.bf16 %v3922_v8, %v3921_v54  ;;  %v4354_v9 = vmul.f32 %v7151_v17, %v3922_v8  ;;  %v4388_v52 = vadd.f32 %v4387_v26, %v4353_v4  ;;  %v4465_v47 = vadd.f32 %v4464_v33, %v4430_v0  ;;  %v4295_v4 = vpop.permute.xlu1 %4294 }
 0x1fd   : > { %v3842_v51 = vpop.f32.mrf.mxu0  ;;  %v3544_v50 = vpop.f32.mrf.mxu1  ;;  %v3927_v5 = vadd.f32 %v5536_v60, %v3613_v29  ;;  %v4434_v54 = vmul.f32 %v4356_v14, %v3924_v6  ;;  %v3617_v6 = vadd.f32 %v5502_v49, %v7062_v46 }
 0x1fe   : > { %5027 = vst [vmem:[%s7121_s13 + $0x40] sm:$0xff] %v4973_v25   ;;  %v4432_v24 = vmul.f32 %v4354_v9, %v3922_v8  ;;  %v3925_v21 = vadd.f32 %v3842_v51, %v3611_v20  ;;  %v4466_v7 = vadd.f32 %v4465_v47, %v4431_v43  ;;  %v4389_v17 = vadd.f32 %v4388_v52, %v4354_v9 }
 0x1ff   : > { %v5537_v16 = vpop.f32.mrf.mxu0  ;;  %v5503_v57 = vpop.f32.mrf.mxu1  ;;  %v3615_v30 = vadd.f32 %v3544_v50, %v7067_v37  ;;  %v4359_v10 = vmul.f32 %v4270_v59, %v3927_v5 }
 0x200   : > { %v3928_v48 = vadd.f32 %v5537_v16, %v3614_v58  ;;  %v4390_v63 = vadd.f32 %v4389_v17, %v4355_v11  ;;  %v4467_v39 = vadd.f32 %v4466_v7, %v4432_v24  ;;  %v4357_v12 = vmul.f32 %v7169_v35, %v3925_v21  ;;  %v4300_v11 = vpop.permute.xlu0 %4299  ;;  %v4305_v24 = vpop.permute.xlu1 %4304 }
 0x201   : > { %v3845_v23 = vpop.f32.mrf.mxu0  ;;  %v3547_v19 = vpop.f32.mrf.mxu1  ;;  %v3618_v2 = vadd.f32 %v5503_v57, %v7070_v45  ;;  %v4437_v25 = vmul.f32 %v4359_v10, %v3927_v5 }
 0x202   : > { %v4988_v32 = vpack.c.bf16 %v3928_v48, %v3927_v5  ;;  %v3926_v1 = vadd.f32 %v3845_v23, %v3612_v40  ;;  %v4468_v62 = vadd.f32 %v4467_v39, %v4433_v61  ;;  %v4391_v31 = vadd.f32 %v4390_v63, %v4356_v14  ;;  %v7296_v5 = vld [vmem:[#allocation7_spill] sm:$0xff]  ;;  %v7297_v61 = vld [vmem:[#allocation8_spill] sm:$0xff] }
 0x203   : > { %v5540_v34 = vpop.f32.mrf.mxu0  ;;  %v5506_v55 = vpop.f32.mrf.mxu1  ;;  %v4435_v35 = vmul.f32 %v4357_v12, %v3925_v21  ;;  %v4360_v0 = vmul.f32 %v7183_v38, %v3928_v48  ;;  %v3616_v59 = vadd.f32 %v3547_v19, %v7075_v3 }
 0x204   : > { %5030 = vst [vmem:[%s7121_s13 + $0x58] sm:$0xff] %v4988_v32   ;;  %v4983_v22 = vpack.c.bf16 %v3926_v1, %v3925_v21  ;;  %v4358_v53 = vmul.f32 %v7171_v28, %v3926_v1  ;;  %v4392_v41 = vadd.f32 %v4391_v31, %v4357_v12  ;;  %v4469_v15 = vadd.f32 %v4468_v62, %v4434_v54 }
 0x205   : > { %v3858_v13 = vpop.f32.mrf.mxu0  ;;  %v3560_v36 = vpop.f32.mrf.mxu1  ;;  %v3931_v26 = vadd.f32 %v5540_v34, %v3617_v6  ;;  %v4438_v51 = vmul.f32 %v4360_v0, %v3928_v48  ;;  %v3621_v57 = vadd.f32 %v5506_v55, %v7296_v5 }
 0x206   : > { %5029 = vst [vmem:[%s7121_s13 + $0x50] sm:$0xff] %v4983_v22   ;;  %v4436_v56 = vmul.f32 %v4358_v53, %v3926_v1  ;;  %v3929_v8 = vadd.f32 %v3858_v13, %v3615_v30  ;;  %v4470_v37 = vadd.f32 %v4469_v15, %v4435_v35  ;;  %v4393_v33 = vadd.f32 %v4392_v41, %v4358_v53  ;;  %v4310_v1 = vpop.permute.xlu0 %4309 }
 0x207   : > { %v5541_v28 = vpop.f32.mrf.mxu0  ;;  %v5507_v60 = vpop.f32.mrf.mxu1  ;;  %v3619_v3 = vadd.f32 %v3560_v36, %v7083_v44  ;;  %v4363_v14 = vmul.f32 %v4290_v18, %v3931_v26 }
 0x208   : > { %v3932_v20 = vadd.f32 %v5541_v28, %v3618_v2  ;;  %v4394_v9 = vadd.f32 %v4393_v33, %v4359_v10  ;;  %v4471_v46 = vadd.f32 %v4470_v37, %v4436_v56  ;;  %v4361_v49 = vmul.f32 %v4280_v42, %v3929_v8  ;;  %v4315_v10 = vpop.permute.xlu1 %4314  ;;  %v7299_v2 = vld [vmem:[#allocation15_spill] sm:$0xff] }
 0x209   : > { %v3861_v45 = vpop.f32.mrf.mxu0  ;;  %v3563_v43 = vpop.f32.mrf.mxu1  ;;  %v3622_v48 = vadd.f32 %v5507_v60, %v7297_v61  ;;  %v4441_v34 = vmul.f32 %v4363_v14, %v3931_v26 }
 0x20a   : > { %v4998_v52 = vpack.c.bf16 %v3932_v20, %v3931_v26  ;;  %v3930_v47 = vadd.f32 %v3861_v45, %v3616_v59  ;;  %v4472_v29 = vadd.f32 %v4471_v46, %v4437_v25  ;;  %v4395_v38 = vadd.f32 %v4394_v9, %v4360_v0  ;;  %v4320_v60 = vpop.permute.xlu0 %4319  ;;  %v7300_v25 = vld [vmem:[#allocation3_spill] sm:$0xff]  ;;  %v7301_v46 = vld [vmem:[#allocation9_spill] sm:$0xff] }
 0x20b   : > { %v5544_v58 = vpop.f32.mrf.mxu0  ;;  %v5510_v7 = vpop.f32.mrf.mxu1  ;;  %v4439_v42 = vmul.f32 %v4361_v49, %v3929_v8  ;;  %v4364_v32 = vmul.f32 %v4295_v4, %v3932_v20 }
 0x20c   : > { %5032 = vst [vmem:[%s7121_s13 + $0x68] sm:$0xff] %v4998_v52   ;;  %v4993_v50 = vpack.c.bf16 %v3930_v47, %v3929_v8  ;;  %v4362_v21 = vmul.f32 %v4285_v27, %v3930_v47  ;;  %v4396_v17 = vadd.f32 %v4395_v38, %v4361_v49  ;;  %v4473_v16 = vadd.f32 %v4472_v29, %v4438_v51  ;;  %v7298_v27 = vld [vmem:[#allocation2_spill] sm:$0xff]  ;;  %v4325_v51 = vpop.permute.xlu1 %4324  ;;  %v7302_v29 = vld [vmem:[#allocation16_spill] sm:$0xff] }
 0x20d   : > { %v3874_v40 = vpop.f32.mrf.mxu0  ;;  %v3576_v39 = vpop.f32.mrf.mxu1  ;;  %v3620_v54 = vadd.f32 %v3563_v43, %v7298_v27  ;;  %v3935_v62 = vadd.f32 %v5544_v58, %v3621_v57  ;;  %v4442_v15 = vmul.f32 %v4364_v32, %v3932_v20  ;;  %v3625_v9 = vadd.f32 %v5510_v7, %v7300_v25 }
 0x20e   : > { %5031 = vst [vmem:[%s7121_s13 + $0x60] sm:$0xff] %v4993_v50   ;;  %v4440_v63 = vmul.f32 %v4362_v21, %v3930_v47  ;;  %v3933_v12 = vadd.f32 %v3874_v40, %v3619_v3  ;;  %v4474_v23 = vadd.f32 %v4473_v16, %v4439_v42  ;;  %v4397_v44 = vadd.f32 %v4396_v17, %v4362_v21  ;;  %v4330_v57 = vpop.permute.xlu0 %4329 }
 0x20f   : > { %v5545_v19 = vpop.f32.mrf.mxu0  ;;  %v5511_v53 = vpop.f32.mrf.mxu1  ;;  %v3623_v56 = vadd.f32 %v3576_v39, %v7299_v2  ;;  %v4367_v37 = vmul.f32 %v4310_v1, %v3935_v62 }
 0x210   : > { %v3936_v31 = vadd.f32 %v5545_v19, %v3622_v48  ;;  %v4398_v18 = vadd.f32 %v4397_v44, %v4363_v14  ;;  %v4475_v30 = vadd.f32 %v4474_v23, %v4440_v63  ;;  %v4365_v22 = vmul.f32 %v4300_v11, %v3933_v12 }
 0x211   : > { %v3877_v55 = vpop.f32.mrf.mxu0  ;;  %v3579_v59 = vpop.f32.mrf.mxu1  ;;  %v3626_v20 = vadd.f32 %v5511_v53, %v7301_v46  ;;  %v4445_v3 = vmul.f32 %v4367_v37, %v3935_v62 }
 0x212   : > { %v5008_v41 = vpack.c.bf16 %v3936_v31, %v3935_v62  ;;  %v3934_v35 = vadd.f32 %v3877_v55, %v3620_v54  ;;  %v4476_v13 = vadd.f32 %v4475_v30, %v4441_v34  ;;  %v4399_v4 = vadd.f32 %v4398_v18, %v4364_v32  ;;  %v4335_v32 = vpop.permute.xlu1 %4334 }
 0x213   : > { %v5548_v6 = vpop.f32.mrf.mxu0  ;;  %v4443_v33 = vmul.f32 %v4365_v22, %v3933_v12  ;;  %v4368_v52 = vmul.f32 %v4315_v10, %v3936_v31  ;;  %v3624_v38 = vadd.f32 %v3579_v59, %v7302_v29 }
 0x214   : > { %5034 = vst [vmem:[%s7121_s13 + $0x78] sm:$0xff] %v5008_v41   ;;  %v5003_v36 = vpack.c.bf16 %v3934_v35, %v3933_v12  ;;  %v4366_v8 = vmul.f32 %v4305_v24, %v3934_v35  ;;  %v4400_v0 = vadd.f32 %v4399_v4, %v4365_v22  ;;  %v4477_v28 = vadd.f32 %v4476_v13, %v4442_v15 }
 0x215   : > { %v3890_v26 = vpop.f32.mrf.mxu0  ;;  %v3939_v58 = vadd.f32 %v5548_v6, %v3625_v9  ;;  %v4446_v16 = vmul.f32 %v4368_v52, %v3936_v31 }
 0x216   : > { %5033 = vst [vmem:[%s7121_s13 + $0x70] sm:$0xff] %v5003_v36   ;;  %v4444_v49 = vmul.f32 %v4366_v8, %v3934_v35  ;;  %v3937_v45 = vadd.f32 %v3890_v26, %v3623_v56  ;;  %v4478_v11 = vadd.f32 %v4477_v28, %v4443_v33  ;;  %v4401_v43 = vadd.f32 %v4400_v0, %v4366_v8 }
 0x217   : > { %v5549_v47 = vpop.f32.mrf.mxu0  ;;  %v4371_v63 = vmul.f32 %v4330_v57, %v3939_v58 }
 0x218   : > { %v3940_v24 = vadd.f32 %v5549_v47, %v3626_v20  ;;  %v4402_v50 = vadd.f32 %v4401_v43, %v4367_v37  ;;  %v4479_v21 = vadd.f32 %v4478_v11, %v4444_v49  ;;  %v4369_v14 = vmul.f32 %v4320_v60, %v3937_v45 }
 0x219   : > { %v3893_v7 = vpop.f32.mrf.mxu0  ;;  %v4449_v54 = vmul.f32 %v4371_v63, %v3939_v58 }
 0x21a   : > { %v5018_v17 = vpack.c.bf16 %v3940_v24, %v3939_v58  ;;  %v3938_v42 = vadd.f32 %v3893_v7, %v3624_v38  ;;  %v4480_v40 = vadd.f32 %v4479_v21, %v4445_v3  ;;  %v4403_v5 = vadd.f32 %v4402_v50, %v4368_v52 }
 0x21b   : > { %v4447_v12 = vmul.f32 %v4369_v14, %v3937_v45  ;;  %v4372_v1 = vmul.f32 %v4335_v32, %v3940_v24 }
 0x21c   : > { %5036 = vst [vmem:[%s7121_s13 + $0x88] sm:$0xff] %v5018_v17   ;;  %v5013_v61 = vpack.c.bf16 %v3938_v42, %v3937_v45  ;;  %v4370_v48 = vmul.f32 %v4325_v51, %v3938_v42  ;;  %v4404_v39 = vadd.f32 %v4403_v5, %v4369_v14  ;;  %v4481_v23 = vadd.f32 %v4480_v40, %v4446_v16 }
 0x21d   : > { %v4450_v34 = vmul.f32 %v4372_v1, %v3940_v24 }
 0x21e   : > { %5035 = vst [vmem:[%s7121_s13 + $0x80] sm:$0xff] %v5013_v61   ;;  %v4448_v44 = vmul.f32 %v4370_v48, %v3938_v42  ;;  %v4482_v19 = vadd.f32 %v4481_v23, %v4447_v12  ;;  %v4405_v27 = vadd.f32 %v4404_v39, %v4370_v48 }
 0x220   : > { %v4406_v62 = vadd.f32 %v4405_v27, %v4371_v63  ;;  %v4483_v31 = vadd.f32 %v4482_v19, %v4448_v44 }
 0x222   : > { %v4407_v18 = vadd.f32 %v4406_v62, %v4372_v1  ;;  %v4484_v30 = vadd.f32 %v4483_v31, %v4449_v54 }
 0x224   : > { %v4408_v22 = vrot.slane %v4407_v18, 4  ;;  %v4485_v53 = vadd.f32 %v4484_v30, %v4450_v34 }
 0x226   : > { %v4409_v55 = vadd.f32 %v4408_v22, %v4407_v18  ;;  %v4486_v10 = vrot.slane %v4485_v53, 4 }
 0x228   : > { %v4410_v41 = vrot.slane %v4409_v55, 2  ;;  %v4487_v35 = vadd.f32 %v4486_v10, %v4485_v53 }
 0x22a   : > { %v4411_v15 = vadd.f32 %v4410_v41, %v4409_v55  ;;  %v4488_v13 = vrot.slane %v4487_v35, 2 }
 0x22c   : > { %v4412_v4 = vrot.slane %v4411_v15, 1  ;;  %v4489_v6 = vadd.f32 %v4488_v13, %v4487_v35 }
 0x22e   : > { %v4413_v2 = vadd.f32 %v4412_v4, %v4411_v15  ;;  %v4490_v56 = vrot.slane %v4489_v6, 1 }
 0x230   : > { %4414 = vst [vmem:[%s265_s16] sm:$0x1] %v4413_v2  ;;  %v4491_v36 = vadd.f32 %v4490_v56, %v4489_v6 }
 0x232   : > { %4492 = vst [vmem:[%s268_s19] sm:$0x1] %v4491_v36 }
 0x233 PF: > { %s17_s21 = sadd.s32 1, %s5661_s21  }
 0x234   : > { %p14_p4 = scmp.ge.s32.totalorder %s17_s21, 4  }
 0x236   :  { %16 = sbr.rel (!%p14_p4) target bundleno = 1 (0x1), region = 98 }

</bundles_post_ra>
